<compile_context>
chip_gen: v6e
topology: v6e:2x2x1
jax: 0.10.0
libtpu: 0.0.40
codegen_flags: <defaults>
</compile_context>

<pallas_src>
import functools
import math

import jax
import jax.numpy as jnp
from jax import lax
from jax.experimental import pallas as pl
from jax.experimental.pallas import tpu as pltpu

LN_EPS = 1e-5           # torch.nn.LayerNorm default
NEG_INF = -1e9          # additive mask value (avoids NaN on masked rows)
VMEM_LIMIT = 48 * 1024 * 1024   # below v7x's 64 MiB physical, above 16/32 MiB defaults


def _round_up(x, m):
    return (x + m - 1) // m * m


def _ln(x, g, b):
    mu = jnp.mean(x, axis=-1, keepdims=True)
    var = jnp.mean((x - mu) ** 2, axis=-1, keepdims=True)
    return (x - mu) * lax.rsqrt(var + LN_EPS) * g + b


def _mha_core(q_all, kt_all, v_all, add_mask, wo, bo, num_heads):
    """Per-head scores/softmax/context with one fused output projection.

    q_all  : (rows, D) f32, already scaled
    kt_all : (D, Tk)   f32, K^T in lane-dense layout
    v_all  : (Tk, D)   f32
    add_mask: (1, Tk)  f32 additive key mask or None
    """
    rows, d = q_all.shape
    hd = d // num_heads
    qb = q_all.astype(jnp.bfloat16)
    ktb = kt_all.astype(jnp.bfloat16)
    vb = v_all.astype(jnp.bfloat16)
    ctx = []
    for h in range(num_heads):                         # static unroll over heads
        lo, hi = h * hd, (h + 1) * hd
        s = jnp.dot(qb[:, lo:hi], ktb[lo:hi, :],
                    preferred_element_type=jnp.float32)            # (rows, Tk)
        if add_mask is not None:
            s = s + add_mask
        s = s - jnp.max(s, axis=-1, keepdims=True)
        p = jnp.exp(s)
        p = p * pl.reciprocal(jnp.sum(p, axis=-1, keepdims=True), approx=True)
        ctx.append(jnp.dot(p.astype(jnp.bfloat16), vb[:, lo:hi],
                           preferred_element_type=jnp.float32))     # (rows, hd)
    ctx = jnp.concatenate(ctx, axis=-1)                # (rows, D), lane concat
    return jnp.dot(ctx.astype(jnp.bfloat16), wo,
                   preferred_element_type=jnp.float32) + bo


def _attn_weights(attn_p, norm_p, d):
    """Weight layouts for the fused attention kernels (bf16 for the MXU)."""
    return dict(
        wq=attn_p['wq'].astype(jnp.bfloat16),          # (D, D)
        wkT=attn_p['wk'].T.astype(jnp.bfloat16),       # (D, D): K^T = Wk^T @ x^T
        wv=attn_p['wv'].astype(jnp.bfloat16),          # (D, D)
        wo=attn_p['wo'].astype(jnp.bfloat16),          # (D, D)
        bq=attn_p['bq'].reshape(1, d),
        bkT=attn_p['bk'].reshape(d, 1),
        bv=attn_p['bv'].reshape(1, d),
        bo=attn_p['bo'].reshape(1, d),
        g=norm_p['g'].reshape(1, d),
        b=norm_p['b'].reshape(1, d),
    )


_WEIGHT_SHAPES = lambda d: ([(d, d)] * 4 +                       # wq, wkT, wv, wo
                            [(1, d), (d, 1), (1, d), (1, d),     # bq, bkT, bv, bo
                             (1, d), (1, d)])                    # LN gamma, beta


# ---------------------------------------------------------------------------
# Kernel 1a: cross-attention, single kv tile (plain softmax, no flash scratch)
#            out = LayerNorm(q_in + MHA(q_in, dense_kv, dense_kv))
# ---------------------------------------------------------------------------

def _cross_attn_single_kernel(q_ref, kv_ref, kvt_ref,
                              wq_ref, wkt_ref, wv_ref, wo_ref,
                              bq_ref, bkt_ref, bv_ref, bo_ref,
                              g_ref, be_ref, o_ref,
                              *, num_heads, scale, n_valid, n_keys):
    qx = q_ref[0]                      # (Kq, D) f32
    kv = kv_ref[0]                     # (n_keys, D) bf16
    kvt = kvt_ref[0]                   # (D, n_keys) bf16

    q_all = (jnp.dot(qx.astype(jnp.bfloat16), wq_ref[...],
                     preferred_element_type=jnp.float32) + bq_ref[...]) * scale
    kt_all = jnp.dot(wkt_ref[...], kvt,
                     preferred_element_type=jnp.float32) + bkt_ref[...]   # (D, Tk)
    v_all = jnp.dot(kv, wv_ref[...],
                    preferred_element_type=jnp.float32) + bv_ref[...]     # (Tk, D)

    add_mask = None
    if n_valid < n_keys:               # static branch: mask only right-pad keys
        idx = lax.broadcasted_iota(jnp.int32, (1, n_keys), 1)
        add_mask = jnp.where(idx < n_valid, 0.0, NEG_INF).astype(jnp.float32)

    out = _mha_core(q_all, kt_all, v_all, add_mask,
                    wo_ref[...], bo_ref[...], num_heads)
    o_ref[0] = _ln(qx + out, g_ref[...], be_ref[...])


# ---------------------------------------------------------------------------
# Kernel 1b: cross-attention, flash-style online softmax over kv tiles
# ---------------------------------------------------------------------------

def _cross_attn_flash_kernel(q_ref, kv_ref, kvt_ref,
                             wq_ref, wkt_ref, wv_ref, wo_ref,
                             bq_ref, bkt_ref, bv_ref, bo_ref,
                             g_ref, be_ref, o_ref,
                             q_scr, m_scr, l_scr, acc_scr,
                             *, num_heads, scale, n_valid, n_total, tk):
    kvi = pl.program_id(1)
    qx = q_ref[0]                      # (Kq, D) f32, resident across kv axis
    kv = kv_ref[0]                     # (tk, D) bf16
    kvt = kvt_ref[0]                   # (D, tk) bf16
    d = qx.shape[-1]
    hd = d // num_heads

    @pl.when(kvi == 0)
    def _init():
        m_scr[...] = jnp.full_like(m_scr, -jnp.inf)
        l_scr[...] = jnp.zeros_like(l_scr)
        acc_scr[...] = jnp.zeros_like(acc_scr)
        q_scr[...] = (jnp.dot(qx.astype(jnp.bfloat16), wq_ref[...],
                              preferred_element_type=jnp.float32)
                      + bq_ref[...]) * scale

    kt_all = jnp.dot(wkt_ref[...], kvt,
                     preferred_element_type=jnp.float32) + bkt_ref[...]   # (D, tk)
    v_all = jnp.dot(kv, wv_ref[...],
                    preferred_element_type=jnp.float32) + bv_ref[...]     # (tk, D)

    add_mask = None
    if n_valid < n_total:              # static branch: padding exists
        idx = kvi * tk + lax.broadcasted_iota(jnp.int32, (1, tk), 1)
        add_mask = jnp.where(idx < n_valid, 0.0, NEG_INF).astype(jnp.float32)

    qb = q_scr[...].astype(jnp.bfloat16)
    ktb = kt_all.astype(jnp.bfloat16)
    vb = v_all.astype(jnp.bfloat16)
    for h in range(num_heads):
        lo, hi = h * hd, (h + 1) * hd
        s = jnp.dot(qb[:, lo:hi], ktb[lo:hi, :],
                    preferred_element_type=jnp.float32)                   # (Kq, tk)
        if add_mask is not None:
            s = s + add_mask
        m_prev = m_scr[h]
        m_new = jnp.maximum(m_prev, jnp.max(s, axis=-1, keepdims=True))
        alpha = jnp.exp(m_prev - m_new)
        p = jnp.exp(s - m_new)
        l_scr[h] = alpha * l_scr[h] + jnp.sum(p, axis=-1, keepdims=True)
        acc_scr[h] = alpha * acc_scr[h] + jnp.dot(
            p.astype(jnp.bfloat16), vb[:, lo:hi],
            preferred_element_type=jnp.float32)
        m_scr[h] = m_new

    @pl.when(kvi == pl.num_programs(1) - 1)
    def _finalize():
        ctx = jnp.concatenate(
            [acc_scr[h] * pl.reciprocal(l_scr[h], approx=True)
             for h in range(num_heads)], axis=-1)                         # (Kq, D)
        out = jnp.dot(ctx.astype(jnp.bfloat16), wo_ref[...],
                      preferred_element_type=jnp.float32) + bo_ref[...]
        o_ref[0] = _ln(qx + out, g_ref[...], be_ref[...])


def cross_attention_block(q_x, kv_x, attn_p, norm_p, num_heads, *,
                          max_single_tile=2048, tk=1024):
    """LayerNorm(q + MHA(q, kv, kv)) fused in one pallas_call.

    max_single_tile / tk were sized for 128 MiB VMEM (v5e/v6e); on v7x (64 MiB)
    halve them for large production D.
    """
    B, Kq, D = q_x.shape
    Np = kv_x.shape[1]
    assert D % num_heads == 0
    scale = 1.0 / math.sqrt(D // num_heads)

    np_pad = _round_up(Np, 128)
    single = np_pad <= max_single_tile
    if single:
        tk = np_pad
    else:
        tk = _round_up(min(tk, np_pad), 128)
        np_pad = _round_up(np_pad, tk)
    nkv = np_pad // tk

    kv_pad = jnp.pad(kv_x, ((0, 0), (0, np_pad - Np), (0, 0))).astype(jnp.bfloat16)
    kvt_pad = jnp.swapaxes(kv_pad, 1, 2)          # (B, D, np_pad): lane-dense K^T src

    w = _attn_weights(attn_p, norm_p, D)
    weight_args = (w['wq'], w['wkT'], w['wv'], w['wo'],
                   w['bq'], w['bkT'], w['bv'], w['bo'], w['g'], w['b'])
    wshapes = _WEIGHT_SHAPES(D)

    if single:
        in_specs = ([pl.BlockSpec((1, Kq, D), lambda b: (b, 0, 0)),
                     pl.BlockSpec((1, np_pad, D), lambda b: (b, 0, 0)),
                     pl.BlockSpec((1, D, np_pad), lambda b: (b, 0, 0))]
                    + [pl.BlockSpec(s, lambda b: (0, 0)) for s in wshapes])
        return pl.pallas_call(
            functools.partial(_cross_attn_single_kernel, num_heads=num_heads,
                              scale=scale, n_valid=Np, n_keys=np_pad),
            grid=(B,),
            in_specs=in_specs,
            out_specs=pl.BlockSpec((1, Kq, D), lambda b: (b, 0, 0)),
            out_shape=jax.ShapeDtypeStruct((B, Kq, D), jnp.float32),
            compiler_params=pltpu.CompilerParams(
                dimension_semantics=("parallel",), vmem_limit_bytes=VMEM_LIMIT),
        )(q_x, kv_pad, kvt_pad, *weight_args)

    # flash path (nkv > 1): key axis is the (resident-output) reduction axis
    hd = D // num_heads
    in_specs = ([pl.BlockSpec((1, Kq, D), lambda b, k: (b, 0, 0)),
                 pl.BlockSpec((1, tk, D), lambda b, k: (b, k, 0)),
                 pl.BlockSpec((1, D, tk), lambda b, k: (b, 0, k))]
                + [pl.BlockSpec(s, lambda b, k: (0, 0)) for s in wshapes])
    return pl.pallas_call(
        functools.partial(_cross_attn_flash_kernel, num_heads=num_heads,
                          scale=scale, n_valid=Np, n_total=np_pad, tk=tk),
        grid=(B, nkv),
        in_specs=in_specs,
        out_specs=pl.BlockSpec((1, Kq, D), lambda b, k: (b, 0, 0)),
        out_shape=jax.ShapeDtypeStruct((B, Kq, D), jnp.float32),
        scratch_shapes=[
            pltpu.VMEM((Kq, D), jnp.float32),               # projected, scaled Q
            pltpu.VMEM((num_heads, Kq, 1), jnp.float32),    # running max
            pltpu.VMEM((num_heads, Kq, 1), jnp.float32),    # running sum
            pltpu.VMEM((num_heads, Kq, hd), jnp.float32),   # unnormalized context
        ],
        compiler_params=pltpu.CompilerParams(
            dimension_semantics=("parallel", "arbitrary"),
            vmem_limit_bytes=VMEM_LIMIT),
    )(q_x, kv_pad, kvt_pad, *weight_args)


# ---------------------------------------------------------------------------
# Kernel 2: joint self-attention + LN + FFN + LN, fused, two output streams
#           z = LN2(y + FFN(y)),  y = LN1(x + MHA(x, x, x, key_padding_mask)),
#           x = concat([sparse_visual, text]) built in-kernel
# ---------------------------------------------------------------------------

def _joint_ffn_kernel(sv_ref, svt_ref, tx_ref, txt_ref, tmask_ref,
                      wq_ref, wkt_ref, wv_ref, wo_ref,
                      bq_ref, bkt_ref, bv_ref, bo_ref,
                      g1_ref, be1_ref,
                      w1_ref, b1_ref, w2_ref, b2_ref, g2_ref, be2_ref,
                      ov_ref, ot_ref,
                      *, num_heads, scale, n_vis):
    x = jnp.concatenate([sv_ref[0], tx_ref[0]], axis=0)          # (S, D) f32
    xt = jnp.concatenate([svt_ref[0], txt_ref[0]], axis=1)       # (D, S) f32
    # additive key-padding mask: visual keys always valid, text per text_mask
    add_mask = jnp.concatenate(
        [jnp.zeros((1, n_vis), jnp.float32), tmask_ref[0]], axis=1)   # (1, S)

    xb = x.astype(jnp.bfloat16)
    q_all = (jnp.dot(xb, wq_ref[...], preferred_element_type=jnp.float32)
             + bq_ref[...]) * scale
    kt_all = jnp.dot(wkt_ref[...], xt.astype(jnp.bfloat16),
                     preferred_element_type=jnp.float32) + bkt_ref[...]   # (D, S)
    v_all = jnp.dot(xb, wv_ref[...],
                    preferred_element_type=jnp.float32) + bv_ref[...]     # (S, D)

    attn = _mha_core(q_all, kt_all, v_all, add_mask,
                     wo_ref[...], bo_ref[...], num_heads)
    y = _ln(x + attn, g1_ref[...], be1_ref[...])                  # (S, D)

    # FFN (Linear -> ReLU -> Linear; Dropout = identity in eval) + residual + LN
    h1 = jnp.dot(y.astype(jnp.bfloat16), w1_ref[...],
                 preferred_element_type=jnp.float32) + b1_ref[...]
    h1 = jnp.maximum(h1, 0.0)
    y2 = jnp.dot(h1.astype(jnp.bfloat16), w2_ref[...],
                 preferred_element_type=jnp.float32) + b2_ref[...]
    z = _ln(y + y2, g2_ref[...], be2_ref[...])                    # (S, D)

    ov_ref[0] = z[:n_vis]
    ot_ref[0] = z[n_vis:]


def joint_ffn_block(sv, tx, tmask_add, attn_p, attn_norm_p, ffn_p, ffn_norm_p,
                    num_heads):
    B, K, D = sv.shape
    Lt = tx.shape[1]
    Dh = ffn_p['w1'].shape[1]
    assert D % num_heads == 0
    scale = 1.0 / math.sqrt(D // num_heads)

    sv_t = jnp.swapaxes(sv, 1, 2)     # (B, D, K): lane-dense K^T source (tiny)
    tx_t = jnp.swapaxes(tx, 1, 2)     # (B, D, Lt)

    w = _attn_weights(attn_p, attn_norm_p, D)
    args = (sv, sv_t, tx, tx_t, tmask_add,
            w['wq'], w['wkT'], w['wv'], w['wo'],
            w['bq'], w['bkT'], w['bv'], w['bo'], w['g'], w['b'],
            ffn_p['w1'].astype(jnp.bfloat16), ffn_p['b1'].reshape(1, Dh),
            ffn_p['w2'].astype(jnp.bfloat16), ffn_p['b2'].reshape(1, D),
            ffn_norm_p['g'].reshape(1, D), ffn_norm_p['b'].reshape(1, D))

    const_shapes = (_WEIGHT_SHAPES(D)
                    + [(D, Dh), (1, Dh), (Dh, D), (1, D), (1, D), (1, D)])
    in_specs = ([pl.BlockSpec((1, K, D), lambda b: (b, 0, 0)),
                 pl.BlockSpec((1, D, K), lambda b: (b, 0, 0)),
                 pl.BlockSpec((1, Lt, D), lambda b: (b, 0, 0)),
                 pl.BlockSpec((1, D, Lt), lambda b: (b, 0, 0)),
                 pl.BlockSpec((1, 1, Lt), lambda b: (b, 0, 0))]
                + [pl.BlockSpec(s, lambda b: (0, 0)) for s in const_shapes])

    return pl.pallas_call(
        functools.partial(_joint_ffn_kernel, num_heads=num_heads,
                          scale=scale, n_vis=K),
        grid=(B,),
        in_specs=in_specs,
        out_specs=[pl.BlockSpec((1, K, D), lambda b: (b, 0, 0)),
                   pl.BlockSpec((1, Lt, D), lambda b: (b, 0, 0))],
        out_shape=(jax.ShapeDtypeStruct((B, K, D), jnp.float32),
                   jax.ShapeDtypeStruct((B, Lt, D), jnp.float32)),
        compiler_params=pltpu.CompilerParams(
            dimension_semantics=("parallel",), vmem_limit_bytes=VMEM_LIMIT),
    )(*args)


# ---------------------------------------------------------------------------
# Forward pass (matches DenseToSparseTransformerLayer.forward, eval mode)
# ---------------------------------------------------------------------------

def dense_to_sparse_transformer_layer(params, sparse_visual_feats, dense_visual_feats,
                                      text_feats, text_mask=None, *, num_heads):
    B, Kq, D = sparse_visual_feats.shape
    Lt = text_feats.shape[1]

    # 1) cross-attention + residual + LayerNorm (fused)
    sv = cross_attention_block(sparse_visual_feats, dense_visual_feats,
                               params['cross_attn'], params['cross_norm'], num_heads)

    # 2+3) joint self-attention + LN + FFN + LN, fused; concat done in-kernel
    if text_mask is None:
        text_mask = jnp.ones((B, Lt), dtype=jnp.bool_)
    tmask_add = jnp.where(text_mask, 0.0, NEG_INF).astype(jnp.float32)[:, None, :]

    enhanced_visual, enhanced_text = joint_ffn_block(
        sv, text_feats, tmask_add,
        params['self_attn'], params['self_norm'],
        params['ffn'], params['ffn_norm'], num_heads)
    return enhanced_visual, enhanced_text


# ---------------------------------------------------------------------------
# Parameters
# ---------------------------------------------------------------------------

def init_params(key, d):
    ks = jax.random.split(key, 4)

    def lin(k, din, dout):
        kw, kb = jax.random.split(k)
        bound = 1.0 / math.sqrt(din)
        return {'w': jax.random.uniform(kw, (din, dout), jnp.float32, -bound, bound),
                'b': jax.random.uniform(kb, (dout,), jnp.float32, -bound, bound)}

    def mha(k):
        kq, kk, kv, ko = jax.random.split(k, 4)
        lq, lk, lv, lo = lin(kq, d, d), lin(kk, d, d), lin(kv, d, d), lin(ko, d, d)
        return {'wq': lq['w'], 'bq': lq['b'], 'wk': lk['w'], 'bk': lk['b'],
                'wv': lv['w'], 'bv': lv['b'], 'wo': lo['w'], 'bo': lo['b']}

    ones = jnp.ones((d,), jnp.float32)
    zeros = jnp.zeros((d,), jnp.float32)
    f1 = lin(jax.random.fold_in(ks[2], 0), d, 4 * d)
    f2 = lin(jax.random.fold_in(ks[2], 1), 4 * d, d)
    return {
        'cross_attn': mha(ks[0]), 'cross_norm': {'g': ones, 'b': zeros},
        'self_attn': mha(ks[1]), 'self_norm': {'g': ones, 'b': zeros},
        'ffn': {'w1': f1['w'], 'b1': f1['b'], 'w2': f2['w'], 'b2': f2['b']},
        'ffn_norm': {'g': ones, 'b': zeros},
    }


# ---------------------------------------------------------------------------
# Main
# ---------------------------------------------------------------------------

if __name__ == "__main__":
    B, Np, K, Lt, D, H = 2, 256, 16, 16, 64, 4
    key = jax.random.PRNGKey(0)
    ks, kd, kt, kw = jax.random.split(key, 4)

    sparse_visual = jax.random.normal(ks, (B, K, D), jnp.float32)
    dense_visual = jax.random.normal(kd, (B, Np, D), jnp.float32)
    text_feats = jax.random.normal(kt, (B, Lt, D), jnp.float32)
    lengths = jnp.array([Lt, Lt - 3], dtype=jnp.int32)
    text_mask = jnp.arange(Lt)[None, :] < lengths[:, None]     # [B, Lt] bool

    params = init_params(kw, D)

    fwd = jax.jit(functools.partial(dense_to_sparse_transformer_layer, num_heads=H))
    enhanced_visual, enhanced_text = fwd(params, sparse_visual, dense_visual,
                                         text_feats, text_mask)
    jax.block_until_ready(enhanced_visual)
    jax.block_until_ready(enhanced_text)

    assert enhanced_visual.shape == (B, K, D)
    assert enhanced_text.shape == (B, Lt, D)
    assert bool(jnp.isfinite(enhanced_visual).all())
    assert bool(jnp.isfinite(enhanced_text).all())

    # Exercise the flash (multi kv-tile) cross-attention path too and check it
    # agrees with the single-tile specialization (both bf16 MXU; diffs ~1e-3).
    single = jax.jit(functools.partial(cross_attention_block, num_heads=H))(
        sparse_visual, dense_visual, params['cross_attn'], params['cross_norm'])
    flash = jax.jit(functools.partial(cross_attention_block, num_heads=H,
                                      max_single_tile=0, tk=128))(
        sparse_visual, dense_visual, params['cross_attn'], params['cross_norm'])
    jax.block_until_ready(flash)
    assert bool(jnp.isfinite(flash).all())
    assert bool(jnp.allclose(single, flash, atol=5e-2, rtol=5e-2))

    print("KERNEL_OK")
</pallas_src>

<mosaic_0001>
module attributes {stable_mosaic.version = 11 : i64} {
  func.func @_cross_attn_single_kernel(%arg0: i32, %arg1: memref<1x16x64xf32, #tpu.memory_space<vmem>>, %arg2: memref<1x256x64xbf16, #tpu.memory_space<vmem>>, %arg3: memref<1x64x256xbf16, #tpu.memory_space<vmem>>, %arg4: memref<64x64xbf16, #tpu.memory_space<vmem>>, %arg5: memref<64x64xbf16, #tpu.memory_space<vmem>>, %arg6: memref<64x64xbf16, #tpu.memory_space<vmem>>, %arg7: memref<64x64xbf16, #tpu.memory_space<vmem>>, %arg8: memref<1x64xf32, #tpu.memory_space<vmem>>, %arg9: memref<64x1xf32, #tpu.memory_space<vmem>>, %arg10: memref<1x64xf32, #tpu.memory_space<vmem>>, %arg11: memref<1x64xf32, #tpu.memory_space<vmem>>, %arg12: memref<1x64xf32, #tpu.memory_space<vmem>>, %arg13: memref<1x64xf32, #tpu.memory_space<vmem>>, %arg14: memref<1x16x64xf32, #tpu.memory_space<vmem>>) attributes {dimension_semantics = [#tpu.dimension_semantics<parallel>], iteration_bounds = array<i64: 2>, scalar_prefetch = 0 : i64, scratch_operands = 0 : i64, tpu.core_type = #tpu.core_type<tc>, window_params = [{transform_indices = @transform_0, window_bounds = array<i64: 1, 16, 64>}, {transform_indices = @transform_1, window_bounds = array<i64: 1, 256, 64>}, {transform_indices = @transform_2, window_bounds = array<i64: 1, 64, 256>}, {pipeline_mode = #tpu.pipeline_mode<synchronous>, transform_indices = @transform_3, window_bounds = array<i64: 64, 64>}, {pipeline_mode = #tpu.pipeline_mode<synchronous>, transform_indices = @transform_4, window_bounds = array<i64: 64, 64>}, {pipeline_mode = #tpu.pipeline_mode<synchronous>, transform_indices = @transform_5, window_bounds = array<i64: 64, 64>}, {pipeline_mode = #tpu.pipeline_mode<synchronous>, transform_indices = @transform_6, window_bounds = array<i64: 64, 64>}, {pipeline_mode = #tpu.pipeline_mode<synchronous>, transform_indices = @transform_7, window_bounds = array<i64: 1, 64>}, {pipeline_mode = #tpu.pipeline_mode<synchronous>, transform_indices = @transform_8, window_bounds = array<i64: 64, 1>}, {pipeline_mode = #tpu.pipeline_mode<synchronous>, transform_indices = @transform_9, window_bounds = array<i64: 1, 64>}, {pipeline_mode = #tpu.pipeline_mode<synchronous>, transform_indices = @transform_10, window_bounds = array<i64: 1, 64>}, {pipeline_mode = #tpu.pipeline_mode<synchronous>, transform_indices = @transform_11, window_bounds = array<i64: 1, 64>}, {pipeline_mode = #tpu.pipeline_mode<synchronous>, transform_indices = @transform_12, window_bounds = array<i64: 1, 64>}, {transform_indices = @transform_13, window_bounds = array<i64: 1, 16, 64>}]} {
    %c0 = arith.constant 0 : index
    %c0_0 = arith.constant 0 : index
    %c0_1 = arith.constant 0 : index
    %0 = vector.load %arg1[%c0, %c0_0, %c0_1] : memref<1x16x64xf32, #tpu.memory_space<vmem>>, vector<1x16x64xf32>
    %1 = vector.shape_cast %0 : vector<1x16x64xf32> to vector<16x64xf32>
    %c0_2 = arith.constant 0 : index
    %c0_3 = arith.constant 0 : index
    %c0_4 = arith.constant 0 : index
    %2 = vector.load %arg2[%c0_2, %c0_3, %c0_4] : memref<1x256x64xbf16, #tpu.memory_space<vmem>>, vector<1x256x64xbf16>
    %3 = vector.shape_cast %2 : vector<1x256x64xbf16> to vector<256x64xbf16>
    %c0_5 = arith.constant 0 : index
    %c0_6 = arith.constant 0 : index
    %c0_7 = arith.constant 0 : index
    %4 = vector.load %arg3[%c0_5, %c0_6, %c0_7] : memref<1x64x256xbf16, #tpu.memory_space<vmem>>, vector<1x64x256xbf16>
    %5 = vector.shape_cast %4 : vector<1x64x256xbf16> to vector<64x256xbf16>
    %6 = arith.truncf %1 : vector<16x64xf32> to vector<16x64xbf16>
    %c0_8 = arith.constant 0 : index
    %c0_9 = arith.constant 0 : index
    %7 = vector.load %arg4[%c0_8, %c0_9] : memref<64x64xbf16, #tpu.memory_space<vmem>>, vector<64x64xbf16>
    %cst = arith.constant dense<0.000000e+00> : vector<16x64xf32>
    %8 = tpu.matmul %6, %7, %cst {dimension_numbers = #tpu.dot_dimension_numbers<[1], [0], [0], [1], [0, 0, 1, 1], [], []>} : vector<16x64xbf16>, vector<64x64xbf16>, vector<16x64xf32> -> vector<16x64xf32>
    %c0_10 = arith.constant 0 : index
    %c0_11 = arith.constant 0 : index
    %9 = vector.load %arg8[%c0_10, %c0_11] : memref<1x64xf32, #tpu.memory_space<vmem>>, vector<1x64xf32>
    %10 = vector.broadcast %9 : vector<1x64xf32> to vector<16x64xf32>
    %11 = arith.addf %8, %10 : vector<16x64xf32>
    %cst_12 = arith.constant 2.500000e-01 : f32
    %12 = vector.broadcast %cst_12 : f32 to vector<16x64xf32>
    %13 = arith.mulf %11, %12 : vector<16x64xf32>
    %c0_13 = arith.constant 0 : index
    %c0_14 = arith.constant 0 : index
    %14 = vector.load %arg5[%c0_13, %c0_14] : memref<64x64xbf16, #tpu.memory_space<vmem>>, vector<64x64xbf16>
    %cst_15 = arith.constant dense<0.000000e+00> : vector<64x256xf32>
    %15 = tpu.matmul %14, %5, %cst_15 {dimension_numbers = #tpu.dot_dimension_numbers<[1], [0], [0], [1], [0, 0, 1, 1], [], []>} : vector<64x64xbf16>, vector<64x256xbf16>, vector<64x256xf32> -> vector<64x256xf32>
    %c0_16 = arith.constant 0 : index
    %c0_17 = arith.constant 0 : index
    %16 = vector.load %arg9[%c0_16, %c0_17] : memref<64x1xf32, #tpu.memory_space<vmem>>, vector<64x1xf32>
    %17 = vector.broadcast %16 : vector<64x1xf32> to vector<64x256xf32>
    %18 = arith.addf %15, %17 : vector<64x256xf32>
    %c0_18 = arith.constant 0 : index
    %c0_19 = arith.constant 0 : index
    %19 = vector.load %arg6[%c0_18, %c0_19] : memref<64x64xbf16, #tpu.memory_space<vmem>>, vector<64x64xbf16>
    %cst_20 = arith.constant dense<0.000000e+00> : vector<256x64xf32>
    %20 = tpu.matmul %3, %19, %cst_20 {dimension_numbers = #tpu.dot_dimension_numbers<[1], [0], [0], [1], [0, 0, 1, 1], [], []>} : vector<256x64xbf16>, vector<64x64xbf16>, vector<256x64xf32> -> vector<256x64xf32>
    %c0_21 = arith.constant 0 : index
    %c0_22 = arith.constant 0 : index
    %21 = vector.load %arg10[%c0_21, %c0_22] : memref<1x64xf32, #tpu.memory_space<vmem>>, vector<1x64xf32>
    %22 = vector.broadcast %21 : vector<1x64xf32> to vector<256x64xf32>
    %23 = arith.addf %20, %22 : vector<256x64xf32>
    %c0_23 = arith.constant 0 : index
    %c0_24 = arith.constant 0 : index
    %24 = vector.load %arg7[%c0_23, %c0_24] : memref<64x64xbf16, #tpu.memory_space<vmem>>, vector<64x64xbf16>
    %c0_25 = arith.constant 0 : index
    %c0_26 = arith.constant 0 : index
    %25 = vector.load %arg11[%c0_25, %c0_26] : memref<1x64xf32, #tpu.memory_space<vmem>>, vector<1x64xf32>
    %26 = arith.truncf %13 : vector<16x64xf32> to vector<16x64xbf16>
    %27 = arith.truncf %18 : vector<64x256xf32> to vector<64x256xbf16>
    %28 = arith.truncf %23 : vector<256x64xf32> to vector<256x64xbf16>
    %29 = vector.extract_strided_slice %26 {offsets = [0, 0], sizes = [16, 16], strides = [1, 1]} : vector<16x64xbf16> to vector<16x16xbf16>
    %30 = vector.extract_strided_slice %27 {offsets = [0, 0], sizes = [16, 256], strides = [1, 1]} : vector<64x256xbf16> to vector<16x256xbf16>
    %cst_27 = arith.constant dense<0.000000e+00> : vector<16x256xf32>
    %31 = tpu.matmul %29, %30, %cst_27 {dimension_numbers = #tpu.dot_dimension_numbers<[1], [0], [0], [1], [0, 0, 1, 1], [], []>} : vector<16x16xbf16>, vector<16x256xbf16>, vector<16x256xf32> -> vector<16x256xf32>
    %cst_28 = arith.constant dense<0xFF800000> : vector<16xf32>
    %32 = vector.multi_reduction <maximumf>, %31, %cst_28 [1] : vector<16x256xf32> to vector<16xf32>
    %33 = vector.shape_cast %32 : vector<16xf32> to vector<16x1xf32>
    %34 = vector.broadcast %33 : vector<16x1xf32> to vector<16x256xf32>
    %35 = arith.subf %31, %34 : vector<16x256xf32>
    %36 = math.exp %35 : vector<16x256xf32>
    %cst_29 = arith.constant dense<0.000000e+00> : vector<16xf32>
    %37 = vector.multi_reduction <add>, %36, %cst_29 [1] : vector<16x256xf32> to vector<16xf32>
    %38 = vector.shape_cast %37 : vector<16xf32> to vector<16x1xf32>
    %39 = tpu.reciprocal %38 {approx = true} : vector<16x1xf32> -> vector<16x1xf32>
    %40 = vector.broadcast %39 : vector<16x1xf32> to vector<16x256xf32>
    %41 = arith.mulf %36, %40 : vector<16x256xf32>
    %42 = arith.truncf %41 : vector<16x256xf32> to vector<16x256xbf16>
    %43 = vector.extract_strided_slice %28 {offsets = [0, 0], sizes = [256, 16], strides = [1, 1]} : vector<256x64xbf16> to vector<256x16xbf16>
    %cst_30 = arith.constant dense<0.000000e+00> : vector<16x16xf32>
    %44 = tpu.matmul %42, %43, %cst_30 {dimension_numbers = #tpu.dot_dimension_numbers<[1], [0], [0], [1], [0, 0, 1, 1], [], []>} : vector<16x256xbf16>, vector<256x16xbf16>, vector<16x16xf32> -> vector<16x16xf32>
    %45 = vector.extract_strided_slice %26 {offsets = [0, 16], sizes = [16, 16], strides = [1, 1]} : vector<16x64xbf16> to vector<16x16xbf16>
    %46 = vector.extract_strided_slice %27 {offsets = [16, 0], sizes = [16, 256], strides = [1, 1]} : vector<64x256xbf16> to vector<16x256xbf16>
    %cst_31 = arith.constant dense<0.000000e+00> : vector<16x256xf32>
    %47 = tpu.matmul %45, %46, %cst_31 {dimension_numbers = #tpu.dot_dimension_numbers<[1], [0], [0], [1], [0, 0, 1, 1], [], []>} : vector<16x16xbf16>, vector<16x256xbf16>, vector<16x256xf32> -> vector<16x256xf32>
    %cst_32 = arith.constant dense<0xFF800000> : vector<16xf32>
    %48 = vector.multi_reduction <maximumf>, %47, %cst_32 [1] : vector<16x256xf32> to vector<16xf32>
    %49 = vector.shape_cast %48 : vector<16xf32> to vector<16x1xf32>
    %50 = vector.broadcast %49 : vector<16x1xf32> to vector<16x256xf32>
    %51 = arith.subf %47, %50 : vector<16x256xf32>
    %52 = math.exp %51 : vector<16x256xf32>
    %cst_33 = arith.constant dense<0.000000e+00> : vector<16xf32>
    %53 = vector.multi_reduction <add>, %52, %cst_33 [1] : vector<16x256xf32> to vector<16xf32>
    %54 = vector.shape_cast %53 : vector<16xf32> to vector<16x1xf32>
    %55 = tpu.reciprocal %54 {approx = true} : vector<16x1xf32> -> vector<16x1xf32>
    %56 = vector.broadcast %55 : vector<16x1xf32> to vector<16x256xf32>
    %57 = arith.mulf %52, %56 : vector<16x256xf32>
    %58 = arith.truncf %57 : vector<16x256xf32> to vector<16x256xbf16>
    %59 = vector.extract_strided_slice %28 {offsets = [0, 16], sizes = [256, 16], strides = [1, 1]} : vector<256x64xbf16> to vector<256x16xbf16>
    %cst_34 = arith.constant dense<0.000000e+00> : vector<16x16xf32>
    %60 = tpu.matmul %58, %59, %cst_34 {dimension_numbers = #tpu.dot_dimension_numbers<[1], [0], [0], [1], [0, 0, 1, 1], [], []>} : vector<16x256xbf16>, vector<256x16xbf16>, vector<16x16xf32> -> vector<16x16xf32>
    %61 = vector.extract_strided_slice %26 {offsets = [0, 32], sizes = [16, 16], strides = [1, 1]} : vector<16x64xbf16> to vector<16x16xbf16>
    %62 = vector.extract_strided_slice %27 {offsets = [32, 0], sizes = [16, 256], strides = [1, 1]} : vector<64x256xbf16> to vector<16x256xbf16>
    %cst_35 = arith.constant dense<0.000000e+00> : vector<16x256xf32>
    %63 = tpu.matmul %61, %62, %cst_35 {dimension_numbers = #tpu.dot_dimension_numbers<[1], [0], [0], [1], [0, 0, 1, 1], [], []>} : vector<16x16xbf16>, vector<16x256xbf16>, vector<16x256xf32> -> vector<16x256xf32>
    %cst_36 = arith.constant dense<0xFF800000> : vector<16xf32>
    %64 = vector.multi_reduction <maximumf>, %63, %cst_36 [1] : vector<16x256xf32> to vector<16xf32>
    %65 = vector.shape_cast %64 : vector<16xf32> to vector<16x1xf32>
    %66 = vector.broadcast %65 : vector<16x1xf32> to vector<16x256xf32>
    %67 = arith.subf %63, %66 : vector<16x256xf32>
    %68 = math.exp %67 : vector<16x256xf32>
    %cst_37 = arith.constant dense<0.000000e+00> : vector<16xf32>
    %69 = vector.multi_reduction <add>, %68, %cst_37 [1] : vector<16x256xf32> to vector<16xf32>
    %70 = vector.shape_cast %69 : vector<16xf32> to vector<16x1xf32>
    %71 = tpu.reciprocal %70 {approx = true} : vector<16x1xf32> -> vector<16x1xf32>
    %72 = vector.broadcast %71 : vector<16x1xf32> to vector<16x256xf32>
    %73 = arith.mulf %68, %72 : vector<16x256xf32>
    %74 = arith.truncf %73 : vector<16x256xf32> to vector<16x256xbf16>
    %75 = vector.extract_strided_slice %28 {offsets = [0, 32], sizes = [256, 16], strides = [1, 1]} : vector<256x64xbf16> to vector<256x16xbf16>
    %cst_38 = arith.constant dense<0.000000e+00> : vector<16x16xf32>
    %76 = tpu.matmul %74, %75, %cst_38 {dimension_numbers = #tpu.dot_dimension_numbers<[1], [0], [0], [1], [0, 0, 1, 1], [], []>} : vector<16x256xbf16>, vector<256x16xbf16>, vector<16x16xf32> -> vector<16x16xf32>
    %77 = vector.extract_strided_slice %26 {offsets = [0, 48], sizes = [16, 16], strides = [1, 1]} : vector<16x64xbf16> to vector<16x16xbf16>
    %78 = vector.extract_strided_slice %27 {offsets = [48, 0], sizes = [16, 256], strides = [1, 1]} : vector<64x256xbf16> to vector<16x256xbf16>
    %cst_39 = arith.constant dense<0.000000e+00> : vector<16x256xf32>
    %79 = tpu.matmul %77, %78, %cst_39 {dimension_numbers = #tpu.dot_dimension_numbers<[1], [0], [0], [1], [0, 0, 1, 1], [], []>} : vector<16x16xbf16>, vector<16x256xbf16>, vector<16x256xf32> -> vector<16x256xf32>
    %cst_40 = arith.constant dense<0xFF800000> : vector<16xf32>
    %80 = vector.multi_reduction <maximumf>, %79, %cst_40 [1] : vector<16x256xf32> to vector<16xf32>
    %81 = vector.shape_cast %80 : vector<16xf32> to vector<16x1xf32>
    %82 = vector.broadcast %81 : vector<16x1xf32> to vector<16x256xf32>
    %83 = arith.subf %79, %82 : vector<16x256xf32>
    %84 = math.exp %83 : vector<16x256xf32>
    %cst_41 = arith.constant dense<0.000000e+00> : vector<16xf32>
    %85 = vector.multi_reduction <add>, %84, %cst_41 [1] : vector<16x256xf32> to vector<16xf32>
    %86 = vector.shape_cast %85 : vector<16xf32> to vector<16x1xf32>
    %87 = tpu.reciprocal %86 {approx = true} : vector<16x1xf32> -> vector<16x1xf32>
    %88 = vector.broadcast %87 : vector<16x1xf32> to vector<16x256xf32>
    %89 = arith.mulf %84, %88 : vector<16x256xf32>
    %90 = arith.truncf %89 : vector<16x256xf32> to vector<16x256xbf16>
    %91 = vector.extract_strided_slice %28 {offsets = [0, 48], sizes = [256, 16], strides = [1, 1]} : vector<256x64xbf16> to vector<256x16xbf16>
    %cst_42 = arith.constant dense<0.000000e+00> : vector<16x16xf32>
    %92 = tpu.matmul %90, %91, %cst_42 {dimension_numbers = #tpu.dot_dimension_numbers<[1], [0], [0], [1], [0, 0, 1, 1], [], []>} : vector<16x256xbf16>, vector<256x16xbf16>, vector<16x16xf32> -> vector<16x16xf32>
    %93 = tpu.concatenate %44, %60, %76, %92 in 1 : vector<16x16xf32>, vector<16x16xf32>, vector<16x16xf32>, vector<16x16xf32> -> vector<16x64xf32>
    %94 = arith.truncf %93 : vector<16x64xf32> to vector<16x64xbf16>
    %cst_43 = arith.constant dense<0.000000e+00> : vector<16x64xf32>
    %95 = tpu.matmul %94, %24, %cst_43 {dimension_numbers = #tpu.dot_dimension_numbers<[1], [0], [0], [1], [0, 0, 1, 1], [], []>} : vector<16x64xbf16>, vector<64x64xbf16>, vector<16x64xf32> -> vector<16x64xf32>
    %96 = vector.broadcast %25 : vector<1x64xf32> to vector<16x64xf32>
    %97 = arith.addf %95, %96 : vector<16x64xf32>
    %98 = arith.addf %1, %97 : vector<16x64xf32>
    %c0_44 = arith.constant 0 : index
    %c0_45 = arith.constant 0 : index
    %99 = vector.load %arg12[%c0_44, %c0_45] : memref<1x64xf32, #tpu.memory_space<vmem>>, vector<1x64xf32>
    %c0_46 = arith.constant 0 : index
    %c0_47 = arith.constant 0 : index
    %100 = vector.load %arg13[%c0_46, %c0_47] : memref<1x64xf32, #tpu.memory_space<vmem>>, vector<1x64xf32>
    %cst_48 = arith.constant dense<0.000000e+00> : vector<16xf32>
    %101 = vector.multi_reduction <add>, %98, %cst_48 [1] : vector<16x64xf32> to vector<16xf32>
    %102 = vector.shape_cast %101 : vector<16xf32> to vector<16x1xf32>
    %cst_49 = arith.constant 6.400000e+01 : f32
    %103 = vector.broadcast %cst_49 : f32 to vector<16x1xf32>
    %104 = arith.divf %102, %103 : vector<16x1xf32>
    %105 = vector.broadcast %104 : vector<16x1xf32> to vector<16x64xf32>
    %106 = arith.subf %98, %105 : vector<16x64xf32>
    %107 = arith.mulf %106, %106 : vector<16x64xf32>
    %cst_50 = arith.constant dense<0.000000e+00> : vector<16xf32>
    %108 = vector.multi_reduction <add>, %107, %cst_50 [1] : vector<16x64xf32> to vector<16xf32>
    %109 = vector.shape_cast %108 : vector<16xf32> to vector<16x1xf32>
    %cst_51 = arith.constant 6.400000e+01 : f32
    %110 = vector.broadcast %cst_51 : f32 to vector<16x1xf32>
    %111 = arith.divf %109, %110 : vector<16x1xf32>
    %112 = vector.broadcast %104 : vector<16x1xf32> to vector<16x64xf32>
    %113 = arith.subf %98, %112 : vector<16x64xf32>
    %cst_52 = arith.constant 9.99999974E-6 : f32
    %114 = vector.broadcast %cst_52 : f32 to vector<16x1xf32>
    %115 = arith.addf %111, %114 : vector<16x1xf32>
    %116 = math.rsqrt %115 : vector<16x1xf32>
    %117 = vector.broadcast %116 : vector<16x1xf32> to vector<16x64xf32>
    %118 = arith.mulf %113, %117 : vector<16x64xf32>
    %119 = vector.broadcast %99 : vector<1x64xf32> to vector<16x64xf32>
    %120 = arith.mulf %118, %119 : vector<16x64xf32>
    %121 = vector.broadcast %100 : vector<1x64xf32> to vector<16x64xf32>
    %122 = arith.addf %120, %121 : vector<16x64xf32>
    %c0_53 = arith.constant 0 : index
    %c0_54 = arith.constant 0 : index
    %c0_55 = arith.constant 0 : index
    %123 = vector.load %arg14[%c0_53, %c0_54, %c0_55] : memref<1x16x64xf32, #tpu.memory_space<vmem>>, vector<1x16x64xf32>
    %124 = vector.shape_cast %123 : vector<1x16x64xf32> to vector<16x64xf32>
    %125 = vector.shape_cast %122 : vector<16x64xf32> to vector<1x16x64xf32>
    tpu.vector_store %arg14[%c0_53, %c0_54, %c0_55], %125 {strides = array<i32>} : memref<1x16x64xf32, #tpu.memory_space<vmem>>, vector<1x16x64xf32>,
    return
  }
  func.func @transform_0(%arg0: i32) -> (i32, i32, i32) {
    %c0_i32 = arith.constant 0 : i32
    %c0_i32_0 = arith.constant 0 : i32
    %c0_i32_1 = arith.constant 0 : i32
    return %arg0, %c0_i32, %c0_i32_0 : i32, i32, i32
  }
  func.func @transform_1(%arg0: i32) -> (i32, i32, i32) {
    %c0_i32 = arith.constant 0 : i32
    %c0_i32_0 = arith.constant 0 : i32
    %c0_i32_1 = arith.constant 0 : i32
    return %arg0, %c0_i32, %c0_i32_0 : i32, i32, i32
  }
  func.func @transform_2(%arg0: i32) -> (i32, i32, i32) {
    %c0_i32 = arith.constant 0 : i32
    %c0_i32_0 = arith.constant 0 : i32
    %c0_i32_1 = arith.constant 0 : i32
    return %arg0, %c0_i32, %c0_i32_0 : i32, i32, i32
  }
  func.func @transform_3(%arg0: i32) -> (i32, i32) {
    %c0_i32 = arith.constant 0 : i32
    %c0_i32_0 = arith.constant 0 : i32
    %c0_i32_1 = arith.constant 0 : i32
    return %c0_i32, %c0_i32_0 : i32, i32
  }
  func.func @transform_4(%arg0: i32) -> (i32, i32) {
    %c0_i32 = arith.constant 0 : i32
    %c0_i32_0 = arith.constant 0 : i32
    %c0_i32_1 = arith.constant 0 : i32
    return %c0_i32, %c0_i32_0 : i32, i32
  }
  func.func @transform_5(%arg0: i32) -> (i32, i32) {
    %c0_i32 = arith.constant 0 : i32
    %c0_i32_0 = arith.constant 0 : i32
    %c0_i32_1 = arith.constant 0 : i32
    return %c0_i32, %c0_i32_0 : i32, i32
  }
  func.func @transform_6(%arg0: i32) -> (i32, i32) {
    %c0_i32 = arith.constant 0 : i32
    %c0_i32_0 = arith.constant 0 : i32
    %c0_i32_1 = arith.constant 0 : i32
    return %c0_i32, %c0_i32_0 : i32, i32
  }
  func.func @transform_7(%arg0: i32) -> (i32, i32) {
    %c0_i32 = arith.constant 0 : i32
    %c0_i32_0 = arith.constant 0 : i32
    %c0_i32_1 = arith.constant 0 : i32
    return %c0_i32, %c0_i32_0 : i32, i32
  }
  func.func @transform_8(%arg0: i32) -> (i32, i32) {
    %c0_i32 = arith.constant 0 : i32
    %c0_i32_0 = arith.constant 0 : i32
    %c0_i32_1 = arith.constant 0 : i32
    return %c0_i32, %c0_i32_0 : i32, i32
  }
  func.func @transform_9(%arg0: i32) -> (i32, i32) {
    %c0_i32 = arith.constant 0 : i32
    %c0_i32_0 = arith.constant 0 : i32
    %c0_i32_1 = arith.constant 0 : i32
    return %c0_i32, %c0_i32_0 : i32, i32
  }
  func.func @transform_10(%arg0: i32) -> (i32, i32) {
    %c0_i32 = arith.constant 0 : i32
    %c0_i32_0 = arith.constant 0 : i32
    %c0_i32_1 = arith.constant 0 : i32
    return %c0_i32, %c0_i32_0 : i32, i32
  }
  func.func @transform_11(%arg0: i32) -> (i32, i32) {
    %c0_i32 = arith.constant 0 : i32
    %c0_i32_0 = arith.constant 0 : i32
    %c0_i32_1 = arith.constant 0 : i32
    return %c0_i32, %c0_i32_0 : i32, i32
  }
  func.func @transform_12(%arg0: i32) -> (i32, i32) {
    %c0_i32 = arith.constant 0 : i32
    %c0_i32_0 = arith.constant 0 : i32
    %c0_i32_1 = arith.constant 0 : i32
    return %c0_i32, %c0_i32_0 : i32, i32
  }
  func.func @transform_13(%arg0: i32) -> (i32, i32, i32) {
    %c0_i32 = arith.constant 0 : i32
    %c0_i32_0 = arith.constant 0 : i32
    %c0_i32_1 = arith.constant 0 : i32
    return %arg0, %c0_i32, %c0_i32_0 : i32, i32, i32
  }
}

module attributes {stable_mosaic.version = 11 : i64} {
  func.func @_joint_ffn_kernel(%arg0: i32, %arg1: memref<1x16x64xf32, #tpu.memory_space<vmem>>, %arg2: memref<1x64x16xf32, #tpu.memory_space<vmem>>, %arg3: memref<1x16x64xf32, #tpu.memory_space<vmem>>, %arg4: memref<1x64x16xf32, #tpu.memory_space<vmem>>, %arg5: memref<1x1x16xf32, #tpu.memory_space<vmem>>, %arg6: memref<64x64xbf16, #tpu.memory_space<vmem>>, %arg7: memref<64x64xbf16, #tpu.memory_space<vmem>>, %arg8: memref<64x64xbf16, #tpu.memory_space<vmem>>, %arg9: memref<64x64xbf16, #tpu.memory_space<vmem>>, %arg10: memref<1x64xf32, #tpu.memory_space<vmem>>, %arg11: memref<64x1xf32, #tpu.memory_space<vmem>>, %arg12: memref<1x64xf32, #tpu.memory_space<vmem>>, %arg13: memref<1x64xf32, #tpu.memory_space<vmem>>, %arg14: memref<1x64xf32, #tpu.memory_space<vmem>>, %arg15: memref<1x64xf32, #tpu.memory_space<vmem>>, %arg16: memref<64x256xbf16, #tpu.memory_space<vmem>>, %arg17: memref<1x256xf32, #tpu.memory_space<vmem>>, %arg18: memref<256x64xbf16, #tpu.memory_space<vmem>>, %arg19: memref<1x64xf32, #tpu.memory_space<vmem>>, %arg20: memref<1x64xf32, #tpu.memory_space<vmem>>, %arg21: memref<1x64xf32, #tpu.memory_space<vmem>>, %arg22: memref<1x16x64xf32, #tpu.memory_space<vmem>>, %arg23: memref<1x16x64xf32, #tpu.memory_space<vmem>>) attributes {dimension_semantics = [#tpu.dimension_semantics<parallel>], iteration_bounds = array<i64: 2>, scalar_prefetch = 0 : i64, scratch_operands = 0 : i64, tpu.core_type = #tpu.core_type<tc>, window_params = [{transform_indices = @transform_0, window_bounds = array<i64: 1, 16, 64>}, {transform_indices = @transform_1, window_bounds = array<i64: 1, 64, 16>}, {transform_indices = @transform_2, window_bounds = array<i64: 1, 16, 64>}, {transform_indices = @transform_3, window_bounds = array<i64: 1, 64, 16>}, {transform_indices = @transform_4, window_bounds = array<i64: 1, 1, 16>}, {pipeline_mode = #tpu.pipeline_mode<synchronous>, transform_indices = @transform_5, window_bounds = array<i64: 64, 64>}, {pipeline_mode = #tpu.pipeline_mode<synchronous>, transform_indices = @transform_6, window_bounds = array<i64: 64, 64>}, {pipeline_mode = #tpu.pipeline_mode<synchronous>, transform_indices = @transform_7, window_bounds = array<i64: 64, 64>}, {pipeline_mode = #tpu.pipeline_mode<synchronous>, transform_indices = @transform_8, window_bounds = array<i64: 64, 64>}, {pipeline_mode = #tpu.pipeline_mode<synchronous>, transform_indices = @transform_9, window_bounds = array<i64: 1, 64>}, {pipeline_mode = #tpu.pipeline_mode<synchronous>, transform_indices = @transform_10, window_bounds = array<i64: 64, 1>}, {pipeline_mode = #tpu.pipeline_mode<synchronous>, transform_indices = @transform_11, window_bounds = array<i64: 1, 64>}, {pipeline_mode = #tpu.pipeline_mode<synchronous>, transform_indices = @transform_12, window_bounds = array<i64: 1, 64>}, {pipeline_mode = #tpu.pipeline_mode<synchronous>, transform_indices = @transform_13, window_bounds = array<i64: 1, 64>}, {pipeline_mode = #tpu.pipeline_mode<synchronous>, transform_indices = @transform_14, window_bounds = array<i64: 1, 64>}, {pipeline_mode = #tpu.pipeline_mode<synchronous>, transform_indices = @transform_15, window_bounds = array<i64: 64, 256>}, {pipeline_mode = #tpu.pipeline_mode<synchronous>, transform_indices = @transform_16, window_bounds = array<i64: 1, 256>}, {pipeline_mode = #tpu.pipeline_mode<synchronous>, transform_indices = @transform_17, window_bounds = array<i64: 256, 64>}, {pipeline_mode = #tpu.pipeline_mode<synchronous>, transform_indices = @transform_18, window_bounds = array<i64: 1, 64>}, {pipeline_mode = #tpu.pipeline_mode<synchronous>, transform_indices = @transform_19, window_bounds = array<i64: 1, 64>}, {pipeline_mode = #tpu.pipeline_mode<synchronous>, transform_indices = @transform_20, window_bounds = array<i64: 1, 64>}, {transform_indices = @transform_21, window_bounds = array<i64: 1, 16, 64>}, {transform_indices = @transform_22, window_bounds = array<i64: 1, 16, 64>}]} {
    %c0 = arith.constant 0 : index
    %c0_0 = arith.constant 0 : index
    %c0_1 = arith.constant 0 : index
    %0 = vector.load %arg1[%c0, %c0_0, %c0_1] : memref<1x16x64xf32, #tpu.memory_space<vmem>>, vector<1x16x64xf32>
    %1 = vector.shape_cast %0 : vector<1x16x64xf32> to vector<16x64xf32>
    %c0_2 = arith.constant 0 : index
    %c0_3 = arith.constant 0 : index
    %c0_4 = arith.constant 0 : index
    %2 = vector.load %arg3[%c0_2, %c0_3, %c0_4] : memref<1x16x64xf32, #tpu.memory_space<vmem>>, vector<1x16x64xf32>
    %3 = vector.shape_cast %2 : vector<1x16x64xf32> to vector<16x64xf32>
    %4 = tpu.concatenate %1, %3 in 0 : vector<16x64xf32>, vector<16x64xf32> -> vector<32x64xf32>
    %c0_5 = arith.constant 0 : index
    %c0_6 = arith.constant 0 : index
    %c0_7 = arith.constant 0 : index
    %5 = vector.load %arg2[%c0_5, %c0_6, %c0_7] : memref<1x64x16xf32, #tpu.memory_space<vmem>>, vector<1x64x16xf32>
    %6 = vector.shape_cast %5 : vector<1x64x16xf32> to vector<64x16xf32>
    %c0_8 = arith.constant 0 : index
    %c0_9 = arith.constant 0 : index
    %c0_10 = arith.constant 0 : index
    %7 = vector.load %arg4[%c0_8, %c0_9, %c0_10] : memref<1x64x16xf32, #tpu.memory_space<vmem>>, vector<1x64x16xf32>
    %8 = vector.shape_cast %7 : vector<1x64x16xf32> to vector<64x16xf32>
    %9 = tpu.concatenate %6, %8 in 1 : vector<64x16xf32>, vector<64x16xf32> -> vector<64x32xf32>
    %cst = arith.constant 0.000000e+00 : f32
    %10 = vector.broadcast %cst : f32 to vector<1x16xf32>
    %c0_11 = arith.constant 0 : index
    %c0_12 = arith.constant 0 : index
    %c0_13 = arith.constant 0 : index
    %11 = vector.load %arg5[%c0_11, %c0_12, %c0_13] : memref<1x1x16xf32, #tpu.memory_space<vmem>>, vector<1x1x16xf32>
    %12 = vector.shape_cast %11 : vector<1x1x16xf32> to vector<1x16xf32>
    %13 = tpu.concatenate %10, %12 in 1 : vector<1x16xf32>, vector<1x16xf32> -> vector<1x32xf32>
    %14 = arith.truncf %4 : vector<32x64xf32> to vector<32x64xbf16>
    %c0_14 = arith.constant 0 : index
    %c0_15 = arith.constant 0 : index
    %15 = vector.load %arg6[%c0_14, %c0_15] : memref<64x64xbf16, #tpu.memory_space<vmem>>, vector<64x64xbf16>
    %cst_16 = arith.constant dense<0.000000e+00> : vector<32x64xf32>
    %16 = tpu.matmul %14, %15, %cst_16 {dimension_numbers = #tpu.dot_dimension_numbers<[1], [0], [0], [1], [0, 0, 1, 1], [], []>} : vector<32x64xbf16>, vector<64x64xbf16>, vector<32x64xf32> -> vector<32x64xf32>
    %c0_17 = arith.constant 0 : index
    %c0_18 = arith.constant 0 : index
    %17 = vector.load %arg10[%c0_17, %c0_18] : memref<1x64xf32, #tpu.memory_space<vmem>>, vector<1x64xf32>
    %18 = vector.broadcast %17 : vector<1x64xf32> to vector<32x64xf32>
    %19 = arith.addf %16, %18 : vector<32x64xf32>
    %cst_19 = arith.constant 2.500000e-01 : f32
    %20 = vector.broadcast %cst_19 : f32 to vector<32x64xf32>
    %21 = arith.mulf %19, %20 : vector<32x64xf32>
    %c0_20 = arith.constant 0 : index
    %c0_21 = arith.constant 0 : index
    %22 = vector.load %arg7[%c0_20, %c0_21] : memref<64x64xbf16, #tpu.memory_space<vmem>>, vector<64x64xbf16>
    %23 = arith.truncf %9 : vector<64x32xf32> to vector<64x32xbf16>
    %cst_22 = arith.constant dense<0.000000e+00> : vector<64x32xf32>
    %24 = tpu.matmul %22, %23, %cst_22 {dimension_numbers = #tpu.dot_dimension_numbers<[1], [0], [0], [1], [0, 0, 1, 1], [], []>} : vector<64x64xbf16>, vector<64x32xbf16>, vector<64x32xf32> -> vector<64x32xf32>
    %c0_23 = arith.constant 0 : index
    %c0_24 = arith.constant 0 : index
    %25 = vector.load %arg11[%c0_23, %c0_24] : memref<64x1xf32, #tpu.memory_space<vmem>>, vector<64x1xf32>
    %26 = vector.broadcast %25 : vector<64x1xf32> to vector<64x32xf32>
    %27 = arith.addf %24, %26 : vector<64x32xf32>
    %c0_25 = arith.constant 0 : index
    %c0_26 = arith.constant 0 : index
    %28 = vector.load %arg8[%c0_25, %c0_26] : memref<64x64xbf16, #tpu.memory_space<vmem>>, vector<64x64xbf16>
    %cst_27 = arith.constant dense<0.000000e+00> : vector<32x64xf32>
    %29 = tpu.matmul %14, %28, %cst_27 {dimension_numbers = #tpu.dot_dimension_numbers<[1], [0], [0], [1], [0, 0, 1, 1], [], []>} : vector<32x64xbf16>, vector<64x64xbf16>, vector<32x64xf32> -> vector<32x64xf32>
    %c0_28 = arith.constant 0 : index
    %c0_29 = arith.constant 0 : index
    %30 = vector.load %arg12[%c0_28, %c0_29] : memref<1x64xf32, #tpu.memory_space<vmem>>, vector<1x64xf32>
    %31 = vector.broadcast %30 : vector<1x64xf32> to vector<32x64xf32>
    %32 = arith.addf %29, %31 : vector<32x64xf32>
    %c0_30 = arith.constant 0 : index
    %c0_31 = arith.constant 0 : index
    %33 = vector.load %arg9[%c0_30, %c0_31] : memref<64x64xbf16, #tpu.memory_space<vmem>>, vector<64x64xbf16>
    %c0_32 = arith.constant 0 : index
    %c0_33 = arith.constant 0 : index
    %34 = vector.load %arg13[%c0_32, %c0_33] : memref<1x64xf32, #tpu.memory_space<vmem>>, vector<1x64xf32>
    %35 = arith.truncf %21 : vector<32x64xf32> to vector<32x64xbf16>
    %36 = arith.truncf %27 : vector<64x32xf32> to vector<64x32xbf16>
    %37 = arith.truncf %32 : vector<32x64xf32> to vector<32x64xbf16>
    %38 = vector.extract_strided_slice %35 {offsets = [0, 0], sizes = [32, 16], strides = [1, 1]} : vector<32x64xbf16> to vector<32x16xbf16>
    %39 = vector.extract_strided_slice %36 {offsets = [0, 0], sizes = [16, 32], strides = [1, 1]} : vector<64x32xbf16> to vector<16x32xbf16>
    %cst_34 = arith.constant dense<0.000000e+00> : vector<32x32xf32>
    %40 = tpu.matmul %38, %39, %cst_34 {dimension_numbers = #tpu.dot_dimension_numbers<[1], [0], [0], [1], [0, 0, 1, 1], [], []>} : vector<32x16xbf16>, vector<16x32xbf16>, vector<32x32xf32> -> vector<32x32xf32>
    %41 = vector.broadcast %13 : vector<1x32xf32> to vector<32x32xf32>
    %42 = arith.addf %40, %41 : vector<32x32xf32>
    %cst_35 = arith.constant dense<0xFF800000> : vector<32xf32>
    %43 = vector.multi_reduction <maximumf>, %42, %cst_35 [1] : vector<32x32xf32> to vector<32xf32>
    %44 = vector.shape_cast %43 : vector<32xf32> to vector<32x1xf32>
    %45 = vector.broadcast %44 : vector<32x1xf32> to vector<32x32xf32>
    %46 = arith.subf %42, %45 : vector<32x32xf32>
    %47 = math.exp %46 : vector<32x32xf32>
    %cst_36 = arith.constant dense<0.000000e+00> : vector<32xf32>
    %48 = vector.multi_reduction <add>, %47, %cst_36 [1] : vector<32x32xf32> to vector<32xf32>
    %49 = vector.shape_cast %48 : vector<32xf32> to vector<32x1xf32>
    %50 = tpu.reciprocal %49 {approx = true} : vector<32x1xf32> -> vector<32x1xf32>
    %51 = vector.broadcast %50 : vector<32x1xf32> to vector<32x32xf32>
    %52 = arith.mulf %47, %51 : vector<32x32xf32>
    %53 = arith.truncf %52 : vector<32x32xf32> to vector<32x32xbf16>
    %54 = vector.extract_strided_slice %37 {offsets = [0, 0], sizes = [32, 16], strides = [1, 1]} : vector<32x64xbf16> to vector<32x16xbf16>
    %cst_37 = arith.constant dense<0.000000e+00> : vector<32x16xf32>
    %55 = tpu.matmul %53, %54, %cst_37 {dimension_numbers = #tpu.dot_dimension_numbers<[1], [0], [0], [1], [0, 0, 1, 1], [], []>} : vector<32x32xbf16>, vector<32x16xbf16>, vector<32x16xf32> -> vector<32x16xf32>
    %56 = vector.extract_strided_slice %35 {offsets = [0, 16], sizes = [32, 16], strides = [1, 1]} : vector<32x64xbf16> to vector<32x16xbf16>
    %57 = vector.extract_strided_slice %36 {offsets = [16, 0], sizes = [16, 32], strides = [1, 1]} : vector<64x32xbf16> to vector<16x32xbf16>
    %cst_38 = arith.constant dense<0.000000e+00> : vector<32x32xf32>
    %58 = tpu.matmul %56, %57, %cst_38 {dimension_numbers = #tpu.dot_dimension_numbers<[1], [0], [0], [1], [0, 0, 1, 1], [], []>} : vector<32x16xbf16>, vector<16x32xbf16>, vector<32x32xf32> -> vector<32x32xf32>
    %59 = vector.broadcast %13 : vector<1x32xf32> to vector<32x32xf32>
    %60 = arith.addf %58, %59 : vector<32x32xf32>
    %cst_39 = arith.constant dense<0xFF800000> : vector<32xf32>
    %61 = vector.multi_reduction <maximumf>, %60, %cst_39 [1] : vector<32x32xf32> to vector<32xf32>
    %62 = vector.shape_cast %61 : vector<32xf32> to vector<32x1xf32>
    %63 = vector.broadcast %62 : vector<32x1xf32> to vector<32x32xf32>
    %64 = arith.subf %60, %63 : vector<32x32xf32>
    %65 = math.exp %64 : vector<32x32xf32>
    %cst_40 = arith.constant dense<0.000000e+00> : vector<32xf32>
    %66 = vector.multi_reduction <add>, %65, %cst_40 [1] : vector<32x32xf32> to vector<32xf32>
    %67 = vector.shape_cast %66 : vector<32xf32> to vector<32x1xf32>
    %68 = tpu.reciprocal %67 {approx = true} : vector<32x1xf32> -> vector<32x1xf32>
    %69 = vector.broadcast %68 : vector<32x1xf32> to vector<32x32xf32>
    %70 = arith.mulf %65, %69 : vector<32x32xf32>
    %71 = arith.truncf %70 : vector<32x32xf32> to vector<32x32xbf16>
    %72 = vector.extract_strided_slice %37 {offsets = [0, 16], sizes = [32, 16], strides = [1, 1]} : vector<32x64xbf16> to vector<32x16xbf16>
    %cst_41 = arith.constant dense<0.000000e+00> : vector<32x16xf32>
    %73 = tpu.matmul %71, %72, %cst_41 {dimension_numbers = #tpu.dot_dimension_numbers<[1], [0], [0], [1], [0, 0, 1, 1], [], []>} : vector<32x32xbf16>, vector<32x16xbf16>, vector<32x16xf32> -> vector<32x16xf32>
    %74 = vector.extract_strided_slice %35 {offsets = [0, 32], sizes = [32, 16], strides = [1, 1]} : vector<32x64xbf16> to vector<32x16xbf16>
    %75 = vector.extract_strided_slice %36 {offsets = [32, 0], sizes = [16, 32], strides = [1, 1]} : vector<64x32xbf16> to vector<16x32xbf16>
    %cst_42 = arith.constant dense<0.000000e+00> : vector<32x32xf32>
    %76 = tpu.matmul %74, %75, %cst_42 {dimension_numbers = #tpu.dot_dimension_numbers<[1], [0], [0], [1], [0, 0, 1, 1], [], []>} : vector<32x16xbf16>, vector<16x32xbf16>, vector<32x32xf32> -> vector<32x32xf32>
    %77 = vector.broadcast %13 : vector<1x32xf32> to vector<32x32xf32>
    %78 = arith.addf %76, %77 : vector<32x32xf32>
    %cst_43 = arith.constant dense<0xFF800000> : vector<32xf32>
    %79 = vector.multi_reduction <maximumf>, %78, %cst_43 [1] : vector<32x32xf32> to vector<32xf32>
    %80 = vector.shape_cast %79 : vector<32xf32> to vector<32x1xf32>
    %81 = vector.broadcast %80 : vector<32x1xf32> to vector<32x32xf32>
    %82 = arith.subf %78, %81 : vector<32x32xf32>
    %83 = math.exp %82 : vector<32x32xf32>
    %cst_44 = arith.constant dense<0.000000e+00> : vector<32xf32>
    %84 = vector.multi_reduction <add>, %83, %cst_44 [1] : vector<32x32xf32> to vector<32xf32>
    %85 = vector.shape_cast %84 : vector<32xf32> to vector<32x1xf32>
    %86 = tpu.reciprocal %85 {approx = true} : vector<32x1xf32> -> vector<32x1xf32>
    %87 = vector.broadcast %86 : vector<32x1xf32> to vector<32x32xf32>
    %88 = arith.mulf %83, %87 : vector<32x32xf32>
    %89 = arith.truncf %88 : vector<32x32xf32> to vector<32x32xbf16>
    %90 = vector.extract_strided_slice %37 {offsets = [0, 32], sizes = [32, 16], strides = [1, 1]} : vector<32x64xbf16> to vector<32x16xbf16>
    %cst_45 = arith.constant dense<0.000000e+00> : vector<32x16xf32>
    %91 = tpu.matmul %89, %90, %cst_45 {dimension_numbers = #tpu.dot_dimension_numbers<[1], [0], [0], [1], [0, 0, 1, 1], [], []>} : vector<32x32xbf16>, vector<32x16xbf16>, vector<32x16xf32> -> vector<32x16xf32>
    %92 = vector.extract_strided_slice %35 {offsets = [0, 48], sizes = [32, 16], strides = [1, 1]} : vector<32x64xbf16> to vector<32x16xbf16>
    %93 = vector.extract_strided_slice %36 {offsets = [48, 0], sizes = [16, 32], strides = [1, 1]} : vector<64x32xbf16> to vector<16x32xbf16>
    %cst_46 = arith.constant dense<0.000000e+00> : vector<32x32xf32>
    %94 = tpu.matmul %92, %93, %cst_46 {dimension_numbers = #tpu.dot_dimension_numbers<[1], [0], [0], [1], [0, 0, 1, 1], [], []>} : vector<32x16xbf16>, vector<16x32xbf16>, vector<32x32xf32> -> vector<32x32xf32>
    %95 = vector.broadcast %13 : vector<1x32xf32> to vector<32x32xf32>
    %96 = arith.addf %94, %95 : vector<32x32xf32>
    %cst_47 = arith.constant dense<0xFF800000> : vector<32xf32>
    %97 = vector.multi_reduction <maximumf>, %96, %cst_47 [1] : vector<32x32xf32> to vector<32xf32>
    %98 = vector.shape_cast %97 : vector<32xf32> to vector<32x1xf32>
    %99 = vector.broadcast %98 : vector<32x1xf32> to vector<32x32xf32>
    %100 = arith.subf %96, %99 : vector<32x32xf32>
    %101 = math.exp %100 : vector<32x32xf32>
    %cst_48 = arith.constant dense<0.000000e+00> : vector<32xf32>
    %102 = vector.multi_reduction <add>, %101, %cst_48 [1] : vector<32x32xf32> to vector<32xf32>
    %103 = vector.shape_cast %102 : vector<32xf32> to vector<32x1xf32>
    %104 = tpu.reciprocal %103 {approx = true} : vector<32x1xf32> -> vector<32x1xf32>
    %105 = vector.broadcast %104 : vector<32x1xf32> to vector<32x32xf32>
    %106 = arith.mulf %101, %105 : vector<32x32xf32>
    %107 = arith.truncf %106 : vector<32x32xf32> to vector<32x32xbf16>
    %108 = vector.extract_strided_slice %37 {offsets = [0, 48], sizes = [32, 16], strides = [1, 1]} : vector<32x64xbf16> to vector<32x16xbf16>
    %cst_49 = arith.constant dense<0.000000e+00> : vector<32x16xf32>
    %109 = tpu.matmul %107, %108, %cst_49 {dimension_numbers = #tpu.dot_dimension_numbers<[1], [0], [0], [1], [0, 0, 1, 1], [], []>} : vector<32x32xbf16>, vector<32x16xbf16>, vector<32x16xf32> -> vector<32x16xf32>
    %110 = tpu.concatenate %55, %73, %91, %109 in 1 : vector<32x16xf32>, vector<32x16xf32>, vector<32x16xf32>, vector<32x16xf32> -> vector<32x64xf32>
    %111 = arith.truncf %110 : vector<32x64xf32> to vector<32x64xbf16>
    %cst_50 = arith.constant dense<0.000000e+00> : vector<32x64xf32>
    %112 = tpu.matmul %111, %33, %cst_50 {dimension_numbers = #tpu.dot_dimension_numbers<[1], [0], [0], [1], [0, 0, 1, 1], [], []>} : vector<32x64xbf16>, vector<64x64xbf16>, vector<32x64xf32> -> vector<32x64xf32>
    %113 = vector.broadcast %34 : vector<1x64xf32> to vector<32x64xf32>
    %114 = arith.addf %112, %113 : vector<32x64xf32>
    %115 = arith.addf %4, %114 : vector<32x64xf32>
    %c0_51 = arith.constant 0 : index
    %c0_52 = arith.constant 0 : index
    %116 = vector.load %arg14[%c0_51, %c0_52] : memref<1x64xf32, #tpu.memory_space<vmem>>, vector<1x64xf32>
    %c0_53 = arith.constant 0 : index
    %c0_54 = arith.constant 0 : index
    %117 = vector.load %arg15[%c0_53, %c0_54] : memref<1x64xf32, #tpu.memory_space<vmem>>, vector<1x64xf32>
    %cst_55 = arith.constant dense<0.000000e+00> : vector<32xf32>
    %118 = vector.multi_reduction <add>, %115, %cst_55 [1] : vector<32x64xf32> to vector<32xf32>
    %119 = vector.shape_cast %118 : vector<32xf32> to vector<32x1xf32>
    %cst_56 = arith.constant 6.400000e+01 : f32
    %120 = vector.broadcast %cst_56 : f32 to vector<32x1xf32>
    %121 = arith.divf %119, %120 : vector<32x1xf32>
    %122 = vector.broadcast %121 : vector<32x1xf32> to vector<32x64xf32>
    %123 = arith.subf %115, %122 : vector<32x64xf32>
    %124 = arith.mulf %123, %123 : vector<32x64xf32>
    %cst_57 = arith.constant dense<0.000000e+00> : vector<32xf32>
    %125 = vector.multi_reduction <add>, %124, %cst_57 [1] : vector<32x64xf32> to vector<32xf32>
    %126 = vector.shape_cast %125 : vector<32xf32> to vector<32x1xf32>
    %cst_58 = arith.constant 6.400000e+01 : f32
    %127 = vector.broadcast %cst_58 : f32 to vector<32x1xf32>
    %128 = arith.divf %126, %127 : vector<32x1xf32>
    %129 = vector.broadcast %121 : vector<32x1xf32> to vector<32x64xf32>
    %130 = arith.subf %115, %129 : vector<32x64xf32>
    %cst_59 = arith.constant 9.99999974E-6 : f32
    %131 = vector.broadcast %cst_59 : f32 to vector<32x1xf32>
    %132 = arith.addf %128, %131 : vector<32x1xf32>
    %133 = math.rsqrt %132 : vector<32x1xf32>
    %134 = vector.broadcast %133 : vector<32x1xf32> to vector<32x64xf32>
    %135 = arith.mulf %130, %134 : vector<32x64xf32>
    %136 = vector.broadcast %116 : vector<1x64xf32> to vector<32x64xf32>
    %137 = arith.mulf %135, %136 : vector<32x64xf32>
    %138 = vector.broadcast %117 : vector<1x64xf32> to vector<32x64xf32>
    %139 = arith.addf %137, %138 : vector<32x64xf32>
    %140 = arith.truncf %139 : vector<32x64xf32> to vector<32x64xbf16>
    %c0_60 = arith.constant 0 : index
    %c0_61 = arith.constant 0 : index
    %141 = vector.load %arg16[%c0_60, %c0_61] : memref<64x256xbf16, #tpu.memory_space<vmem>>, vector<64x256xbf16>
    %cst_62 = arith.constant dense<0.000000e+00> : vector<32x256xf32>
    %142 = tpu.matmul %140, %141, %cst_62 {dimension_numbers = #tpu.dot_dimension_numbers<[1], [0], [0], [1], [0, 0, 1, 1], [], []>} : vector<32x64xbf16>, vector<64x256xbf16>, vector<32x256xf32> -> vector<32x256xf32>
    %c0_63 = arith.constant 0 : index
    %c0_64 = arith.constant 0 : index
    %143 = vector.load %arg17[%c0_63, %c0_64] : memref<1x256xf32, #tpu.memory_space<vmem>>, vector<1x256xf32>
    %144 = vector.broadcast %143 : vector<1x256xf32> to vector<32x256xf32>
    %145 = arith.addf %142, %144 : vector<32x256xf32>
    %cst_65 = arith.constant 0.000000e+00 : f32
    %146 = vector.broadcast %cst_65 : f32 to vector<32x256xf32>
    %147 = arith.maximumf %145, %146 : vector<32x256xf32>
    %148 = arith.truncf %147 : vector<32x256xf32> to vector<32x256xbf16>
    %c0_66 = arith.constant 0 : index
    %c0_67 = arith.constant 0 : index
    %149 = vector.load %arg18[%c0_66, %c0_67] : memref<256x64xbf16, #tpu.memory_space<vmem>>, vector<256x64xbf16>
    %cst_68 = arith.constant dense<0.000000e+00> : vector<32x64xf32>
    %150 = tpu.matmul %148, %149, %cst_68 {dimension_numbers = #tpu.dot_dimension_numbers<[1], [0], [0], [1], [0, 0, 1, 1], [], []>} : vector<32x256xbf16>, vector<256x64xbf16>, vector<32x64xf32> -> vector<32x64xf32>
    %c0_69 = arith.constant 0 : index
    %c0_70 = arith.constant 0 : index
    %151 = vector.load %arg19[%c0_69, %c0_70] : memref<1x64xf32, #tpu.memory_space<vmem>>, vector<1x64xf32>
    %152 = vector.broadcast %151 : vector<1x64xf32> to vector<32x64xf32>
    %153 = arith.addf %150, %152 : vector<32x64xf32>
    %154 = arith.addf %139, %153 : vector<32x64xf32>
    %c0_71 = arith.constant 0 : index
    %c0_72 = arith.constant 0 : index
    %155 = vector.load %arg20[%c0_71, %c0_72] : memref<1x64xf32, #tpu.memory_space<vmem>>, vector<1x64xf32>
    %c0_73 = arith.constant 0 : index
    %c0_74 = arith.constant 0 : index
    %156 = vector.load %arg21[%c0_73, %c0_74] : memref<1x64xf32, #tpu.memory_space<vmem>>, vector<1x64xf32>
    %cst_75 = arith.constant dense<0.000000e+00> : vector<32xf32>
    %157 = vector.multi_reduction <add>, %154, %cst_75 [1] : vector<32x64xf32> to vector<32xf32>
    %158 = vector.shape_cast %157 : vector<32xf32> to vector<32x1xf32>
    %cst_76 = arith.constant 6.400000e+01 : f32
    %159 = vector.broadcast %cst_76 : f32 to vector<32x1xf32>
    %160 = arith.divf %158, %159 : vector<32x1xf32>
    %161 = vector.broadcast %160 : vector<32x1xf32> to vector<32x64xf32>
    %162 = arith.subf %154, %161 : vector<32x64xf32>
    %163 = arith.mulf %162, %162 : vector<32x64xf32>
    %cst_77 = arith.constant dense<0.000000e+00> : vector<32xf32>
    %164 = vector.multi_reduction <add>, %163, %cst_77 [1] : vector<32x64xf32> to vector<32xf32>
    %165 = vector.shape_cast %164 : vector<32xf32> to vector<32x1xf32>
    %cst_78 = arith.constant 6.400000e+01 : f32
    %166 = vector.broadcast %cst_78 : f32 to vector<32x1xf32>
    %167 = arith.divf %165, %166 : vector<32x1xf32>
    %168 = vector.broadcast %160 : vector<32x1xf32> to vector<32x64xf32>
    %169 = arith.subf %154, %168 : vector<32x64xf32>
    %cst_79 = arith.constant 9.99999974E-6 : f32
    %170 = vector.broadcast %cst_79 : f32 to vector<32x1xf32>
    %171 = arith.addf %167, %170 : vector<32x1xf32>
    %172 = math.rsqrt %171 : vector<32x1xf32>
    %173 = vector.broadcast %172 : vector<32x1xf32> to vector<32x64xf32>
    %174 = arith.mulf %169, %173 : vector<32x64xf32>
    %175 = vector.broadcast %155 : vector<1x64xf32> to vector<32x64xf32>
    %176 = arith.mulf %174, %175 : vector<32x64xf32>
    %177 = vector.broadcast %156 : vector<1x64xf32> to vector<32x64xf32>
    %178 = arith.addf %176, %177 : vector<32x64xf32>
    %179 = vector.extract_strided_slice %178 {offsets = [0, 0], sizes = [16, 64], strides = [1, 1]} : vector<32x64xf32> to vector<16x64xf32>
    %c0_80 = arith.constant 0 : index
    %c0_81 = arith.constant 0 : index
    %c0_82 = arith.constant 0 : index
    %180 = vector.load %arg22[%c0_80, %c0_81, %c0_82] : memref<1x16x64xf32, #tpu.memory_space<vmem>>, vector<1x16x64xf32>
    %181 = vector.shape_cast %180 : vector<1x16x64xf32> to vector<16x64xf32>
    %182 = vector.shape_cast %179 : vector<16x64xf32> to vector<1x16x64xf32>
    tpu.vector_store %arg22[%c0_80, %c0_81, %c0_82], %182 {strides = array<i32>} : memref<1x16x64xf32, #tpu.memory_space<vmem>>, vector<1x16x64xf32>,
    %183 = vector.extract_strided_slice %178 {offsets = [16, 0], sizes = [16, 64], strides = [1, 1]} : vector<32x64xf32> to vector<16x64xf32>
    %c0_83 = arith.constant 0 : index
    %c0_84 = arith.constant 0 : index
    %c0_85 = arith.constant 0 : index
    %184 = vector.load %arg23[%c0_83, %c0_84, %c0_85] : memref<1x16x64xf32, #tpu.memory_space<vmem>>, vector<1x16x64xf32>
    %185 = vector.shape_cast %184 : vector<1x16x64xf32> to vector<16x64xf32>
    %186 = vector.shape_cast %183 : vector<16x64xf32> to vector<1x16x64xf32>
    tpu.vector_store %arg23[%c0_83, %c0_84, %c0_85], %186 {strides = array<i32>} : memref<1x16x64xf32, #tpu.memory_space<vmem>>, vector<1x16x64xf32>,
    return
  }
  func.func @transform_0(%arg0: i32) -> (i32, i32, i32) {
    %c0_i32 = arith.constant 0 : i32
    %c0_i32_0 = arith.constant 0 : i32
    %c0_i32_1 = arith.constant 0 : i32
    return %arg0, %c0_i32, %c0_i32_0 : i32, i32, i32
  }
  func.func @transform_1(%arg0: i32) -> (i32, i32, i32) {
    %c0_i32 = arith.constant 0 : i32
    %c0_i32_0 = arith.constant 0 : i32
    %c0_i32_1 = arith.constant 0 : i32
    return %arg0, %c0_i32, %c0_i32_0 : i32, i32, i32
  }
  func.func @transform_2(%arg0: i32) -> (i32, i32, i32) {
    %c0_i32 = arith.constant 0 : i32
    %c0_i32_0 = arith.constant 0 : i32
    %c0_i32_1 = arith.constant 0 : i32
    return %arg0, %c0_i32, %c0_i32_0 : i32, i32, i32
  }
  func.func @transform_3(%arg0: i32) -> (i32, i32, i32) {
    %c0_i32 = arith.constant 0 : i32
    %c0_i32_0 = arith.constant 0 : i32
    %c0_i32_1 = arith.constant 0 : i32
    return %arg0, %c0_i32, %c0_i32_0 : i32, i32, i32
  }
  func.func @transform_4(%arg0: i32) -> (i32, i32, i32) {
    %c0_i32 = arith.constant 0 : i32
    %c0_i32_0 = arith.constant 0 : i32
    %c0_i32_1 = arith.constant 0 : i32
    return %arg0, %c0_i32, %c0_i32_0 : i32, i32, i32
  }
  func.func @transform_5(%arg0: i32) -> (i32, i32) {
    %c0_i32 = arith.constant 0 : i32
    %c0_i32_0 = arith.constant 0 : i32
    %c0_i32_1 = arith.constant 0 : i32
    return %c0_i32, %c0_i32_0 : i32, i32
  }
  func.func @transform_6(%arg0: i32) -> (i32, i32) {
    %c0_i32 = arith.constant 0 : i32
    %c0_i32_0 = arith.constant 0 : i32
    %c0_i32_1 = arith.constant 0 : i32
    return %c0_i32, %c0_i32_0 : i32, i32
  }
  func.func @transform_7(%arg0: i32) -> (i32, i32) {
    %c0_i32 = arith.constant 0 : i32
    %c0_i32_0 = arith.constant 0 : i32
    %c0_i32_1 = arith.constant 0 : i32
    return %c0_i32, %c0_i32_0 : i32, i32
  }
  func.func @transform_8(%arg0: i32) -> (i32, i32) {
    %c0_i32 = arith.constant 0 : i32
    %c0_i32_0 = arith.constant 0 : i32
    %c0_i32_1 = arith.constant 0 : i32
    return %c0_i32, %c0_i32_0 : i32, i32
  }
  func.func @transform_9(%arg0: i32) -> (i32, i32) {
    %c0_i32 = arith.constant 0 : i32
    %c0_i32_0 = arith.constant 0 : i32
    %c0_i32_1 = arith.constant 0 : i32
    return %c0_i32, %c0_i32_0 : i32, i32
  }
  func.func @transform_10(%arg0: i32) -> (i32, i32) {
    %c0_i32 = arith.constant 0 : i32
    %c0_i32_0 = arith.constant 0 : i32
    %c0_i32_1 = arith.constant 0 : i32
    return %c0_i32, %c0_i32_0 : i32, i32
  }
  func.func @transform_11(%arg0: i32) -> (i32, i32) {
    %c0_i32 = arith.constant 0 : i32
    %c0_i32_0 = arith.constant 0 : i32
    %c0_i32_1 = arith.constant 0 : i32
    return %c0_i32, %c0_i32_0 : i32, i32
  }
  func.func @transform_12(%arg0: i32) -> (i32, i32) {
    %c0_i32 = arith.constant 0 : i32
    %c0_i32_0 = arith.constant 0 : i32
    %c0_i32_1 = arith.constant 0 : i32
    return %c0_i32, %c0_i32_0 : i32, i32
  }
  func.func @transform_13(%arg0: i32) -> (i32, i32) {
    %c0_i32 = arith.constant 0 : i32
    %c0_i32_0 = arith.constant 0 : i32
    %c0_i32_1 = arith.constant 0 : i32
    return %c0_i32, %c0_i32_0 : i32, i32
  }
  func.func @transform_14(%arg0: i32) -> (i32, i32) {
    %c0_i32 = arith.constant 0 : i32
    %c0_i32_0 = arith.constant 0 : i32
    %c0_i32_1 = arith.constant 0 : i32
    return %c0_i32, %c0_i32_0 : i32, i32
  }
  func.func @transform_15(%arg0: i32) -> (i32, i32) {
    %c0_i32 = arith.constant 0 : i32
    %c0_i32_0 = arith.constant 0 : i32
    %c0_i32_1 = arith.constant 0 : i32
    return %c0_i32, %c0_i32_0 : i32, i32
  }
  func.func @transform_16(%arg0: i32) -> (i32, i32) {
    %c0_i32 = arith.constant 0 : i32
    %c0_i32_0 = arith.constant 0 : i32
    %c0_i32_1 = arith.constant 0 : i32
    return %c0_i32, %c0_i32_0 : i32, i32
  }
  func.func @transform_17(%arg0: i32) -> (i32, i32) {
    %c0_i32 = arith.constant 0 : i32
    %c0_i32_0 = arith.constant 0 : i32
    %c0_i32_1 = arith.constant 0 : i32
    return %c0_i32, %c0_i32_0 : i32, i32
  }
  func.func @transform_18(%arg0: i32) -> (i32, i32) {
    %c0_i32 = arith.constant 0 : i32
    %c0_i32_0 = arith.constant 0 : i32
    %c0_i32_1 = arith.constant 0 : i32
    return %c0_i32, %c0_i32_0 : i32, i32
  }
  func.func @transform_19(%arg0: i32) -> (i32, i32) {
    %c0_i32 = arith.constant 0 : i32
    %c0_i32_0 = arith.constant 0 : i32
    %c0_i32_1 = arith.constant 0 : i32
    return %c0_i32, %c0_i32_0 : i32, i32
  }
  func.func @transform_20(%arg0: i32) -> (i32, i32) {
    %c0_i32 = arith.constant 0 : i32
    %c0_i32_0 = arith.constant 0 : i32
    %c0_i32_1 = arith.constant 0 : i32
    return %c0_i32, %c0_i32_0 : i32, i32
  }
  func.func @transform_21(%arg0: i32) -> (i32, i32, i32) {
    %c0_i32 = arith.constant 0 : i32
    %c0_i32_0 = arith.constant 0 : i32
    %c0_i32_1 = arith.constant 0 : i32
    return %arg0, %c0_i32, %c0_i32_0 : i32, i32, i32
  }
  func.func @transform_22(%arg0: i32) -> (i32, i32, i32) {
    %c0_i32 = arith.constant 0 : i32
    %c0_i32_0 = arith.constant 0 : i32
    %c0_i32_1 = arith.constant 0 : i32
    return %arg0, %c0_i32, %c0_i32_0 : i32, i32, i32
  }
}

</mosaic_0001>

<bundles_post_ra>
// kernel: dense_to_sparse_transformer_layer.3
= control target key start
LH: loop header
LB: loop body
LE: loop exit
PB: predicated region body
PF: predicated region fallthrough
CT: control target
= control target key end

     0   :  { %s4094_s0 = inlined_call_operand.vmem [shape: f32[2,16,64], index: 0, kind: input, shape index: {}]   ;;  %s4095_s1 = inlined_call_operand.vmem [shape: f32[2,64,16], index: 1, kind: input, shape index: {}]   ;;  %s4096_s2 = inlined_call_operand.vmem [shape: f32[2,16,64], index: 2, kind: input, shape index: {}]   ;;  %s4097_s3 = inlined_call_operand.vmem [shape: f32[2,64,16], index: 3, kind: input, shape index: {}]   ;;  %s4098_s4 = inlined_call_operand.vmem [shape: f32[2,1,16], index: 4, kind: input, shape index: {}]   ;;  %s4099_s5 = inlined_call_operand.vmem [shape: bf16[64,64], index: 5, kind: input, shape index: {}]   ;;  %s4100_s6 = inlined_call_operand.vmem [shape: bf16[64,64], index: 6, kind: input, shape index: {}]   ;;  %s4101_s7 = inlined_call_operand.vmem [shape: bf16[64,64], index: 7, kind: input, shape index: {}]   ;;  %s4102_s8 = inlined_call_operand.vmem [shape: bf16[64,64], index: 8, kind: input, shape index: {}]   ;;  %s4103_s9 = inlined_call_operand.vmem [shape: f32[1,64], index: 9, kind: input, shape index: {}]   ;;  %s4104_s10 = inlined_call_operand.vmem [shape: f32[64,1], index: 10, kind: input, shape index: {}]   ;;  %s4105_s11 = inlined_call_operand.vmem [shape: f32[1,64], index: 11, kind: input, shape index: {}]   ;;  %s4106_s12 = inlined_call_operand.vmem [shape: f32[1,64], index: 12, kind: input, shape index: {}]   ;;  %s4107_s13 = inlined_call_operand.vmem [shape: f32[1,64], index: 13, kind: input, shape index: {}]   ;;  %s4108_s14 = inlined_call_operand.vmem [shape: f32[1,64], index: 14, kind: input, shape index: {}]   ;;  %s4109_s15 = inlined_call_operand.vmem [shape: bf16[64,256], index: 15, kind: input, shape index: {}]   ;;  %s4110_s16 = inlined_call_operand.vmem [shape: f32[1,256], index: 16, kind: input, shape index: {}]   ;;  %s4111_s17 = inlined_call_operand.vmem [shape: bf16[256,64], index: 17, kind: input, shape index: {}]   ;;  %s4112_s18 = inlined_call_operand.vmem [shape: f32[1,64], index: 18, kind: input, shape index: {}]   ;;  %s4113_s19 = inlined_call_operand.vmem [shape: f32[1,64], index: 19, kind: input, shape index: {}]   ;;  %s4114_s20 = inlined_call_operand.vmem [shape: f32[1,64], index: 20, kind: input, shape index: {}]   ;;  %s4115_s21 = inlined_call_operand.hbm [shape: f32[2,16,64], index: 21, kind: output, shape index: {0}]   ;;  %s4116_s22 = inlined_call_operand.hbm [shape: f32[2,16,64], index: 22, kind: output, shape index: {1}]  }
   0x1   :  { %4131 = sst [smem:[#allocation14_spill]] %s4094_s0 }
   0x2   :  { %4132 = sst [smem:[#allocation15_spill]] %s4095_s1 }
   0x3   :  { %4133 = sst [smem:[#allocation16_spill]] %s4096_s2 }
   0x4   :  { %4134 = sst [smem:[#allocation17_spill]] %s4097_s3 }
   0x5   :  { %4135 = sst [smem:[#allocation18_spill]] %s4098_s4 }
   0x6   :  { %4136 = sst [smem:[#allocation19_spill]] %s4099_s5 }
   0x7   :  { %4137 = sst [smem:[#allocation20_spill]] %s4100_s6 }
   0x8   :  { %4138 = sst [smem:[#allocation21_spill]] %s4101_s7 }
   0x9   :  { %4139 = sst [smem:[#allocation22_spill]] %s4115_s21 }
   0xa   :  { %4140 = sst [smem:[#allocation23_spill]] %s4116_s22 }
   0xb   :  { %28 = vsyncpa [#allocation3], 0 }
   0xc   :  { %30 = vsyncpa [#allocation3 + $0x1], 0 }
   0xd   :  { %31 = vsyncpa [#allocation5], 0 }
   0xe   :  { %33 = vsyncpa [#allocation5 + $0x1], 0  ;;  %s3411_s3 = smov 0   ;;  %s3413_s28 = smov 0  }
   0xf   :  { %s3415_s29 = smov 0   ;;  %s3417_s30 = smov 0  }
  0x10 LB: > { %4141 = sst [smem:[#allocation8_spill]] %s3271_s3  ;;  %s3432_s4 = sadd.s32 4294967295, %s3283_s30   ;;  %s3283_s30 = sphi %s3417_s30, %s4165_s30   ;;  %s3279_s29 = sphi %s3415_s29, %s4167_s29   ;;  %s3275_s28 = sphi %s3413_s28, %s4169_s28   ;;  %s3271_s3 = sphi %s3411_s3, %s4168_s3  }
  0x11   : > { %4142 = sst [smem:[#allocation9_spill]] %s3279_s29  ;;  %s2665_s0 = sadd.s32 4294967294, %s3283_s30  }
  0x12   : > { %4143 = sst [smem:[#allocation10_spill]] %s3283_s30  ;;  %s3436_s23 = sadd.s32 1, %s3283_s30  }
  0x13   : > { %4144 = sst [smem:[#allocation11_spill]] %s3436_s23  ;;  %s512_s1 = sadd.s32 1, %s3279_s29 }
  0x14   : > { %s509_s5 = ssub.s32 %s3283_s30, %s3436_s23  ;;  %p522_p0 = scmp.ne.s32.totalorder %s3279_s29, %s3275_s28 }
  0x15   : > { %p510_p1 = scmp.eq.s32.totalorder %s509_s5, 0  ;;  %p523_p2 = scmp.eq.s32.totalorder %s3432_s4, 1 }
  0x16   : > { %p528_p3 = scmp.ne.s32.totalorder %s3275_s28, %s3271_s3  ;;  %p529_p4 = scmp.eq.s32.totalorder %s2665_s0, 1 }
  0x17   : > { %s3447_s24 = scalar_select %p510_p1, %s3279_s29, %s512_s1  }
  0x18   : > { %p3449_p5 = por %p523_p2, %p522_p0  ;;  %p3453_p6 = por %p529_p4, %p528_p3 }
  0x19   : > { %4145 = sst [smem:[#allocation12_spill]] %s3447_s24  ;;  %p2668_p7 = scmp.ge.s32.totalorder %s3283_s30, 1 }
  0x1a   : > { %s4147_s25 = scalar_select %p3453_p6, 1, 0 }
  0x1b   : > { %p659_p8 = scmp.lt.s32.totalorder %s3283_s30, 3 }
  0x1c   : > { %4148 = sst [smem:[#allocation13_spill]] %s4147_s25 }
  0x1d   : > { %p660_p9 = pnand %p2668_p7, %p659_p8 }
  0x1e   : > { %p744_p10 = scmp.lt.s32.totalorder (!%p660_p9), %s3432_s4, 1  ;;  %s4149_s27 = sld [smem:[#allocation19_spill]] (!%p660_p9) }
  0x1f   : > { %663 = sbr.rel (%p660_p9) target bundleno = 3053 (0xbed), region = 104  ;;  %s4150_s3 = sld [smem:[#allocation17_spill]] (!%p660_p9) }
  0x20   : > { %s4151_s22 = sld [smem:[#allocation14_spill]] (!%p660_p9)  ;;  %s3287_s26 = smov (!%p660_p9), 112  }
  0x21   : > { %s4152_s2 = sld [smem:[#allocation16_spill]] (!%p660_p9) }
  0x22   : > { %s4153_s5 = sld [smem:[#allocation20_spill]] (!%p660_p9) }
  0x23   : > { %s4156_s7 = sld [smem:[#allocation21_spill]] (!%p660_p9) }
  0x24   : > { %v3065_v0 = vld [vmem:[%s4149_s27 + $0x18] sm:$0xff]   ;;  %s3464_s0 = scalar_select %p744_p10, %s3432_s4, 1  ;;  %v3066_v1 = vld [vmem:[%s4149_s27 + $0x10] sm:$0xff]   ;;  %v3067_v2 = vld [vmem:[%s4149_s27 + $0x8] sm:$0xff]   ;;  %vm880_vm0 = vcmask 523264   ;;  %v3286_v25 = vmov 0  }
  0x25   : > { %2852 = vmatprep.subr.bf16.mxu0 %v3065_v0  ;;  %v3068_v15 = vld [vmem:[%s4149_s27] sm:$0xff]   ;;  %v953_v24 = vld [vmem:[%s4104_s10 + $0x8] sm:$0xff]  ;;  %3033 = vset.pattern.permute.xlu0 %v3286_v25  ;;  %vm820_vm1 = vcmask 130048   ;;  %vm1261_vm2 = vcmask 261120   ;;  %vm1921_vm3 = vcmask 392192  }
  0x26   : > { %s2765_s24 = sshll.u32 %s3464_s0, 6  ;;  %2853 = vmatpush3.bf16.msra.mxu0 %v3065_v0  ;;  %s2764_s25 = sshll.u32 %s3464_s0, 4  ;;  %v952_v23 = vld [vmem:[%s4104_s10] sm:$0xff]  ;;  %3034 = vset.pattern.permute.xlu1 %v3286_v25 }
  0x27   : > { %s763_s30 = scalar_lea.vmem %s4150_s3, %s2765_s24  ;;  %2854 = vmatprep.subr.bf16.mxu0 %v3066_v1  ;;  %s3482_s21 = scalar_lea.vmem %s4151_s22, %s2764_s25  ;;  %v2680_v59 = vld [vmem:[%s4103_s9] ss:$0 sm:$0xff] }
  0x28   : > { %v786_v3 = vld [vmem:[%s763_s30 + $0x30] sm:$0xff]  ;;  %v787_v4 = vld [vmem:[%s763_s30 + $0x38] sm:$0xff]  ;;  %v784_v5 = vld [vmem:[%s763_s30 + $0x20] sm:$0xff]  ;;  %s3285_s3 = smov 16   ;;  %s3492_s1 = scalar_lea.vmem %s4152_s2, %s2764_s25 }
  0x29   : > { %v3013_v6 = vpack.i.bf16 %v787_v4, %v786_v3  ;;  %v785_v7 = vld [vmem:[%s763_s30 + $0x28] sm:$0xff]  ;;  %v782_v8 = vld [vmem:[%s763_s30 + $0x10] sm:$0xff]  ;;  %v783_v9 = vld [vmem:[%s763_s30 + $0x18] sm:$0xff]  ;;  %s4154_s25 = sld [smem:[#allocation15_spill]] }
  0x2a   : > { %v3023_v10 = vpack.i.bf16 %v783_v9, %v782_v8  ;;  %v780_v11 = vld [vmem:[%s763_s30] sm:$0xff]  ;;  %v781_v12 = vld [vmem:[%s763_s30 + $0x8] sm:$0xff]  ;;  %2855 = vmatpush3.bf16.msra.mxu0 %v3066_v1  ;;  %v3018_v14 = vpack.i.bf16 %v785_v7, %v784_v5 }
  0x2b   : > { %v768_v13 = vld [vmem:[%s3482_s21] sm:$0xff]  ;;  %3014 = vrot.lane.b32.xlu0 %v3013_v6, %s3285_s3  ;;  %2856 = vmatprep.subr.bf16.mxu0 %v3067_v2  ;;  %v769_v16 = vld [vmem:[%s3482_s21 + $0x8] sm:$0xff]  ;;  %v3028_v17 = vpack.i.bf16 %v781_v12, %v780_v11 }
  0x2c   : > { %3024 = vrot.lane.b32.xlu1 %v3023_v10, %s3285_s3  ;;  %v3496_v18 = vpack.c.bf16 %v769_v16, %v768_v13  ;;  %v770_v19 = vld [vmem:[%s3492_s1] sm:$0xff]  ;;  %v771_v20 = vld [vmem:[%s3492_s1 + $0x8] sm:$0xff] }
  0x2d   : > { %v3069_v21 = vld [vmem:[%s4153_s5] sm:$0xff]   ;;  %v3507_v22 = vpack.c.bf16 %v771_v20, %v770_v19  ;;  %v3070_v58 = vld [vmem:[%s4153_s5 + $0x8] sm:$0xff]  }
  0x2e   : > { %2857 = vmatpush3.bf16.msra.mxu0 %v3067_v2  ;;  %2860 = vmatprep.mubr.msk.bf16.mxu0 %vm880_vm0, %v3496_v18 }
  0x2f   : > { %3019 = vrot.lane.b32.xlu0 %v3018_v14, %s3285_s3  ;;  %2858 = vmatprep.subr.bf16.mxu0 %v3068_v15  ;;  %s753_s29 = scalar_lea.vmem %s4154_s25, %s2765_s24  ;;  %s4155_s25 = sld [smem:[#allocation18_spill]] }
  0x30   : > { %3029 = vrot.lane.b32.xlu1 %v3028_v17, %s3285_s3  ;;  %v778_v27 = vld [vmem:[%s753_s29 + $0x30] sm:$0xff]  ;;  %v779_v28 = vld [vmem:[%s753_s29 + $0x38] sm:$0xff]  ;;  %v776_v40 = vld [vmem:[%s753_s29 + $0x20] sm:$0xff]  ;;  %s3289_s24 = smov 80  }
  0x31   : > { %v774_v34 = vld [vmem:[%s753_s29 + $0x10] sm:$0xff]  ;;  %v775_v35 = vld [vmem:[%s753_s29 + $0x18] sm:$0xff]  ;;  %v777_v41 = vld [vmem:[%s753_s29 + $0x28] sm:$0xff] }
  0x32   : > { %2859 = vmatpush3.bf16.msra.mxu0 %v3068_v15  ;;  %v772_v49 = vld [vmem:[%s753_s29] sm:$0xff]  ;;  %v773_v50 = vld [vmem:[%s753_s29 + $0x8] sm:$0xff] }
  0x33   : > { %962 = vperm.xlu0 %3033, %v952_v23   ;;  %v3072_v23 = vld [vmem:[%s4156_s7 + $0x10] sm:$0xff]  }
  0x34   : > { %967 = vperm.xlu1 %3034, %v953_v24   ;;  %v3073_v24 = vld [vmem:[%s4153_s5 + $0x10] sm:$0xff]  }
  0x35   : > { %2861 = vmatmul.mubr.msk.bf16.vlgmr.msra.gmra.mxu0 %vm880_vm0, %v3507_v22  ;;  %s766_s29 = scalar_lea.vmem %s4155_s25, %s3464_s0  ;;  %s3288_s0 = smov 96  }
  0x36   : > { %2872 = vmatprep.mubr.msk.bf16.mxu0 %vm880_vm0, %v3069_v21  ;;  %v2679_v10 = vld [vmem:[%s766_s29] ss:$0 sm:$0xff]  ;;  %v3071_v21 = vld [vmem:[%s4156_s7 + $0x18] sm:$0xff]  }
  0x38   : > { %835 = vrot.lane.b32.xlu1 %v2679_v10, %s3285_s3 }
  0x9d   : > { %v3015_v26 = vpop.permute.xlu0 %3014 }
  0x9e   : > { %v3017_v29 = vunpack.i.h.bf16 %v3015_v26  ;;  %v3016_v30 = vunpack.i.l.bf16 %v3015_v26  ;;  %v3025_v31 = vpop.permute.xlu1 %3024  ;;  %v3074_v26 = vld [vmem:[%s4153_s5 + $0x18] sm:$0xff]  }
  0x9f   : > { %v3027_v32 = vunpack.i.h.bf16 %v3025_v31  ;;  %v3026_v33 = vunpack.i.l.bf16 %v3025_v31 }
  0xa0   : > { %v827_v36 = vsel %vm820_vm1, %v778_v27, %v3016_v30  ;;  %v828_v37 = vsel %vm820_vm1, %v779_v28, %v3017_v29  ;;  %v3075_v27 = vld [vmem:[%s4156_s7 + $0x8] sm:$0xff]   ;;  %v3076_v28 = vld [vmem:[%s4156_s7] sm:$0xff]   ;;  %v1202_v29 = vlaneseq }
  0xa1   : > { %v3020_v38 = vpop.permute.xlu0 %3019  ;;  %v951_v39 = vpack.c.bf16 %v828_v37, %v827_v36  ;;  %v823_v45 = vsel %vm820_vm1, %v774_v34, %v3026_v33  ;;  %v824_v46 = vsel %vm820_vm1, %v775_v35, %v3027_v32 }
  0xa2   : > { %v3022_v42 = vunpack.i.h.bf16 %v3020_v38  ;;  %v3021_v43 = vunpack.i.l.bf16 %v3020_v38  ;;  %v3030_v44 = vpop.permute.xlu1 %3029  ;;  %v949_v54 = vpack.c.bf16 %v824_v46, %v823_v45  ;;  %v3581_v30 = vshrl.u32 %v1202_v29, 7  ;;  %v954_v45 = vld [vmem:[%s4104_s10 + $0x10] sm:$0xff] }
  0xa3   : > { %2864 = vmatprep.subr.bf16.mxu0 %v951_v39  ;;  %v3032_v47 = vunpack.i.h.bf16 %v3030_v44  ;;  %v3031_v48 = vunpack.i.l.bf16 %v3030_v44 }
  0xa4   : > { %2865 = vmatpush3.bf16.msra.mxu0 %v951_v39  ;;  %v825_v51 = vsel %vm820_vm1, %v776_v40, %v3021_v43  ;;  %v826_v52 = vsel %vm820_vm1, %v777_v41, %v3022_v42  ;;  %v1204_v32 = vsub.s32 0, %v3581_v30 }
  0xa5   : > { %v950_v53 = vpack.c.bf16 %v826_v52, %v825_v51  ;;  %v821_v55 = vsel %vm820_vm1, %v772_v49, %v3031_v48  ;;  %v822_v56 = vsel %vm820_vm1, %v773_v50, %v3032_v47 }
  0xa6   : > { %v948_v57 = vpack.c.bf16 %v822_v56, %v821_v55 }
  0xa7   : > { %2866 = vmatprep.subr.bf16.mxu0 %v950_v53 }
  0xa8   : > { %2867 = vmatpush3.bf16.msra.mxu0 %v950_v53 }
  0xa9   : > { %2868 = vmatprep.subr.bf16.mxu0 %v949_v54 }
  0xac   : > { %2869 = vmatpush3.bf16.msra.mxu0 %v949_v54 }
  0xad   : > { %2870 = vmatprep.subr.bf16.mxu0 %v948_v57 }
  0xae   : > { %v963_v13 = vpop.permute.xlu0 %962 }
  0xaf   : > { %v968_v15 = vpop.permute.xlu1 %967 }
  0xb0   : > { %2871 = vmatpush3.bf16.msra.mxu0 %v948_v57 }
  0xb1   : > { %2880 = vmatprep.subr.bf16.mxu0 %v3071_v21 }
  0xb3   : > { %2873 = vmatmul.mubr.msk.bf16.vlgmr.msra.gmra.mxu0 %vm880_vm0, %v3070_v58  ;;  %v836_v31 = vpop.permute.xlu1 %835 }
  0xb4   : > { %2876 = vmatprep.mubr.msk.bf16.mxu0 %vm880_vm0, %v3073_v24  ;;  %2881 = vmatpush3.bf16.msra.mxu0 %v3071_v21  ;;  %v957_v24 = vld [vmem:[%s4104_s10 + $0x28] sm:$0xff] }
  0xb5   : > { %2882 = vmatprep.subr.bf16.mxu0 %v3072_v23 }
  0xb8   : > { %2883 = vmatpush3.bf16.msra.mxu0 %v3072_v23 }
  0xb9   : > { %2884 = vmatprep.subr.bf16.mxu0 %v3075_v27 }
  0xbb   : > { %2877 = vmatmul.mubr.msk.bf16.gmra.mxu0 %vm880_vm0, %v3074_v26  ;;  %v955_v26 = vld [vmem:[%s4104_s10 + $0x18] sm:$0xff] }
  0xbc   : > { %2888 = vmatprep.mubr.msk.bf16.mxu0 %vm880_vm0, %v3496_v18  ;;  %2885 = vmatpush3.bf16.msra.mxu0 %v3075_v27  ;;  %v838_v18 = vsel %vm820_vm1, 0.0, %v836_v31  ;;  %v959_v27 = vld [vmem:[%s4104_s10 + $0x38] sm:$0xff] }
  0xbd   : > { %2886 = vmatprep.subr.bf16.mxu0 %v3076_v28  ;;  %v3587_v34 = vrot.slane %v838_v18, %v1204_v32 }
  0xc0   : > { %2887 = vmatpush3.bf16.msra.mxu0 %v3076_v28  ;;  %v958_v28 = vld [vmem:[%s4104_s10 + $0x30] sm:$0xff] }
  0xc3   : > { %2889 = vmatmul.mubr.msk.bf16.vlgmr.msra.gmra.mxu0 %vm880_vm0, %v3507_v22 }
  0xf5   : > { %v2862_v60 = vpop.f32.mrf.mxu0 }
  0xf6   : > { %v930_v61 = vadd.f32 %v2862_v60, %v2680_v59 }
  0xf7   : > { %v921_v62 = vpop.f32.mrf.mxu0 }
  0xf8   : > { %v922_v63 = vadd.f32 %v2680_v59, %v921_v62  ;;  %v938_v1 = vmul.f32 0.25, %v930_v61 }
  0xf9   : > { %v2863_v0 = vpop.f32.mrf.mxu0 }
  0xfa   : > { %v933_v2 = vadd.f32 %v2863_v0, %v2680_v59  ;;  %v936_v4 = vmul.f32 0.25, %v922_v63 }
  0xfb   : > { %v924_v3 = vpop.f32.mrf.mxu0 }
  0xfc   : > { %v939_v5 = vmul.f32 0.25, %v933_v2  ;;  %v925_v6 = vadd.f32 %v2680_v59, %v924_v3 }
  0xfe   : > { %v3540_v7 = vpack.c.bf16 %v939_v5, %v938_v1  ;;  %v937_v8 = vmul.f32 0.25, %v925_v6 }
 0x100   : > { %v3542_v9 = vpack.c.bf16 %v937_v8, %v936_v4  ;;  %v2695_v8 = vld [vmem:[%s4105_s11] ss:$0 sm:$0xff] }
 0x102   : > { %2894 = vmatprep.mubr.msk.bf16.mxu1 %vm820_vm1, %v3542_v9 }
 0x173   : > { %v3551_v11 = vpop.f32.mrf.mxu0 }
 0x175   : > { %v1066_v12 = vpop.f32.mrf.mxu0 }
 0x176   : > { %v1067_v17 = vadd.f32 %v1066_v12, %v963_v13 }
 0x177   : > { %v3553_v14 = vpop.f32.mrf.mxu0 }
 0x179   : > { %v1069_v16 = vpop.f32.mrf.mxu0 }
 0x17a   : > { %v1070_v19 = vadd.f32 %v1069_v16, %v968_v15 }
 0x17b   : > { %v3600_v58 = vpop.f32.mrf.mxu0 }
 0x17c   : > { %v1196_v20 = vpack.c.bf16 %v1070_v19, %v1067_v17  ;;  %v956_v19 = vld [vmem:[%s4104_s10 + $0x20] sm:$0xff] }
 0x17d   : > { %v3604_v60 = vpop.f32.mrf.mxu0 }
 0x17e   : > { %2892 = vmatprep.subr.bf16.mxu1 %v1196_v20 }
 0x17f   : > { %2893 = vmatpush3.bf16.msra.mxu1 %v1196_v20  ;;  %v3614_v1 = vpop.f32.mrf.mxu0 }
 0x181   : > { %v1085_v5 = vpop.f32.mrf.mxu0 }
 0x182   : > { %2895 = vmatmul.mubr.msk.bf16.vlgmr.msra.gmra.mxu1 %vm820_vm1, %v3540_v7 }
 0x183   : > { %v2890_v6 = vpop.f32.mrf.mxu0 }
 0x184   : > { %v1179_v12 = vadd.f32 %v2890_v6, %v2695_v8 }
 0x185   : > { %v1170_v10 = vpop.f32.mrf.mxu0 }
 0x186   : > { %v1171_v16 = vadd.f32 %v2695_v8, %v1170_v10 }
 0x187   : > { %v2891_v13 = vpop.f32.mrf.mxu0 }
 0x188   : > { %v1182_v15 = vadd.f32 %v2891_v13, %v2695_v8 }
 0x189   : > { %v1173_v20 = vpop.f32.mrf.mxu0 }
 0x18a   : > { %v3625_v17 = vpack.c.bf16 %v1182_v15, %v1179_v12  ;;  %v1174_v21 = vadd.f32 %v2695_v8, %v1173_v20 }
 0x18c   : > { %2898 = vmatprep.subr.bf16.mxu1 %v3625_v17  ;;  %v3632_v23 = vpack.c.bf16 %v1174_v21, %v1171_v16 }
 0x18d   : > { %2899 = vmatpush3.bf16.msra.mxu1 %v3625_v17 }
 0x18e   : > { %2900 = vmatprep.subr.bf16.mxu1 %v3632_v23 }
 0x191   : > { %2901 = vmatpush3.bf16.msra.mxu1 %v3632_v23 }
 0x242   : > { %v2896_v33 = vpop.f32.mrf.mxu1 }
 0x243   : > { %v1255_v22 = vadd.f32 %v2896_v33, %v3587_v34 }
 0x244   : > { %v1246_v35 = vpop.f32.mrf.mxu1 }
 0x245   : > { %v1247_v36 = vadd.f32 %v1246_v35, %v3587_v34  ;;  %v1268_v43 = vsel %vm1261_vm2, %v1255_v22, -inf }
 0x246   : > { %v2897_v37 = vpop.f32.mrf.mxu1 }
 0x247   : > { %v1262_v38 = vsel %vm1261_vm2, %v1247_v36, -inf  ;;  %v1258_v41 = vadd.f32 %v2897_v37, %v3587_v34 }
 0x248   : > { %v1249_v39 = vpop.f32.mrf.mxu1  ;;  %1263 = vmax.xlane.f32.xlu0 %v1262_v38 }
 0x249   : > { %v1250_v40 = vadd.f32 %v1249_v39, %v3587_v34  ;;  %v1271_v44 = vsel %vm1261_vm2, %v1258_v41, -inf }
 0x24b   : > { %v1265_v42 = vsel %vm1261_vm2, %v1250_v40, -inf }
 0x24c   : > { %1266 = vmax.xlane.f32.xlu1 %v1265_v42  ;;  %1269 = vmax.xlane.f32.xlu0 %v1268_v43 }
 0x250   : > { %1272 = vmax.xlane.f32.xlu0 %v1271_v44 }
 0x25d   : > { %972 = vperm.xlu1 %3034, %v954_v45  }
 0x2d1   : > { %v1264_v46 = vpop.xlane.xlu0 %1263 }
 0x2d2   : > { %v1274_v47 = vsub.f32 %v1247_v36, %v1264_v46 }
 0x2d4   : > { %v1278_v53 = vmul.f32 1.442695, %v1274_v47 }
 0x2d5   : > { %v1267_v48 = vpop.xlane.xlu1 %1266  ;;  %v1270_v49 = vpop.xlane.xlu0 %1269 }
 0x2d6   : > { %v1276_v50 = vsub.f32 %v1255_v22, %v1270_v49  ;;  %v1275_v51 = vsub.f32 %v1250_v40, %v1267_v48 }
 0x2d8   : > { %v1282_v52 = vmul.f32 1.442695, %v1276_v50  ;;  %v1280_v56 = vmul.f32 1.442695, %v1275_v51 }
 0x2d9   : > { %v1273_v54 = vpop.xlane.xlu0 %1272  ;;  %v973_v29 = vpop.permute.xlu1 %972 }
 0x2da   : > { %v1277_v55 = vsub.f32 %v1258_v41, %v1273_v54  ;;  %3109 = vpow2.f32 %v1282_v52  ;;  %v1075_v22 = vadd.f32 %v3551_v11, %v973_v29 }
 0x2db   : > { %3111 = vpow2.f32 %v1278_v53 }
 0x2dc   : > { %v1284_v57 = vmul.f32 1.442695, %v1277_v55 }
 0x2de   : > { %3113 = vpow2.f32 %v1284_v57 }
 0x2df   : > { %3115 = vpow2.f32 %v1280_v56 }
 0x2e7   : > { %v3602_v59 = vpop.eup %3109 }
 0x2e8   : > { %v1292_v61 = vsel %vm1261_vm2, %v3602_v59, 0.0  ;;  %v3608_v62 = vpop.eup %3111 }
 0x2e9   : > { %1293 = vadd.xlane.f32.xlu1 %v1292_v61  ;;  %v1286_v3 = vsel %vm1261_vm2, %v3608_v62, 0.0 }
 0x2eb   : > { %v3610_v63 = vpop.eup %3113 }
 0x2ec   : > { %v1295_v0 = vsel %vm1261_vm2, %v3610_v63, 0.0  ;;  %v3616_v2 = vpop.eup %3115 }
 0x2ed   : > { %1296 = vadd.xlane.f32.xlu0 %v1295_v0  ;;  %1287 = vadd.xlane.f32.xlu1 %v1286_v3  ;;  %v1289_v4 = vsel %vm1261_vm2, %v3616_v2, 0.0 }
 0x2f1   : > { %1290 = vadd.xlane.f32.xlu0 %v1289_v4 }
 0x2fe   : > { %982 = vperm.xlu1 %3034, %v956_v19  }
 0x302   : > { %987 = vperm.xlu1 %3034, %v957_v24  }
 0x306   : > { %1367 = vrot.lane.b32.xlu1 %v3540_v7, %s3287_s26 }
 0x307   : > { %977 = vperm.xlu0 %3033, %v955_v26  }
 0x30a   : > { %997 = vperm.xlu1 %3034, %v959_v27  }
 0x30b   : > { %1365 = vrot.lane.b32.xlu0 %v3542_v9, %s3287_s26 }
 0x30e   : > { %1535 = vrot.lane.b32.xlu1 %v3540_v7, %s3288_s0 }
 0x30f   : > { %992 = vperm.xlu0 %3033, %v958_v28  }
 0x312   : > { %1701 = vrot.lane.b32.xlu1 %v3540_v7, %s3289_s24 }
 0x313   : > { %1533 = vrot.lane.b32.xlu0 %v3542_v9, %s3288_s0 }
 0x317   : > { %1699 = vrot.lane.b32.xlu0 %v3542_v9, %s3289_s24 }
 0x372   : > { %v1294_v31 = vpop.xlane.xlu1 %1293 }
 0x376   : > { %v1297_v18 = vpop.xlane.xlu0 %1296  ;;  %v1288_v33 = vpop.xlane.xlu1 %1287 }
 0x377   : > { %3117 = vrcp.f32 %v1297_v18 }
 0x378   : > { %3119 = vrcp.f32 %v1288_v33 }
 0x379   : > { %3121 = vrcp.f32 %v1294_v31 }
 0x37a   : > { %v1291_v35 = vpop.xlane.xlu0 %1290  ;;  %v983_v36 = vpop.permute.xlu1 %982 }
 0x37b   : > { %3123 = vrcp.f32 %v1291_v35 }
 0x37e   : > { %v988_v39 = vpop.permute.xlu1 %987 }
 0x37f   : > { %v1086_v47 = vadd.f32 %v1085_v5, %v988_v39 }
 0x382   : > { %v978_v37 = vpop.permute.xlu0 %977  ;;  %v1368_v11 = vpop.permute.xlu1 %1367 }
 0x383   : > { %v1078_v7 = vadd.f32 %v3553_v14, %v978_v37  ;;  %v1083_v14 = vadd.f32 %v3604_v60, %v983_v36 }
 0x384   : > { %v3118_v38 = vpop.eup %3117 }
 0x385   : > { %v1197_v40 = vpack.c.bf16 %v1078_v7, %v1075_v22  ;;  %v3120_v41 = vpop.eup %3119  ;;  %v1305_v43 = vmul.f32 %v3118_v38, %v3610_v63  ;;  %v1198_v51 = vpack.c.bf16 %v1086_v47, %v1083_v14 }
 0x386   : > { %v3122_v9 = vpop.eup %3121  ;;  %v1366_v44 = vpop.permute.xlu0 %1365  ;;  %v1302_v45 = vmul.f32 %v3120_v41, %v3608_v62 }
 0x387   : > { %2906 = vmatprep.subr.bf16.mxu1 %v1197_v40  ;;  %v1304_v48 = vmul.f32 %v3122_v9, %v3602_v59  ;;  %v998_v53 = vpop.permute.xlu1 %997 }
 0x388   : > { %v3124_v42 = vpop.eup %3123  ;;  %v1094_v55 = vadd.f32 %v3614_v1, %v998_v53 }
 0x389   : > { %v1303_v46 = vmul.f32 %v3124_v42, %v3616_v2  ;;  %v1307_v50 = vpack.c.bf16 %v1305_v43, %v1304_v48 }
 0x38a   : > { %v993_v52 = vpop.permute.xlu0 %992 }
 0x38b   : > { %v1306_v49 = vpack.c.bf16 %v1303_v46, %v1302_v45  ;;  %v1091_v54 = vadd.f32 %v3600_v58, %v993_v52  ;;  %v1536_v59 = vpop.permute.xlu1 %1535 }
 0x38d   : > { %2902 = vmatprep.mubr.msk.bf16.mxu1 %vm1261_vm2, %v1306_v49  ;;  %v1199_v56 = vpack.c.bf16 %v1094_v55, %v1091_v54 }
 0x38e   : > { %2903 = vmatmul.mubr.msk.bf16.vlgmr.msra.gmra.mxu1 %vm1261_vm2, %v1307_v50  ;;  %v1534_v57 = vpop.permute.xlu0 %1533 }
 0x38f   : > { %2907 = vmatpush3.bf16.msra.mxu1 %v1197_v40  ;;  %2908 = vmatprep.mubr.msk.bf16.mxu1 %vm820_vm1, %v1366_v44  ;;  %v1702_v61 = vpop.permute.xlu1 %1701 }
 0x390   : > { %2920 = vmatprep.subr.bf16.mxu1 %v1198_v51 }
 0x392   : > { %v1700_v60 = vpop.permute.xlu0 %1699 }
 0x396   : > { %2909 = vmatmul.mubr.msk.bf16.vlgmr.msra.gmra.mxu1 %vm820_vm1, %v1368_v11 }
 0x397   : > { %2921 = vmatpush3.bf16.msra.mxu1 %v1198_v51  ;;  %2922 = vmatprep.mubr.msk.bf16.mxu1 %vm820_vm1, %v1534_v57 }
 0x398   : > { %2934 = vmatprep.subr.bf16.mxu1 %v1199_v56 }
 0x39e   : > { %2923 = vmatmul.mubr.msk.bf16.vlgmr.msra.gmra.mxu1 %vm820_vm1, %v1536_v59 }
 0x39f   : > { %2935 = vmatpush3.bf16.msra.mxu1 %v1199_v56  ;;  %2936 = vmatprep.mubr.msk.bf16.mxu1 %vm820_vm1, %v1700_v60 }
 0x3a6   : > { %2937 = vmatmul.mubr.msk.bf16.vlgmr.msra.gmra.mxu1 %vm820_vm1, %v1702_v61 }
 0x44e   : > { %v3677_v58 = vpop.f32.mrf.mxu1 }
 0x450   : > { %v3679_v62 = vpop.f32.mrf.mxu1 }
 0x452   : > { %v3681_v63 = vpop.f32.mrf.mxu1 }
 0x454   : > { %v3683_v0 = vpop.f32.mrf.mxu1 }
 0x456   : > { %v2910_v1 = vpop.f32.mrf.mxu1 }
 0x457   : > { %v1418_v2 = vadd.f32 %v2910_v1, %v3587_v34 }
 0x458   : > { %v1409_v3 = vpop.f32.mrf.mxu1 }
 0x459   : > { %v1410_v4 = vadd.f32 %v1409_v3, %v3587_v34  ;;  %v1430_v5 = vsel %vm1261_vm2, %v1418_v2, -inf }
 0x45a   : > { %1431 = vmax.xlane.f32.xlu0 %v1430_v5  ;;  %v2911_v6 = vpop.f32.mrf.mxu1 }
 0x45b   : > { %v1421_v10 = vadd.f32 %v2911_v6, %v3587_v34  ;;  %v1424_v13 = vsel %vm1261_vm2, %v1410_v4, -inf }
 0x45c   : > { %v1412_v8 = vpop.f32.mrf.mxu1 }
 0x45d   : > { %v1413_v12 = vadd.f32 %v1412_v8, %v3587_v34  ;;  %v1433_v21 = vsel %vm1261_vm2, %v1421_v10, -inf }
 0x45e   : > { %1425 = vmax.xlane.f32.xlu0 %v1424_v13  ;;  %v2924_v15 = vpop.f32.mrf.mxu1 }
 0x45f   : > { %v1586_v16 = vadd.f32 %v2924_v15, %v3587_v34  ;;  %v1427_v19 = vsel %vm1261_vm2, %v1413_v12, -inf }
 0x460   : > { %1428 = vmax.xlane.f32.xlu1 %v1427_v19  ;;  %v1577_v20 = vpop.f32.mrf.mxu1 }
 0x461   : > { %v1578_v26 = vadd.f32 %v1577_v20, %v3587_v34  ;;  %v1598_v27 = vsel %vm1261_vm2, %v1586_v16, -inf }
 0x462   : > { %1434 = vmax.xlane.f32.xlu0 %v1433_v21  ;;  %v2925_v24 = vpop.f32.mrf.mxu1 }
 0x463   : > { %v1589_v18 = vadd.f32 %v2925_v24, %v3587_v34  ;;  %v1592_v36 = vsel %vm1261_vm2, %v1578_v26, -inf }
 0x464   : > { %1599 = vmax.xlane.f32.xlu1 %v1598_v27  ;;  %v1580_v28 = vpop.f32.mrf.mxu1 }
 0x465   : > { %v3697_v29 = vadd.f32 %v1580_v28, %v3587_v34  ;;  %v1601_v38 = vsel %vm1261_vm2, %v1589_v18, -inf }
 0x466   : > { %v2938_v31 = vpop.f32.mrf.mxu1 }
 0x467   : > { %v1752_v33 = vadd.f32 %v2938_v31, %v3587_v34  ;;  %v1595_v35 = vsel %vm1261_vm2, %v3697_v29, -inf }
 0x468   : > { %1596 = vmax.xlane.f32.xlu0 %v1595_v35  ;;  %1593 = vmax.xlane.f32.xlu1 %v1592_v36  ;;  %v1743_v37 = vpop.f32.mrf.mxu1 }
 0x469   : > { %v1744_v7 = vadd.f32 %v1743_v37, %v3587_v34  ;;  %v1764_v39 = vsel %vm1261_vm2, %v1752_v33, -inf }
 0x46a   : > { %v2939_v22 = vpop.f32.mrf.mxu1 }
 0x46b   : > { %v3711_v9 = vadd.f32 %v2939_v22, %v3587_v34  ;;  %v1758_v43 = vsel %vm1261_vm2, %v1744_v7, -inf }
 0x46c   : > { %1602 = vmax.xlane.f32.xlu0 %v1601_v38  ;;  %1765 = vmax.xlane.f32.xlu1 %v1764_v39  ;;  %v1746_v40 = vpop.f32.mrf.mxu1 }
 0x46d   : > { %v3708_v41 = vadd.f32 %v1746_v40, %v3587_v34  ;;  %v1767_v44 = vsel %vm1261_vm2, %v3711_v9, -inf }
 0x46f   : > { %v1761_v42 = vsel %vm1261_vm2, %v3708_v41, -inf }
 0x470   : > { %1762 = vmax.xlane.f32.xlu0 %v1761_v42  ;;  %1759 = vmax.xlane.f32.xlu1 %v1758_v43 }
 0x474   : > { %1768 = vmax.xlane.f32.xlu0 %v1767_v44 }
 0x481   : > { %1474 = vrot.lane.b32.xlu1 %v3625_v17, %s3287_s26 }
 0x485   : > { %1640 = vrot.lane.b32.xlu1 %v3625_v17, %s3288_s0 }
 0x489   : > { %1638 = vrot.lane.b32.xlu1 %v3632_v23, %s3288_s0  ;;  %s4157_s0 = sld [smem:[#allocation22_spill]] }
 0x48a   : > { %1472 = vrot.lane.b32.xlu0 %v3632_v23, %s3287_s26  ;;  %s4127_s26 = sshll.u32 %s3432_s4, 8 }
 0x4e3   : > { %v1432_v34 = vpop.xlane.xlu0 %1431 }
 0x4e4   : > { %v1438_v45 = vsub.f32 %v1418_v2, %v1432_v34 }
 0x4e6   : > { %v1444_v46 = vmul.f32 1.442695, %v1438_v45 }
 0x4e7   : > { %v1426_v47 = vpop.xlane.xlu0 %1425 }
 0x4e8   : > { %3125 = vpow2.f32 %v1444_v46  ;;  %v1436_v48 = vsub.f32 %v1410_v4, %v1426_v47 }
 0x4e9   : > { %v1429_v11 = vpop.xlane.xlu1 %1428 }
 0x4ea   : > { %v1440_v49 = vmul.f32 1.442695, %v1436_v48  ;;  %v1437_v14 = vsub.f32 %v1413_v12, %v1429_v11 }
 0x4eb   : > { %v1435_v50 = vpop.xlane.xlu0 %1434 }
 0x4ec   : > { %3127 = vpow2.f32 %v1440_v49  ;;  %v1439_v51 = vsub.f32 %v1421_v10, %v1435_v50  ;;  %v1442_v52 = vmul.f32 1.442695, %v1437_v14 }
 0x4ed   : > { %v1600_v53 = vpop.xlane.xlu1 %1599 }
 0x4ee   : > { %v1446_v54 = vmul.f32 1.442695, %v1439_v51  ;;  %v1606_v55 = vsub.f32 %v1586_v16, %v1600_v53 }
 0x4f0   : > { %3129 = vpow2.f32 %v1446_v54  ;;  %v1612_v56 = vmul.f32 1.442695, %v1606_v55 }
 0x4f1   : > { %3131 = vpow2.f32 %v1442_v52  ;;  %v1594_v57 = vpop.xlane.xlu1 %1593  ;;  %v1597_v59 = vpop.xlane.xlu0 %1596 }
 0x4f2   : > { %3133 = vpow2.f32 %v1612_v56  ;;  %v1604_v60 = vsub.f32 %v1578_v26, %v1594_v57  ;;  %v1605_v2 = vsub.f32 %v3697_v29, %v1597_v59 }
 0x4f4   : > { %v1608_v61 = vmul.f32 1.442695, %v1604_v60  ;;  %v1610_v15 = vmul.f32 1.442695, %v1605_v2 }
 0x4f5   : > { %v3726_v1 = vpop.eup %3125  ;;  %v1766_v3 = vpop.xlane.xlu1 %1765 }
 0x4f6   : > { %v1603_v4 = vpop.xlane.xlu0 %1602  ;;  %3135 = vpow2.f32 %v1608_v61  ;;  %v1772_v5 = vsub.f32 %v1752_v33, %v1766_v3  ;;  %v1454_v8 = vsel %vm1261_vm2, %v3726_v1, 0.0 }
 0x4f7   : > { %v1607_v6 = vsub.f32 %v1589_v18, %v1603_v4  ;;  %1455 = vadd.xlane.f32.xlu1 %v1454_v8 }
 0x4f8   : > { %v1778_v10 = vmul.f32 1.442695, %v1772_v5 }
 0x4f9   : > { %v1614_v12 = vmul.f32 1.442695, %v1607_v6  ;;  %v3731_v13 = vpop.eup %3127  ;;  %v1760_v16 = vpop.xlane.xlu1 %1759 }
 0x4fa   : > { %v1763_v19 = vpop.xlane.xlu0 %1762  ;;  %3137 = vpow2.f32 %v1778_v10  ;;  %v1770_v20 = vsub.f32 %v1744_v7, %v1760_v16  ;;  %v1448_v21 = vsel %vm1261_vm2, %v3731_v13, 0.0 }
 0x4fb   : > { %3139 = vpow2.f32 %v1614_v12  ;;  %1449 = vadd.xlane.f32.xlu1 %v1448_v21  ;;  %v1771_v27 = vsub.f32 %v3708_v41, %v1763_v19 }
 0x4fc   : > { %v1774_v24 = vmul.f32 1.442695, %v1770_v20  ;;  %3141 = vpow2.f32 %v1610_v15 }
 0x4fd   : > { %v3735_v26 = vpop.eup %3129  ;;  %v1475_v28 = vpop.permute.xlu1 %1474  ;;  %v1776_v22 = vmul.f32 1.442695, %v1771_v27 }
 0x4fe   : > { %v1769_v29 = vpop.xlane.xlu0 %1768  ;;  %v3738_v31 = vpop.eup %3131  ;;  %3143 = vpow2.f32 %v1774_v24  ;;  %2912 = vmatprep.subr.bf16.mxu0 %v1475_v28  ;;  %v1457_v33 = vsel %vm1261_vm2, %v3735_v26, 0.0 }
 0x4ff   : > { %v1773_v18 = vsub.f32 %v3711_v9, %v1769_v29  ;;  %v3743_v35 = vpop.eup %3133  ;;  %2913 = vmatpush3.bf16.msra.mxu0 %v1475_v28  ;;  %1458 = vadd.xlane.f32.xlu0 %v1457_v33  ;;  %v1451_v38 = vsel %vm1261_vm2, %v3738_v31, 0.0 }
 0x500   : > { %v1622_v37 = vsel %vm1261_vm2, %v3743_v35, 0.0 }
 0x501   : > { %v1780_v36 = vmul.f32 1.442695, %v1773_v18  ;;  %1623 = vadd.xlane.f32.xlu1 %v1622_v37  ;;  %v3751_v40 = vpop.permute.xlu1 %1640 }
 0x502   : > { %v1473_v7 = vpop.permute.xlu0 %1472 }
 0x503   : > { %3145 = vpow2.f32 %v1780_v36  ;;  %2914 = vmatprep.subr.bf16.mxu0 %v1473_v7  ;;  %v3749_v39 = vpop.eup %3135  ;;  %1452 = vadd.xlane.f32.xlu0 %v1451_v38 }
 0x504   : > { %2915 = vmatpush3.bf16.msra.mxu0 %v1473_v7  ;;  %v1616_v41 = vsel %vm1261_vm2, %v3749_v39, 0.0  ;;  %3147 = vpow2.f32 %v1776_v22 }
 0x505   : > { %2926 = vmatprep.subr.bf16.mxu0 %v3751_v40  ;;  %1617 = vadd.xlane.f32.xlu1 %v1616_v41  ;;  %v1639_v50 = vpop.permute.xlu1 %1638 }
 0x507   : > { %v3756_v9 = vpop.eup %3137 }
 0x508   : > { %v3758_v42 = vpop.eup %3139  ;;  %v1788_v43 = vsel %vm1261_vm2, %v3756_v9, 0.0 }
 0x509   : > { %1789 = vadd.xlane.f32.xlu1 %v1788_v43  ;;  %v1625_v44 = vsel %vm1261_vm2, %v3758_v42, 0.0  ;;  %v3764_v34 = vpop.eup %3141 }
 0x50a   : > { %1626 = vadd.xlane.f32.xlu0 %v1625_v44  ;;  %v1619_v47 = vsel %vm1261_vm2, %v3764_v34, 0.0 }
 0x50b   : > { %v3766_v45 = vpop.eup %3143 }
 0x50c   : > { %v1782_v46 = vsel %vm1261_vm2, %v3766_v45, 0.0 }
 0x50d   : > { %1783 = vadd.xlane.f32.xlu1 %v1782_v46 }
 0x50e   : > { %1620 = vadd.xlane.f32.xlu0 %v1619_v47  ;;  %v3078_v47 = vld [vmem:[%s4102_s8 + $0x10] sm:$0xff]  }
 0x510   : > { %v3772_v48 = vpop.eup %3145 }
 0x511   : > { %v1791_v11 = vsel %vm1261_vm2, %v3772_v48, 0.0  ;;  %v3776_v49 = vpop.eup %3147 }
 0x512   : > { %1792 = vadd.xlane.f32.xlu0 %v1791_v11  ;;  %v1785_v14 = vsel %vm1261_vm2, %v3776_v49, 0.0  ;;  %v3079_v11 = vld [vmem:[%s4102_s8 + $0x8] sm:$0xff]  }
 0x516   : > { %1786 = vadd.xlane.f32.xlu0 %v1785_v14 }
 0x51e   : > { %1804 = vrot.lane.b32.xlu1 %v3632_v23, %s3289_s24 }
 0x52c   : > { %1806 = vrot.lane.b32.xlu0 %v3625_v17, %s3289_s24  ;;  %s3290_s24 = smov 32  }
 0x580   : > { %v1456_v51 = vpop.xlane.xlu1 %1455 }
 0x584   : > { %v1450_v52 = vpop.xlane.xlu1 %1449 }
 0x588   : > { %v1459_v53 = vpop.xlane.xlu0 %1458 }
 0x589   : > { %3149 = vrcp.f32 %v1459_v53 }
 0x58a   : > { %v1624_v54 = vpop.xlane.xlu1 %1623  ;;  %3151 = vrcp.f32 %v1450_v52 }
 0x58b   : > { %3153 = vrcp.f32 %v1456_v51  ;;  %v3080_v51 = vld [vmem:[%s4102_s8] sm:$0xff]  }
 0x58c   : > { %v1453_v55 = vpop.xlane.xlu0 %1452 }
 0x58d   : > { %3155 = vrcp.f32 %v1453_v55 }
 0x58e   : > { %v1618_v56 = vpop.xlane.xlu1 %1617 }
 0x592   : > { %v1790_v59 = vpop.xlane.xlu1 %1789 }
 0x593   : > { %v1627_v57 = vpop.xlane.xlu0 %1626 }
 0x594   : > { %3157 = vrcp.f32 %v1627_v57 }
 0x595   : > { %3159 = vrcp.f32 %v1618_v56 }
 0x596   : > { %v3150_v60 = vpop.eup %3149  ;;  %3161 = vrcp.f32 %v1624_v54  ;;  %v1784_v4 = vpop.xlane.xlu1 %1783 }
 0x597   : > { %v1621_v23 = vpop.xlane.xlu0 %1620  ;;  %v3152_v61 = vpop.eup %3151  ;;  %v1467_v3 = vmul.f32 %v3150_v60, %v3735_v26 }
 0x598   : > { %3163 = vrcp.f32 %v1621_v23  ;;  %v3154_v17 = vpop.eup %3153  ;;  %v1464_v6 = vmul.f32 %v3152_v61, %v3731_v13 }
 0x599   : > { %v1466_v10 = vmul.f32 %v3154_v17, %v3726_v1 }
 0x59a   : > { %v3156_v2 = vpop.eup %3155  ;;  %v1805_v37 = vpop.permute.xlu1 %1804 }
 0x59b   : > { %v1793_v5 = vpop.xlane.xlu0 %1792  ;;  %v1465_v8 = vmul.f32 %v3156_v2, %v3738_v31  ;;  %v1469_v15 = vpack.c.bf16 %v1467_v3, %v1466_v10 }
 0x59c   : > { %3165 = vrcp.f32 %v1793_v5 }
 0x59d   : > { %v1468_v12 = vpack.c.bf16 %v1465_v8, %v1464_v6  ;;  %3167 = vrcp.f32 %v1784_v4 }
 0x59e   : > { %3169 = vrcp.f32 %v1790_v59 }
 0x59f   : > { %v1787_v16 = vpop.xlane.xlu0 %1786  ;;  %2916 = vmatprep.mubr.msk.bf16.mxu0 %vm1261_vm2, %v1468_v12 }
 0x5a0   : > { %3171 = vrcp.f32 %v1787_v16  ;;  %2917 = vmatmul.mubr.msk.bf16.vlgmr.msra.gmra.mxu0 %vm1261_vm2, %v1469_v15 }
 0x5a1   : > { %2927 = vmatpush3.bf16.msra.mxu0 %v3751_v40  ;;  %v3158_v19 = vpop.eup %3157 }
 0x5a2   : > { %2928 = vmatprep.subr.bf16.mxu0 %v1639_v50  ;;  %v3160_v13 = vpop.eup %3159  ;;  %v1635_v1 = vmul.f32 %v3158_v19, %v3758_v42 }
 0x5a3   : > { %v3162_v20 = vpop.eup %3161  ;;  %v1807_v24 = vpop.permute.xlu0 %1806  ;;  %v1632_v26 = vmul.f32 %v3160_v13, %v3749_v39 }
 0x5a4   : > { %v1634_v28 = vmul.f32 %v3162_v20, %v3743_v35 }
 0x5a5   : > { %v3164_v21 = vpop.eup %3163  ;;  %2929 = vmatpush3.bf16.msra.mxu0 %v1639_v50 }
 0x5a6   : > { %2940 = vmatprep.subr.bf16.mxu0 %v1807_v24  ;;  %v1633_v27 = vmul.f32 %v3164_v21, %v3764_v34  ;;  %v1637_v31 = vpack.c.bf16 %v1635_v1, %v1634_v28  ;;  %v3077_v34 = vld [vmem:[%s4102_s8 + $0x18] sm:$0xff]  }
 0x5a7   : > { %2948 = vmatprep.subr.bf16.mxu1 %v3077_v34 }
 0x5a8   : > { %v1636_v29 = vpack.c.bf16 %v1633_v27, %v1632_v26  ;;  %2949 = vmatpush3.bf16.msra.mxu1 %v3077_v34 }
 0x5a9   : > { %v3166_v18 = vpop.eup %3165  ;;  %2950 = vmatprep.subr.bf16.mxu1 %v3078_v47 }
 0x5aa   : > { %2930 = vmatprep.mubr.msk.bf16.mxu0 %vm1261_vm2, %v1636_v29  ;;  %v3168_v33 = vpop.eup %3167  ;;  %v1801_v7 = vmul.f32 %v3166_v18, %v3772_v48 }
 0x5ab   : > { %2931 = vmatmul.mubr.msk.bf16.vlgmr.msra.gmra.mxu0 %vm1261_vm2, %v1637_v31  ;;  %v3170_v36 = vpop.eup %3169  ;;  %v1798_v38 = vmul.f32 %v3168_v33, %v3766_v45 }
 0x5ac   : > { %2941 = vmatpush3.bf16.msra.mxu0 %v1807_v24  ;;  %v1800_v35 = vmul.f32 %v3170_v36, %v3756_v9  ;;  %2951 = vmatpush3.bf16.msra.mxu1 %v3078_v47  ;;  %v3191_v47 = vld [vmem:[%s3482_s21 + $0x8] sm:$0xff] }
 0x5ad   : > { %v3172_v22 = vpop.eup %3171  ;;  %2942 = vmatprep.subr.bf16.mxu0 %v1805_v37  ;;  %2952 = vmatprep.subr.bf16.mxu1 %v3079_v11 }
 0x5ae   : > { %v1799_v39 = vmul.f32 %v3172_v22, %v3776_v49  ;;  %v1803_v41 = vpack.c.bf16 %v1801_v7, %v1800_v35  ;;  %v2718_v7 = vld [vmem:[%s4106_s12] ss:$0 sm:$0xff] }
 0x5b0   : > { %2943 = vmatpush3.bf16.msra.mxu0 %v1805_v37  ;;  %v1802_v40 = vpack.c.bf16 %v1799_v39, %v1798_v38  ;;  %2953 = vmatpush3.bf16.msra.mxu1 %v3079_v11 }
 0x5b1   : > { %2954 = vmatprep.subr.bf16.mxu1 %v3080_v51 }
 0x5b2   : > { %2944 = vmatprep.mubr.msk.bf16.mxu0 %vm1261_vm2, %v1802_v40 }
 0x5b3   : > { %2945 = vmatmul.mubr.msk.bf16.vlgmr.msra.gmra.mxu0 %vm1261_vm2, %v1803_v41  ;;  %v3189_v41 = vld [vmem:[%s3482_s21] sm:$0xff] }
 0x5b4   : > { %2192 = vmatprep.mubr.bf16.mxu0 %v3286_v25  ;;  %2955 = vmatpush3.bf16.msra.mxu1 %v3080_v51 }
 0x660   : > { %v2918_v42 = vpop.f32.mrf.mxu0 }
 0x662   : > { %v1518_v43 = vpop.f32.mrf.mxu0 }
 0x664   : > { %v2919_v44 = vpop.f32.mrf.mxu0 }
 0x665   : > { %v3035_v45 = vpack.i.bf16 %v2919_v44, %v2918_v42 }
 0x666   : > { %v1521_v46 = vpop.f32.mrf.mxu0 }
 0x667   : > { %v3040_v9 = vpack.i.bf16 %v1521_v46, %v1518_v43  ;;  %3036 = vrot.lane.b32.xlu1 %v3035_v45, %s3285_s3  ;;  %v3190_v46 = vld [vmem:[%s3492_s1] sm:$0xff] }
 0x669   : > { %3041 = vrot.lane.b32.xlu0 %v3040_v9, %s3285_s3  ;;  %s3291_s3 = smov 48  }
 0x66b   : > { %v2932_v48 = vpop.f32.mrf.mxu0 }
 0x66d   : > { %v1684_v49 = vpop.f32.mrf.mxu0 }
 0x66f   : > { %v2933_v14 = vpop.f32.mrf.mxu0 }
 0x670   : > { %v3045_v50 = vpack.i.bf16 %v2933_v14, %v2932_v48  ;;  %v3192_v14 = vld [vmem:[%s3492_s1 + $0x8] sm:$0xff]  ;;  %s3292_s1 = smov [#allocation2]  }
 0x671   : > { %v1687_v52 = vpop.f32.mrf.mxu0  ;;  %s3197_s25 = sshll.u32 %s3292_s1, 4  ;;  %s3198_s25 = int_to_ptr.vmem [resolvable:$false] %s3197_s25 }
 0x672   : > { %v3050_v53 = vpack.i.bf16 %v1687_v52, %v1684_v49  ;;  %3046 = vrot.lane.b32.xlu1 %v3045_v50, %s3290_s24  ;;  %s3199_s29 = scalar_lea.vmem %s3198_s25, 512 }
 0x673   : > { %v2946_v54 = vpop.f32.mrf.mxu0 }
 0x674   : > { %3051 = vrot.lane.b32.xlu0 %v3050_v53, %s3290_s24  ;;  %s3990_s24 = sand.u32 1, %s3275_s28  }
 0x675   : > { %v1850_v55 = vpop.f32.mrf.mxu0  ;;  %s4128_s22 = sshll.u32 %s3990_s24, 4 }
 0x676   : > { %s736_s2 = scalar_lea.vmem [#allocation2], %s4128_s22 }
 0x677   : > { %v2947_v56 = vpop.f32.mrf.mxu0  ;;  %s2510_s30 = sshll.u32 %s736_s2, 4  ;;  %s4010_s30 = int_to_ptr.vmem [resolvable:$true] %s2510_s30 }
 0x678   : > { %v3060_v57 = vpack.i.bf16 %v2947_v56, %v2946_v54  ;;  %s3193_s21 = scalar_lea.vmem %s4010_s30, 256  ;;  %p3200_p0 = scmp.lt.s32.totalorder %s4010_s30, %s3198_s25 }
 0x679   : > { %v1853_v59 = vpop.f32.mrf.mxu0  ;;  %p3194_p11 = scmp.ne.s32.totalorder %s4010_s30, %s3193_s21  ;;  %p3201_p1 = scmp.lt.s32.totalorder %s3199_s29, %s3193_s21 }
 0x67a   : > { %v3055_v60 = vpack.i.bf16 %v1853_v59, %v1850_v55  ;;  %3061 = vrot.lane.b32.xlu1 %v3060_v57, %s3291_s3 }
 0x67b   : > { %p3195_p12 = pnand %p3194_p11, %p3449_p5  ;;  %p3202_p2 = por %p3201_p1, %p3200_p0 }
 0x67c   : > { %3056 = vrot.lane.b32.xlu0 %v3055_v60, %s3291_s3  ;;  %s4008_s3 = scalar_lea.hbm %s4157_s0, %s4127_s26 }
 0x67d   : > { %p3196_p13 = pneg %p3195_p12 }
 0x67f   : > { %p3203_p3 = pnand %p3202_p2, %p3196_p13 }
 0x6d9   : > { %v3037_v23 = vpop.permute.xlu1 %3036 }
 0x6da   : > { %v3039_v3 = vunpack.i.h.bf16 %v3037_v23  ;;  %v3038_v4 = vunpack.i.l.bf16 %v3037_v23 }
 0x6db   : > { %v3042_v61 = vpop.permute.xlu0 %3041 }
 0x6dc   : > { %v3044_v5 = vunpack.i.h.bf16 %v3042_v61  ;;  %v3043_v6 = vunpack.i.l.bf16 %v3042_v61  ;;  %v1916_v20 = vsel %vm820_vm1, %v3681_v63, %v3039_v3  ;;  %v1915_v21 = vsel %vm820_vm1, %v3677_v58, %v3038_v4 }
 0x6de   : > { %v1914_v24 = vsel %vm820_vm1, %v3683_v0, %v3044_v5  ;;  %v1913_v1 = vsel %vm820_vm1, %v3679_v62, %v3043_v6 }
 0x6e4   : > { %v3047_v17 = vpop.permute.xlu1 %3046 }
 0x6e5   : > { %v3049_v8 = vunpack.i.h.bf16 %v3047_v17  ;;  %v3048_v10 = vunpack.i.l.bf16 %v3047_v17 }
 0x6e6   : > { %v3052_v2 = vpop.permute.xlu0 %3051 }
 0x6e7   : > { %v3054_v12 = vunpack.i.h.bf16 %v3052_v2  ;;  %v3053_v15 = vunpack.i.l.bf16 %v3052_v2  ;;  %v1920_v27 = vsel %vm1261_vm2, %v1916_v20, %v3049_v8  ;;  %v1919_v28 = vsel %vm1261_vm2, %v1915_v21, %v3048_v10  ;;  %v3084_v20 = vld [vmem:[%s4109_s15 + $0x20] ss:$8 sps:$4 sm:$0xff]   ;;  %v3089_v21 = vld [vmem:[%s4109_s15 + $0x14] ss:$8 sps:$4 sm:$0xff]  }
 0x6e9   : > { %v1917_v18 = vsel %vm1261_vm2, %v1913_v1, %v3053_v15  ;;  %v1918_v63 = vsel %vm1261_vm2, %v1914_v24, %v3054_v12  ;;  %v3087_v24 = vld [vmem:[%s4109_s15 + $0x10] ss:$8 sps:$4 sm:$0xff]   ;;  %v3092_v1 = vld [vmem:[%s4109_s15 + $0x4] ss:$8 sps:$4 sm:$0xff]  }
 0x6ec   : > { %v3062_v16 = vpop.permute.xlu1 %3061 }
 0x6ed   : > { %v3064_v19 = vunpack.i.h.bf16 %v3062_v16  ;;  %v3063_v13 = vunpack.i.l.bf16 %v3062_v16  ;;  %v3083_v16 = vld [vmem:[%s4109_s15 + $0x34] ss:$8 sps:$4 sm:$0xff]  }
 0x6ee   : > { %v3057_v26 = vpop.permute.xlu0 %3056  ;;  %2168 = vmatprep.subr.bf16.mxu0 %v3083_v16 }
 0x6ef   : > { %v3059_v29 = vunpack.i.h.bf16 %v3057_v26  ;;  %v3058_v31 = vunpack.i.l.bf16 %v3057_v26  ;;  %v1925_v58 = vsel %vm1921_vm3, %v1920_v27, %v3064_v19  ;;  %v1924_v33 = vsel %vm1921_vm3, %v1919_v28, %v3063_v13  ;;  %v3081_v19 = vld [vmem:[%s4109_s15 + $0x30] ss:$8 sps:$4 sm:$0xff]   ;;  %v3086_v13 = vld [vmem:[%s4109_s15 + $0x24] ss:$8 sps:$4 sm:$0xff]   ;;  %v3090_v26 = vld [vmem:[%s4109_s15] ss:$8 sps:$4 sm:$0xff]  }
 0x6f0   : > { %v1927_v37 = vpack.c.bf16 %v1925_v58, %v1924_v33  ;;  %2169 = vmatpush1.bf16.msra.mxu0 %v3081_v19  ;;  %v3093_v27 = vld [vmem:[%s4111_s17 + $0x78] sm:$0xff]   ;;  %v3099_v58 = vld [vmem:[%s4111_s17 + $0x60] sm:$0xff]  }
 0x6f1   : > { %v1922_v0 = vsel %vm1921_vm3, %v1917_v18, %v3058_v31  ;;  %v1923_v62 = vsel %vm1921_vm3, %v1918_v63, %v3059_v29  ;;  %2170 = vmatprep.subr.bf16.mxu0 %v3086_v13  ;;  %v3094_v28 = vld [vmem:[%s4111_s17 + $0x38] sm:$0xff]   ;;  %v3095_v29 = vld [vmem:[%s4111_s17 + $0x70] sm:$0xff]   ;;  %2824 = vmatprep.subr.bf16.mxu1 %v3093_v27  ;;  %v3097_v18 = vld [vmem:[%s4111_s17 + $0x68] sm:$0xff]  }
 0x6f2   : > { %v1926_v36 = vpack.c.bf16 %v1923_v62, %v1922_v0  ;;  %v3096_v31 = vld [vmem:[%s4111_s17 + $0x30] sm:$0xff]   ;;  %v3098_v63 = vld [vmem:[%s4111_s17 + $0x28] sm:$0xff]   ;;  %v3100_v33 = vld [vmem:[%s4111_s17 + $0x20] sm:$0xff]  }
 0x6f3   : > { %v3101_v0 = vld [vmem:[%s4111_s17 + $0x58] sm:$0xff]  }
 0x6f4   : > { %2956 = vmatprep.mubr.msk.bf16.mxu1 %vm880_vm0, %v1926_v36  ;;  %2171 = vmatpush1.bf16.msra.mxu0 %v3084_v20  ;;  %v3102_v62 = vld [vmem:[%s4111_s17 + $0x18] sm:$0xff]  }
 0x6f5   : > { %2957 = vmatmul.mubr.msk.bf16.vlgmr.msra.gmra.mxu1 %vm880_vm0, %v1927_v37  ;;  %2172 = vmatprep.subr.bf16.mxu0 %v3089_v21 }
 0x6f6   : > { %2825 = vmatpush3.bf16.msra.mxu1 %v3094_v28 }
 0x6f7   : > { %2826 = vmatprep.subr.bf16.mxu1 %v3095_v29 }
 0x6f8   : > { %2173 = vmatpush1.bf16.msra.mxu0 %v3087_v24 }
 0x6f9   : > { %2174 = vmatprep.subr.bf16.mxu0 %v3092_v1 }
 0x6fa   : > { %2827 = vmatpush3.bf16.msra.mxu1 %v3096_v31 }
 0x6fb   : > { %2828 = vmatprep.subr.bf16.mxu1 %v3097_v18 }
 0x6fc   : > { %2175 = vmatpush1.bf16.msra.mxu0 %v3090_v26 }
 0x6fe   : > { %2829 = vmatpush3.bf16.msra.mxu1 %v3098_v63 }
 0x6ff   : > { %2830 = vmatprep.subr.bf16.mxu1 %v3099_v58 }
 0x702   : > { %2831 = vmatpush3.bf16.msra.mxu1 %v3100_v33 }
 0x703   : > { %2832 = vmatprep.subr.bf16.mxu1 %v3101_v0 }
 0x706   : > { %2833 = vmatpush3.bf16.msra.mxu1 %v3102_v62 }
 0x7b5   : > { %v2958_v22 = vpop.f32.mrf.mxu1 }
 0x7b6   : > { %v2007_v39 = vadd.f32 %v2958_v22, %v2718_v7 }
 0x7b7   : > { %v1998_v38 = vpop.f32.mrf.mxu1 }
 0x7b8   : > { %v1999_v35 = vadd.f32 %v2718_v7, %v1998_v38  ;;  %v2015_v9 = vadd.f32 %v3190_v46, %v2007_v39  ;;  %v2725_v46 = vld [vmem:[%s4107_s13] ss:$0 sm:$0xff] }
 0x7b9   : > { %v2959_v40 = vpop.f32.mrf.mxu1 }
 0x7ba   : > { %v2013_v42 = vadd.f32 %v3189_v41, %v1999_v35  ;;  %v2010_v44 = vadd.f32 %v2959_v40, %v2718_v7  ;;  %v2025_v49 = vsel %vm880_vm0, %v2015_v9, 0.0 }
 0x7bb   : > { %v2001_v43 = vpop.f32.mrf.mxu1 }
 0x7bc   : > { %v2002_v34 = vadd.f32 %v2718_v7, %v2001_v43  ;;  %v2019_v45 = vsel %vm880_vm0, %v2013_v42, 0.0  ;;  %v2016_v50 = vadd.f32 %v3192_v14, %v2010_v44 }
 0x7bd   : > { %2020 = vadd.xlane.f32.xlu0 %v2019_v45 }
 0x7be   : > { %v2014_v48 = vadd.f32 %v3191_v47, %v2002_v34  ;;  %v2028_v51 = vsel %vm880_vm0, %v2016_v50, 0.0 }
 0x7c0   : > { %v2022_v11 = vsel %vm880_vm0, %v2014_v48, 0.0 }
 0x7c1   : > { %2023 = vadd.xlane.f32.xlu1 %v2022_v11  ;;  %2026 = vadd.xlane.f32.xlu0 %v2025_v49  ;;  %v2726_v49 = vld [vmem:[%s4108_s14] ss:$0 sm:$0xff] }
 0x7c5   : > { %2029 = vadd.xlane.f32.xlu0 %v2028_v51 }
 0x846   : > { %v2021_v52 = vpop.xlane.xlu0 %2020 }
 0x847   : > { %v2032_v53 = vmul.f32 0.015625, %v2021_v52 }
 0x849   : > { %v3847_v54 = vsub.f32 %v2013_v42, %v2032_v53 }
 0x84a   : > { %v2024_v55 = vpop.xlane.xlu1 %2023  ;;  %v2027_v56 = vpop.xlane.xlu0 %2026 }
 0x84b   : > { %v2033_v57 = vmul.f32 0.015625, %v2024_v55  ;;  %v2034_v59 = vmul.f32 0.015625, %v2027_v56  ;;  %v2040_v60 = vmul.f32 %v3847_v54, %v3847_v54 }
 0x84d   : > { %v3851_v23 = vsub.f32 %v2014_v48, %v2033_v57  ;;  %v3853_v61 = vsub.f32 %v2015_v9, %v2034_v59  ;;  %v2044_v17 = vsel %vm880_vm0, %v2040_v60, 0.0 }
 0x84e   : > { %2045 = vadd.xlane.f32.xlu1 %v2044_v17  ;;  %v2030_v2 = vpop.xlane.xlu0 %2029  ;;  %v3104_v17 = vld [vmem:[%s4111_s17 + $0x10] sm:$0xff]  }
 0x84f   : > { %v2035_v3 = vmul.f32 0.015625, %v2030_v2  ;;  %v2041_v4 = vmul.f32 %v3851_v23, %v3851_v23  ;;  %v2042_v5 = vmul.f32 %v3853_v61, %v3853_v61  ;;  %v3106_v2 = vld [vmem:[%s4111_s17 + $0x8] sm:$0xff]  }
 0x851   : > { %v3860_v6 = vsub.f32 %v2016_v50, %v2035_v3  ;;  %v2047_v8 = vsel %vm880_vm0, %v2041_v4, 0.0  ;;  %v2050_v10 = vsel %vm880_vm0, %v2042_v5, 0.0  ;;  %v3107_v3 = vld [vmem:[%s4111_s17 + $0x40] sm:$0xff]   ;;  %v2110_v5 = vsub.s32 1, %v3581_v30 }
 0x852   : > { %2048 = vadd.xlane.f32.xlu0 %v2047_v8  ;;  %2051 = vadd.xlane.f32.xlu1 %v2050_v10  ;;  %v3108_v4 = vld [vmem:[%s4111_s17] sm:$0xff]  }
 0x853   : > { %v2043_v12 = vmul.f32 %v3860_v6, %v3860_v6 }
 0x855   : > { %v2053_v15 = vsel %vm880_vm0, %v2043_v12, 0.0 }
 0x856   : > { %2054 = vadd.xlane.f32.xlu0 %v2053_v15 }
 0x8d7   : > { %v2046_v36 = vpop.xlane.xlu1 %2045 }
 0x8d8   : > { %v2056_v37 = vmul.f32 0.015625, %v2046_v36 }
 0x8da   : > { %v2060_v22 = vadd.f32 1e-05, %v2056_v37 }
 0x8db   : > { %v2052_v7 = vpop.xlane.xlu1 %2051  ;;  %v2049_v38 = vpop.xlane.xlu0 %2048 }
 0x8dc   : > { %3173 = vrsqrt.f32 %v2060_v22  ;;  %v2058_v39 = vmul.f32 0.015625, %v2052_v7  ;;  %v2057_v35 = vmul.f32 0.015625, %v2049_v38 }
 0x8de   : > { %v2061_v40 = vadd.f32 1e-05, %v2057_v35  ;;  %v2062_v41 = vadd.f32 1e-05, %v2058_v39 }
 0x8df   : > { %v2055_v42 = vpop.xlane.xlu0 %2054 }
 0x8e0   : > { %v2059_v43 = vmul.f32 0.015625, %v2055_v42  ;;  %3175 = vrsqrt.f32 %v2061_v40  ;;  %v2737_v40 = vld [vmem:[%s4112_s18] ss:$0 sm:$0xff] }
 0x8e1   : > { %3177 = vrsqrt.f32 %v2062_v41 }
 0x8e2   : > { %v2063_v44 = vadd.f32 1e-05, %v2059_v43 }
 0x8e4   : > { %3179 = vrsqrt.f32 %v2063_v44 }
 0x8e9   : > { %v3174_v34 = vpop.eup %3173 }
 0x8ea   : > { %v2068_v45 = vmul.f32 %v3174_v34, %v3847_v54 }
 0x8ec   : > { %v2078_v48 = vmul.f32 %v2725_v46, %v2068_v45 }
 0x8ed   : > { %v3176_v9 = vpop.eup %3175 }
 0x8ee   : > { %v2069_v47 = vmul.f32 %v3176_v9, %v3851_v23  ;;  %v3178_v11 = vpop.eup %3177  ;;  %v3930_v52 = vadd.f32 %v2726_v49, %v2078_v48 }
 0x8ef   : > { %v2070_v54 = vmul.f32 %v3178_v11, %v3853_v61  ;;  %v3103_v61 = vld [vmem:[%s4111_s17 + $0x50] sm:$0xff]  }
 0x8f0   : > { %v2079_v50 = vmul.f32 %v2725_v46, %v2069_v47  ;;  %2834 = vmatprep.subr.bf16.mxu1 %v3103_v61 }
 0x8f1   : > { %v3180_v14 = vpop.eup %3179  ;;  %v2080_v57 = vmul.f32 %v2725_v46, %v2070_v54  ;;  %2835 = vmatpush3.bf16.msra.mxu1 %v3104_v17 }
 0x8f2   : > { %v2071_v51 = vmul.f32 %v3180_v14, %v3860_v6  ;;  %v3932_v53 = vadd.f32 %v2726_v49, %v2079_v50  ;;  %v2102_v6 = vld [vmem:[%s4110_s16] sm:$0x3] }
 0x8f3   : > { %v3941_v60 = vadd.f32 %v2726_v49, %v2080_v57  ;;  %v2111_v10 = vrot.slane %v2102_v6, %v2110_v5  ;;  %v2107_v12 = vrot.slane %v2102_v6, %v1204_v32 }
 0x8f4   : > { %v2092_v55 = vpack.c.bf16 %v3932_v53, %v3930_v52  ;;  %v2081_v56 = vmul.f32 %v2725_v46, %v2071_v51 }
 0x8f6   : > { %2735 = vmatmul.mubr.msk.bf16.vlgmr.msra.gmra.mxu0 %vm880_vm0, %v2092_v55  ;;  %v3939_v59 = vadd.f32 %v2726_v49, %v2081_v56 }
 0x8f7   : > { %2202 = vmatprep.mubr.bf16.mxu0 %v3286_v25  ;;  %v3105_v25 = vld [vmem:[%s4111_s17 + $0x48] sm:$0xff]  }
 0x8f8   : > { %v2093_v23 = vpack.c.bf16 %v3939_v59, %v3941_v60  ;;  %2836 = vmatprep.subr.bf16.mxu1 %v3105_v25 }
 0x8f9   : > { %2837 = vmatpush3.bf16.msra.mxu1 %v3106_v2 }
 0x8fa   : > { %2838 = vmatprep.subr.bf16.mxu1 %v3107_v3 }
 0x8fd   : > { %2839 = vmatpush3.bf16.msra.mxu1 %v3108_v4 }
 0x8fe   : > { %2736 = vmatmul.mubr.msk.bf16.gmra.mxu0 %vm880_vm0, %v2093_v23 }
 0x9b6   : > { %v2194_v8 = vpop.f32.mrf.mxu0 }
 0x9b7   : > { %v2195_v20 = vadd.f32 %v2194_v8, %v2107_v12 }
 0x9b8   : > { %v2196_v15 = vpop.f32.mrf.mxu0 }
 0x9b9   : > { %v2197_v19 = vadd.f32 %v2196_v15, %v2111_v10  ;;  %v2213_v29 = vmax.f32 %v2195_v20, 0.0 }
 0x9ba   : > { %v2198_v16 = vpop.f32.mrf.mxu0 }
 0x9bb   : > { %v2199_v13 = vadd.f32 %v2198_v16, %v2107_v12  ;;  %v2214_v27 = vmax.f32 %v2197_v19, 0.0 }
 0x9bc   : > { %v2200_v21 = vpop.f32.mrf.mxu0 }
 0x9bd   : > { %v2201_v24 = vadd.f32 %v2200_v21, %v2111_v10  ;;  %v2215_v1 = vmax.f32 %v2199_v13, 0.0 }
 0x9be   : > { %v2204_v26 = vpop.f32.mrf.mxu0 }
 0x9bf   : > { %v2216_v28 = vmax.f32 %v2201_v24, 0.0  ;;  %v2221_v63 = vpack.c.bf16 %v2215_v1, %v2213_v29  ;;  %v2205_v30 = vadd.f32 %v2204_v26, %v2107_v12 }
 0x9c0   : > { %v2206_v31 = vpop.f32.mrf.mxu0 }
 0x9c1   : > { %v2222_v18 = vpack.c.bf16 %v2216_v28, %v2214_v27  ;;  %v2207_v33 = vadd.f32 %v2206_v31, %v2111_v10  ;;  %v2217_v7 = vmax.f32 %v2205_v30, 0.0 }
 0x9c2   : > { %v2208_v58 = vpop.f32.mrf.mxu0 }
 0x9c3   : > { %v2209_v0 = vadd.f32 %v2208_v58, %v2107_v12  ;;  %2392 = vmatprep.mubr.bf16.mxu1 %v2222_v18  ;;  %v2218_v37 = vmax.f32 %v2207_v33, 0.0 }
 0x9c4   : > { %v2210_v32 = vpop.f32.mrf.mxu0  ;;  %2393 = vmatmul.mubr.bf16.vlgmr.msra.gmra.mxu1 %v2221_v63 }
 0x9c5   : > { %v2211_v62 = vadd.f32 %v2210_v32, %v2111_v10  ;;  %v2219_v36 = vmax.f32 %v2209_v0, 0.0 }
 0x9c7   : > { %v2220_v22 = vmax.f32 %v2211_v62, 0.0  ;;  %v2223_v39 = vpack.c.bf16 %v2219_v36, %v2217_v7  ;;  %v2754_v36 = vld [vmem:[%s4113_s19] ss:$0 sm:$0xff] }
 0x9c9   : > { %v2224_v38 = vpack.c.bf16 %v2220_v22, %v2218_v37  ;;  %v2755_v22 = vld [vmem:[%s4114_s20] ss:$0 sm:$0xff] }
 0x9cb   : > { %2400 = vmatprep.mubr.bf16.mxu1 %v2224_v38 }
 0x9cc   : > { %2401 = vmatmul.mubr.bf16.gmra.mxu1 %v2223_v39 }
 0xa84   : > { %v2840_v35 = vpop.f32.mrf.mxu1 }
 0xa86   : > { %v2841_v41 = vpop.f32.mrf.mxu1 }
 0xa87   : > { %v2842_v42 = vadd.f32 %v2841_v41, %v2840_v35 }
 0xa88   : > { %v2843_v43 = vpop.f32.mrf.mxu1 }
 0xa89   : > { %v2395_v44 = vadd.f32 %v2842_v42, %v2737_v40 }
 0xa8a   : > { %v2844_v34 = vpop.f32.mrf.mxu1 }
 0xa8b   : > { %v2845_v45 = vadd.f32 %v2844_v34, %v2843_v43  ;;  %v2409_v46 = vadd.f32 %v2395_v44, %v3930_v52 }
 0xa8c   : > { %v2846_v9 = vpop.f32.mrf.mxu1 }
 0xa8d   : > { %v2398_v47 = vadd.f32 %v2845_v45, %v2737_v40  ;;  %v2415_v48 = vsel %vm880_vm0, %v2409_v46, 0.0 }
 0xa8e   : > { %2416 = vadd.xlane.f32.xlu1 %v2415_v48  ;;  %v2847_v11 = vpop.f32.mrf.mxu1 }
 0xa8f   : > { %v2848_v49 = vadd.f32 %v2847_v11, %v2846_v9  ;;  %v2410_v14 = vadd.f32 %v2398_v47, %v3932_v53 }
 0xa90   : > { %v2849_v50 = vpop.f32.mrf.mxu1 }
 0xa91   : > { %v2403_v51 = vadd.f32 %v2848_v49, %v2737_v40  ;;  %v2418_v54 = vsel %vm880_vm0, %v2410_v14, 0.0 }
 0xa92   : > { %2419 = vadd.xlane.f32.xlu0 %v2418_v54  ;;  %v2850_v55 = vpop.f32.mrf.mxu1 }
 0xa93   : > { %v2851_v56 = vadd.f32 %v2850_v55, %v2849_v50  ;;  %v2411_v57 = vadd.f32 %v2403_v51, %v3941_v60 }
 0xa95   : > { %v2406_v23 = vadd.f32 %v2851_v56, %v2737_v40  ;;  %v2421_v52 = vsel %vm880_vm0, %v2411_v57, 0.0 }
 0xa96   : > { %2422 = vadd.xlane.f32.xlu1 %v2421_v52 }
 0xa97   : > { %v2412_v61 = vadd.f32 %v2406_v23, %v3939_v59 }
 0xa99   : > { %v2424_v17 = vsel %vm880_vm0, %v2412_v61, 0.0 }
 0xa9a   : > { %2425 = vadd.xlane.f32.xlu0 %v2424_v17 }
 0xb17   : > { %v2417_v25 = vpop.xlane.xlu1 %2416 }
 0xb18   : > { %v2427_v53 = vmul.f32 0.015625, %v2417_v25 }
 0xb1a   : > { %v2431_v2 = vsub.f32 %v2409_v46, %v2427_v53 }
 0xb1b   : > { %v2420_v3 = vpop.xlane.xlu0 %2419 }
 0xb1c   : > { %v2428_v4 = vmul.f32 0.015625, %v2420_v3  ;;  %v2435_v5 = vmul.f32 %v2431_v2, %v2431_v2 }
 0xb1e   : > { %v2432_v6 = vsub.f32 %v2410_v14, %v2428_v4  ;;  %v2439_v8 = vsel %vm880_vm0, %v2435_v5, 0.0 }
 0xb1f   : > { %2440 = vadd.xlane.f32.xlu1 %v2439_v8  ;;  %v2423_v60 = vpop.xlane.xlu1 %2422 }
 0xb20   : > { %v2429_v10 = vmul.f32 0.015625, %v2423_v60  ;;  %v2436_v12 = vmul.f32 %v2432_v6, %v2432_v6 }
 0xb22   : > { %v2433_v15 = vsub.f32 %v2411_v57, %v2429_v10  ;;  %v2442_v16 = vsel %vm880_vm0, %v2436_v12, 0.0 }
 0xb23   : > { %2443 = vadd.xlane.f32.xlu0 %v2442_v16  ;;  %v2426_v59 = vpop.xlane.xlu0 %2425 }
 0xb24   : > { %v2430_v19 = vmul.f32 0.015625, %v2426_v59  ;;  %v2437_v13 = vmul.f32 %v2433_v15, %v2433_v15 }
 0xb26   : > { %v3983_v20 = vsub.f32 %v2412_v61, %v2430_v19  ;;  %v2445_v21 = vsel %vm880_vm0, %v2437_v13, 0.0 }
 0xb27   : > { %2446 = vadd.xlane.f32.xlu1 %v2445_v21 }
 0xb28   : > { %v2438_v24 = vmul.f32 %v3983_v20, %v3983_v20 }
 0xb2a   : > { %v2448_v1 = vsel %vm880_vm0, %v2438_v24, 0.0 }
 0xb2b   : > { %2449 = vadd.xlane.f32.xlu0 %v2448_v1 }
 0xba8   : > { %v2441_v26 = vpop.xlane.xlu1 %2440 }
 0xba9   : > { %v2451_v27 = vmul.f32 0.015625, %v2441_v26 }
 0xbab   : > { %v2455_v28 = vadd.f32 1e-05, %v2451_v27 }
 0xbac   : > { %v2444_v29 = vpop.xlane.xlu0 %2443 }
 0xbad   : > { %3181 = vrsqrt.f32 %v2455_v28  ;;  %v2452_v31 = vmul.f32 0.015625, %v2444_v29 }
 0xbaf   : > { %v2456_v18 = vadd.f32 1e-05, %v2452_v31 }
 0xbb0   : > { %v2447_v63 = vpop.xlane.xlu1 %2446 }
 0xbb1   : > { %3183 = vrsqrt.f32 %v2456_v18  ;;  %v2453_v58 = vmul.f32 0.015625, %v2447_v63 }
 0xbb3   : > { %v2457_v33 = vadd.f32 1e-05, %v2453_v58 }
 0xbb4   : > { %v2450_v0 = vpop.xlane.xlu0 %2449 }
 0xbb5   : > { %3185 = vrsqrt.f32 %v2457_v33  ;;  %v2454_v30 = vmul.f32 0.015625, %v2450_v0 }
 0xbb7   : > { %v2458_v32 = vadd.f32 1e-05, %v2454_v30 }
 0xbb9   : > { %3187 = vrsqrt.f32 %v2458_v32 }
 0xbba   : > { %v3182_v62 = vpop.eup %3181 }
 0xbbb   : > { %v2463_v37 = vmul.f32 %v3182_v62, %v2431_v2 }
 0xbbd   : > { %v2473_v7 = vmul.f32 %v2754_v36, %v2463_v37 }
 0xbbe   : > { %v3184_v38 = vpop.eup %3183 }
 0xbbf   : > { %v2464_v39 = vmul.f32 %v3184_v38, %v2432_v6  ;;  %v2483_v35 = vadd.f32 %v2755_v22, %v2473_v7 }
 0xbc1   : > { %v2474_v40 = vmul.f32 %v2754_v36, %v2464_v39  ;;  %2487 = vst.msk [vmem:[%s736_s2] sm:$0xff] %vm880_vm0, %v2483_v35 }
 0xbc2   : > { %v3186_v41 = vpop.eup %3185 }
 0xbc3   : > { %v2465_v42 = vmul.f32 %v3186_v41, %v2433_v15  ;;  %v2484_v43 = vadd.f32 %v2755_v22, %v2474_v40 }
 0xbc5   : > { %v2475_v44 = vmul.f32 %v2754_v36, %v2465_v42  ;;  %2488 = vst.msk [vmem:[%s736_s2 + $0x8] sm:$0xff] %vm880_vm0, %v2484_v43 }
 0xbc6   : > { %v3188_v34 = vpop.eup %3187 }
 0xbc7   : > { %3206 = shalt.err (!%p3203_p3)
}
 0xbc8   : > { %s3207_s2 = scalar_lea.hbm %s4008_s3, 256  ;;  %s3211_s1 = scalar_lea.hbm %s4157_s0, 512 }
 0xbc9   : > { %p3208_p4 = scmp.ne.s32.totalorder %s4008_s3, %s3207_s2  ;;  %p3212_p9 = scmp.lt.s32.totalorder %s4008_s3, %s4157_s0 }
 0xbca   : > { %p3213_p10 = scmp.lt.s32.totalorder %s3211_s1, %s3207_s2 }
 0xbcb   : > { %p3209_p7 = pnand %p3208_p4, %p3449_p5 }
 0xbcc   : > { %p3214_p11 = por %p3213_p10, %p3212_p9 }
 0xbcd   : > { %p3210_p8 = pneg %p3209_p7 }
 0xbcf   : > { %p3215_p12 = pnand %p3214_p11, %p3210_p8 }
 0xbd1   : > { %3218 = shalt.err (!%p3215_p12)
}
 0xbd2   : > { %s3293_s21 = smov 128   ;;  %s3294_s25 = smov 8   ;;  %v2466_v45 = vmul.f32 %v3188_v34, %v3983_v20  ;;  %v2485_v46 = vadd.f32 %v2755_v22, %v2475_v44 }
 0xbd3   : > { %s4158_s5 = scalar_lea.sflag [#allocation3], %s3990_s24  ;;  %s4159_s22 = sshll.u32 %s3990_s24, 4 }
 0xbd4   : > { %2960 = dma.vmem_to_hbm [thread:$0]  (%p3449_p5), %s4010_s30, 256, %s4008_s3, %s4158_s5, %s3293_s21, %s3293_s21, %s3294_s25   ;;  %v2476_v9 = vmul.f32 %v2754_v36, %v2466_v45 }
 0xbd5   : > { %s743_s26 = scalar_lea.vmem [#allocation4], %s4159_s22  ;;  %s4160_s29 = sshll.u32 %s3432_s4, 8 }
 0xbd6   : > { %s2526_s23 = sshll.u32 %s743_s26, 4  ;;  %2489 = vst.msk [vmem:[%s743_s26] sm:$0xff] %vm880_vm0, %v2485_v46  ;;  %v2486_v47 = vadd.f32 %v2755_v22, %v2476_v9  ;;  %s4161_s0 = sld [smem:[#allocation23_spill]]  ;;  %s4050_s23 = int_to_ptr.vmem [resolvable:$true] %s2526_s23 }
 0xbd7   : > { %s2497_s30 = scalar_lea.sflag [#allocation5], %s3990_s24  ;;  %s3219_s3 = scalar_lea.vmem %s4050_s23, 256 }
 0xbd8   : > { %2490 = vst.msk [vmem:[%s743_s26 + $0x8] sm:$0xff] %vm880_vm0, %v2486_v47  ;;  %p3220_p13 = scmp.ne.s32.totalorder %s4050_s23, %s3219_s3  ;;  %s3295_s5 = smov [#allocation4]  }
 0xbd9   : > { %s3223_s4 = sshll.u32 %s3295_s5, 4  ;;  %s3224_s4 = int_to_ptr.vmem [resolvable:$false] %s3223_s4 }
 0xbda   : > { %p3221_p0 = pnand %p3220_p13, %p3449_p5  ;;  %s3225_s22 = scalar_lea.vmem %s3224_s4, 512 }
 0xbdb   : > { %p3226_p2 = scmp.lt.s32.totalorder %s4050_s23, %s3224_s4  ;;  %p3227_p3 = scmp.lt.s32.totalorder %s3225_s22, %s3219_s3 }
 0xbdc   : > { %s4048_s7 = scalar_lea.hbm %s4161_s0, %s4160_s29  ;;  %p3222_p1 = pneg %p3221_p0 }
 0xbdd   : > { %p3228_p4 = por %p3227_p3, %p3226_p2 }
 0xbdf   : > { %p3229_p7 = pnand %p3228_p4, %p3222_p1 }
 0xbe1   : > { %3232 = shalt.err (!%p3229_p7)
}
 0xbe2   : > { %s3233_s26 = scalar_lea.hbm %s4048_s7, 256  ;;  %s3237_s2 = scalar_lea.hbm %s4161_s0, 512 }
 0xbe3   : > { %p3234_p8 = scmp.ne.s32.totalorder %s4048_s7, %s3233_s26  ;;  %p3238_p11 = scmp.lt.s32.totalorder %s4048_s7, %s4161_s0 }
 0xbe4   : > { %p3239_p12 = scmp.lt.s32.totalorder %s3237_s2, %s3233_s26 }
 0xbe5   : > { %p3235_p9 = pnand %p3234_p8, %p3449_p5 }
 0xbe6   : > { %p3240_p13 = por %p3239_p12, %p3238_p11 }
 0xbe7   : > { %p3236_p10 = pneg %p3235_p9 }
 0xbe9   : > { %p3241_p0 = pnand %p3240_p13, %p3236_p10 }
 0xbeb   : > { %3244 = shalt.err (!%p3241_p0)
}
 0xbec   : > { %2961 = dma.vmem_to_hbm [thread:$0]  (%p3449_p5), %s4050_s23, 256, %s4048_s7, %s2497_s30, %s3293_s21, %s3293_s21, %s3294_s25  }
 0xbed PF: > { %s4162_s3 = sld [smem:[#allocation10_spill]] }
 0xbee   : > { %s4163_s4 = sld [smem:[#allocation8_spill]] }
 0xbf3   : > { %p2971_p1 = scmp.ge.s32.totalorder %s4162_s3, 2 }
 0xbf4   : > { %s2541_s24 = sand.u32 1, %s4163_s4  }
 0xbf5   : > { %p2965_p2 = pnand %p2971_p1, %p3453_p6  ;;  %s2542_s26 = scalar_lea.sflag [#allocation3], %s2541_s24 }
 0xbf7   : > { %p2966_p3 = pneg %p2965_p2 }
 0xbf9   : > { %3262 = dma.done.wait (%p2966_p3), %s2542_s26, 256  }
 0xbfa   : > { %3264 = vsyncadd (%p2966_p3), %s2542_s26, 4294967040  ;;  %s2551_s29 = scalar_lea.sflag [#allocation5], %s2541_s24 }
 0xbfb   : > { %3266 = dma.done.wait (%p2966_p3), %s2551_s29, 256  }
 0xbfc   : > { %3268 = vsyncadd (%p2966_p3), %s2551_s29, 4294967040  ;;  %s4165_s30 = sld [smem:[#allocation11_spill]]  ;;  %s4168_s3 = smov %s3275_s28 }
 0xbfd   : > { %s4166_s6 = sld [smem:[#allocation9_spill]] }
 0xbfe   : > { %s4167_s29 = sld [smem:[#allocation12_spill]] }
 0xc02   : > { %p36_p5 = scmp.ge.s32.totalorder %s4165_s30, 4  }
 0xc03   : > { %s4169_s28 = smov %s4166_s6 }
 0xc04   :  { %38 = sbr.rel (!%p36_p5) target bundleno = 16 (0x10), region = 168 }
 0xc09   :  { %2556 = vsyncpa [#allocation3], 1 }
 0xc0a   :  { %2558 = vsyncpa [#allocation3 + $0x1], 1 }
 0xc0b   :  { %2559 = vsyncpa [#allocation5], 1 }
 0xc0c   :  { %2561 = vsyncpa [#allocation5 + $0x1], 1 }

// kernel: dense_to_sparse_transformer_layer.2
= control target key start
LH: loop header
LB: loop body
LE: loop exit
PB: predicated region body
PF: predicated region fallthrough
CT: control target
= control target key end

     0   :  { %s2544_s25 = smov 0   ;;  %s3107_s0 = inlined_call_operand.vmem [shape: f32[2,16,64], index: 0, kind: input, shape index: {}]   ;;  %s3108_s1 = inlined_call_operand.vmem [shape: bf16[2,256,64], index: 1, kind: input, shape index: {}]   ;;  %s3109_s2 = inlined_call_operand.vmem [shape: bf16[2,64,256], index: 2, kind: input, shape index: {}]   ;;  %s3110_s3 = inlined_call_operand.vmem [shape: bf16[64,64], index: 3, kind: input, shape index: {}]   ;;  %s3111_s4 = inlined_call_operand.vmem [shape: bf16[64,64], index: 4, kind: input, shape index: {}]   ;;  %s3112_s5 = inlined_call_operand.vmem [shape: bf16[64,64], index: 5, kind: input, shape index: {}]   ;;  %s3113_s6 = inlined_call_operand.vmem [shape: bf16[64,64], index: 6, kind: input, shape index: {}]   ;;  %s3114_s7 = inlined_call_operand.vmem [shape: f32[1,64], index: 7, kind: input, shape index: {}]   ;;  %s3115_s8 = inlined_call_operand.vmem [shape: f32[64,1], index: 8, kind: input, shape index: {}]   ;;  %s3116_s9 = inlined_call_operand.vmem [shape: f32[1,64], index: 9, kind: input, shape index: {}]   ;;  %s3117_s10 = inlined_call_operand.vmem [shape: f32[1,64], index: 10, kind: input, shape index: {}]   ;;  %s3118_s11 = inlined_call_operand.vmem [shape: f32[1,64], index: 11, kind: input, shape index: {}]   ;;  %s3119_s12 = inlined_call_operand.vmem [shape: f32[1,64], index: 12, kind: input, shape index: {}]   ;;  %s3120_s13 = inlined_call_operand.vmem [shape: f32[2,16,64], index: 13, kind: output, shape index: {}]  }
   0x1 LB: > { %s2053_s26 = sadd.s32 4294967295, %s2463_s25   ;;  %p2057_p0 = scmp.ge.s32.totalorder %s2463_s25, 1  ;;  %s2463_s25 = sphi %s2544_s25, %s23_s25  }
   0x2   : > { %p407_p1 = scmp.lt.s32.totalorder %s2463_s25, 3 }
   0x4   : > { %p408_p2 = pnand %p2057_p0, %p407_p1 }
   0x5   : > { %p461_p3 = scmp.lt.s32.totalorder (!%p408_p2), %s2053_s26, 1  ;;  %s2468_s21 = smov (!%p408_p2), 112  }
   0x6   : > { %411 = sbr.rel (%p408_p2) target bundleno = 2171 (0x87b), region = 72  ;;  %s2473_s28 = smov (!%p408_p2), 48  }
   0xb   : > { %v2465_v0 = vmov 0.0   ;;  %v2364_v1 = vld [vmem:[%s3110_s3 + $0x18] sm:$0xff]   ;;  %s3122_s26 = smov (!%p461_p3, %s2053_s26), 1  ;;  %v2466_v2 = vmov 0   ;;  %v2368_v3 = vld [vmem:[%s3110_s3 + $0x10] sm:$0xff]   ;;  %v2372_v4 = vld [vmem:[%s3110_s3 + $0x8] sm:$0xff]  }
   0xc   : > { %2261 = vmatprep.subr.bf16.mxu0 %v2465_v0  ;;  %771 = vmatprep.mubr.bf16.mxu1 %v2466_v2  ;;  %s2141_s14 = sshll.u32 %s3122_s26, 6  ;;  %v619_v5 = vld [vmem:[%s3115_s8] sm:$0xff]  ;;  %v620_v6 = vld [vmem:[%s3115_s8 + $0x8] sm:$0xff]  ;;  %vm2467_vm0 = vmmov 0   ;;  %s2139_s24 = sshll.u32 %s3122_s26, 4  ;;  %vm564_vm1 = vcmask 523264  }
   0xd   : > { %2342 = vset.pattern.permute.xlu0 %v2466_v2  ;;  %2262 = vmatpush3.bf16.msra.mxu0 %v2364_v1  ;;  %s2569_s17 = scalar_lea.vmem %s3109_s2, %s2141_s14  ;;  %s2592_s29 = scalar_lea.vmem %s3107_s0, %s2139_s24  ;;  %v2375_v12 = vld [vmem:[%s3110_s3] sm:$0xff]   ;;  %v2376_v20 = vld [vmem:[%s3111_s4 + $0x8] sm:$0xff]   ;;  %v2377_v21 = vld [vmem:[%s3111_s4 + $0x10] sm:$0xff]   ;;  %vm1174_vm2 = vcmask 130048   ;;  %vm1844_vm3 = vcmask 261120   ;;  %vm1847_vm4 = vcmask 392192  }
   0xe   : > { %2343 = vset.pattern.permute.xlu1 %v2466_v2  ;;  %2263 = vmatprep.subr.bf16.mxu0 %v2465_v0  ;;  %v2359_v7 = vld [vmem:[%s2569_s17 + $0x34] ss:$8 sps:$4 sm:$0xff]   ;;  %v2361_v8 = vld [vmem:[%s2569_s17 + $0x30] ss:$8 sps:$4 sm:$0xff]   ;;  %v2362_v9 = vld [vmem:[%s2569_s17 + $0x24] ss:$8 sps:$4 sm:$0xff]  }
   0xf   : > { %2269 = vmatprep.mubr.msk.bf16.mxu0 %vm2467_vm0, %v2465_v0  ;;  %629 = vperm.xlu0 %2342, %v619_v5   ;;  %v2365_v10 = vld [vmem:[%s2569_s17 + $0x20] ss:$8 sps:$4 sm:$0xff]   ;;  %v2366_v11 = vld [vmem:[%s2569_s17 + $0x14] ss:$8 sps:$4 sm:$0xff]   ;;  %s2140_s30 = sshll.u32 %s3122_s26, 7  ;;  %s2470_s14 = smov 80  }
  0x10   : > { %747 = vmatprep.subr.bf16.mxu1 %v2359_v7  ;;  %v482_v13 = vld [vmem:[%s2592_s29] sm:$0xff]  ;;  %v483_v14 = vld [vmem:[%s2592_s29 + $0x8] sm:$0xff]  ;;  %v2369_v15 = vld [vmem:[%s2569_s17 + $0x10] ss:$8 sps:$4 sm:$0xff]   ;;  %s2609_s19 = scalar_lea.vmem %s3108_s1, %s2140_s30  ;;  %s2469_s30 = smov 96  }
  0x11   : > { %2264 = vmatpush3.bf16.msra.mxu0 %v2368_v3  ;;  %748 = vmatpush1.bf16.msra.mxu1 %v2361_v8  ;;  %v2370_v16 = vld [vmem:[%s2569_s17 + $0x4] ss:$8 sps:$4 sm:$0xff]   ;;  %v524_v17 = vpack.c.bf16 %v483_v14, %v482_v13  ;;  %v2373_v18 = vld [vmem:[%s2569_s17] ss:$8 sps:$4 sm:$0xff]   ;;  %v2378_v22 = vld [vmem:[%s3111_s4 + $0x18] sm:$0xff]   ;;  %s480_s17 = scalar_lea.vmem %s3120_s13, %s2139_s24 }
  0x12   : > { %2265 = vmatprep.subr.bf16.mxu0 %v2465_v0  ;;  %749 = vmatprep.subr.bf16.mxu1 %v2362_v9  ;;  %v2374_v19 = vld [vmem:[%s3111_s4] sm:$0xff]   ;;  %v2379_v23 = vld [vmem:[%s3112_s5 + $0x18] sm:$0xff]   ;;  %v2380_v24 = vld [vmem:[%s3112_s5 + $0x10] sm:$0xff]  }
  0x13   : > { %634 = vperm.xlu0 %2342, %v620_v6   ;;  %v2383_v25 = vld [vmem:[%s2609_s19] sm:$0xff]   ;;  %v2381_v26 = vld [vmem:[%s3112_s5 + $0x8] sm:$0xff]   ;;  %v2385_v29 = vld [vmem:[%s2609_s19 + $0x10] sm:$0xff]  }
  0x14   : > { %v2382_v27 = vld [vmem:[%s3112_s5] sm:$0xff]   ;;  %v2384_v28 = vld [vmem:[%s2609_s19 + $0x8] sm:$0xff]   ;;  %v2386_v30 = vld [vmem:[%s2609_s19 + $0x18] sm:$0xff]  }
  0x15   : > { %2266 = vmatpush3.bf16.msra.mxu0 %v2372_v4  ;;  %750 = vmatpush1.bf16.msra.mxu1 %v2365_v10  ;;  %v2387_v31 = vld [vmem:[%s2609_s19 + $0x20] sm:$0xff]   ;;  %v2388_v32 = vld [vmem:[%s2609_s19 + $0x28] sm:$0xff]   ;;  %v2389_v33 = vld [vmem:[%s2609_s19 + $0x30] sm:$0xff]  }
  0x16   : > { %2267 = vmatprep.subr.bf16.mxu0 %v2465_v0  ;;  %751 = vmatprep.subr.bf16.mxu1 %v2366_v11  ;;  %v2390_v34 = vld [vmem:[%s2609_s19 + $0x38] sm:$0xff]   ;;  %v2391_v35 = vld [vmem:[%s2609_s19 + $0x40] sm:$0xff]   ;;  %v2392_v36 = vld [vmem:[%s2609_s19 + $0x48] sm:$0xff]  }
  0x17   : > { %v2393_v37 = vld [vmem:[%s2609_s19 + $0x50] sm:$0xff]   ;;  %v2394_v38 = vld [vmem:[%s2609_s19 + $0x58] sm:$0xff]   ;;  %v2395_v39 = vld [vmem:[%s2609_s19 + $0x60] sm:$0xff]  }
  0x18   : > { %v2396_v40 = vld [vmem:[%s2609_s19 + $0x68] sm:$0xff]   ;;  %v2397_v41 = vld [vmem:[%s2609_s19 + $0x70] sm:$0xff]   ;;  %v2398_v42 = vld [vmem:[%s2609_s19 + $0x78] sm:$0xff]   ;;  %s2472_s19 = smov 32  }
  0x19   : > { %2268 = vmatpush3.bf16.msra.mxu0 %v2375_v12  ;;  %752 = vmatpush1.bf16.msra.mxu1 %v2369_v15  ;;  %v2066_v50 = vld [vmem:[%s3114_s7] ss:$0 sm:$0xff] }
  0x1a   : > { %753 = vmatprep.subr.bf16.mxu1 %v2370_v16  ;;  %2273 = vmatprep.subr.bf16.mxu0 %v2379_v23  ;;  %v2686_v4 = vld [vmem:[%s3116_s9] ss:$0 sm:$0xff] }
  0x1c   : > { %2270 = vmatmul.mubr.msk.bf16.vlgmr.msra.gmra.mxu0 %vm564_vm1, %v524_v17 }
  0x1d   : > { %754 = vmatpush1.bf16.msra.mxu1 %v2373_v18  ;;  %2274 = vmatpush3.bf16.msra.mxu0 %v2379_v23 }
  0x1e   : > { %2281 = vmatprep.mubr.msk.bf16.mxu0 %vm564_vm1, %v2383_v25  ;;  %2275 = vmatprep.subr.bf16.mxu0 %v2380_v24 }
  0x20   : > { %2084 = vmatmul.mubr.msk.bf16.vlgmr.msra.gmra.mxu1 %vm564_vm1, %v2374_v19 }
  0x21   : > { %781 = vmatprep.mubr.bf16.mxu1 %v2466_v2  ;;  %2276 = vmatpush3.bf16.msra.mxu0 %v2380_v24 }
  0x22   : > { %2277 = vmatprep.subr.bf16.mxu0 %v2381_v26 }
  0x25   : > { %2278 = vmatpush3.bf16.msra.mxu0 %v2381_v26 }
  0x26   : > { %2279 = vmatprep.subr.bf16.mxu0 %v2382_v27 }
  0x28   : > { %2085 = vmatmul.mubr.msk.bf16.gmra.mxu1 %vm564_vm1, %v2376_v20 }
  0x29   : > { %791 = vmatprep.mubr.bf16.mxu1 %v2466_v2  ;;  %2280 = vmatpush3.bf16.msra.mxu0 %v2382_v27 }
  0x2c   : > { %2282 = vmatmul.mubr.msk.bf16.vlgmr.msra.gmra.mxu0 %vm564_vm1, %v2384_v28 }
  0x2d   : > { %2285 = vmatprep.mubr.msk.bf16.mxu0 %vm564_vm1, %v2385_v29 }
  0x30   : > { %2086 = vmatmul.mubr.msk.bf16.gmra.mxu1 %vm564_vm1, %v2377_v21 }
  0x31   : > { %801 = vmatprep.mubr.bf16.mxu1 %v2466_v2 }
  0x34   : > { %2286 = vmatmul.mubr.msk.bf16.gmra.mxu0 %vm564_vm1, %v2386_v30 }
  0x35   : > { %2289 = vmatprep.mubr.msk.bf16.mxu0 %vm564_vm1, %v2387_v31 }
  0x38   : > { %2087 = vmatmul.mubr.msk.bf16.gmra.mxu1 %vm564_vm1, %v2378_v22 }
  0x39   : > { %1210 = vmatprep.mubr.bf16.mxu1 %v2466_v2 }
  0x3c   : > { %2290 = vmatmul.mubr.msk.bf16.gmra.mxu0 %vm564_vm1, %v2388_v32 }
  0x3d   : > { %2293 = vmatprep.mubr.msk.bf16.mxu0 %vm564_vm1, %v2389_v33 }
  0x44   : > { %2294 = vmatmul.mubr.msk.bf16.gmra.mxu0 %vm564_vm1, %v2390_v34 }
  0x45   : > { %2297 = vmatprep.mubr.msk.bf16.mxu0 %vm564_vm1, %v2391_v35 }
  0x4c   : > { %2298 = vmatmul.mubr.msk.bf16.gmra.mxu0 %vm564_vm1, %v2392_v36 }
  0x4d   : > { %2301 = vmatprep.mubr.msk.bf16.mxu0 %vm564_vm1, %v2393_v37 }
  0x54   : > { %2302 = vmatmul.mubr.msk.bf16.gmra.mxu0 %vm564_vm1, %v2394_v38 }
  0x55   : > { %2305 = vmatprep.mubr.msk.bf16.mxu0 %vm564_vm1, %v2395_v39 }
  0x5c   : > { %2306 = vmatmul.mubr.msk.bf16.gmra.mxu0 %vm564_vm1, %v2396_v40 }
  0x5d   : > { %2309 = vmatprep.mubr.msk.bf16.mxu0 %vm564_vm1, %v2397_v41 }
  0x64   : > { %2310 = vmatmul.mubr.msk.bf16.gmra.mxu0 %vm564_vm1, %v2398_v42 }
  0x8a   : > { %v630_v46 = vpop.permute.xlu0 %629 }
  0x8e   : > { %v635_v52 = vpop.permute.xlu0 %634 }
  0xdc   : > { %v602_v43 = vpop.f32.mrf.mxu0 }
  0xdd   : > { %v603_v53 = vadd.f32 %v2066_v50, %v602_v43 }
  0xde   : > { %v2271_v44 = vpop.f32.mrf.mxu0 }
  0xdf   : > { %v609_v60 = vmul.f32 0.25, %v603_v53  ;;  %v621_v44 = vld [vmem:[%s3115_s8 + $0x10] sm:$0xff] }
  0xe0   : > { %v605_v45 = vpop.f32.mrf.mxu0  ;;  %v773_v47 = vpop.f32.mrf.mxu1 }
  0xe1   : > { %v606_v54 = vadd.f32 %v2066_v50, %v605_v45  ;;  %v774_v59 = vadd.f32 %v773_v47, %v630_v46 }
  0xe2   : > { %v2272_v48 = vpop.f32.mrf.mxu0  ;;  %v775_v49 = vpop.f32.mrf.mxu1 }
  0xe3   : > { %v776_v57 = vadd.f32 %v775_v49, %v630_v46  ;;  %v610_v62 = vmul.f32 0.25, %v606_v54 }
  0xe4   : > { %v777_v51 = vpop.f32.mrf.mxu1 }
  0xe5   : > { %v778_v55 = vadd.f32 %v777_v51, %v635_v52  ;;  %v2679_v1 = vpack.c.bf16 %v610_v62, %v609_v60 }
  0xe6   : > { %v779_v56 = vpop.f32.mrf.mxu1 }
  0xe7   : > { %v780_v58 = vadd.f32 %v779_v56, %v635_v52  ;;  %v1150_v63 = vpack.c.bf16 %v778_v55, %v774_v59 }
  0xe8   : > { %v2702_v20 = vpop.f32.mrf.mxu1 }
  0xe9   : > { %v1151_v61 = vpack.c.bf16 %v780_v58, %v776_v57 }
  0xea   : > { %v2704_v21 = vpop.f32.mrf.mxu1 }
  0xeb   : > { %1192 = vmatprep.subr.bf16.mxu1 %v1151_v61 }
  0xec   : > { %1193 = vmatpush1.bf16.msra.mxu1 %v1150_v63  ;;  %v2283_v3 = vpop.f32.mrf.mxu0  ;;  %v2706_v22 = vpop.f32.mrf.mxu1 }
  0xed   : > { %v1022_v6 = vadd.f32 %v2283_v3, %v2686_v4 }
  0xee   : > { %v1013_v5 = vpop.f32.mrf.mxu0  ;;  %v2708_v23 = vpop.f32.mrf.mxu1 }
  0xef   : > { %2125 = vmatmul.mubr.msk.bf16.vlgmr.msra.gmra.mxu1 %vm1174_vm2, %v2679_v1  ;;  %v1014_v8 = vadd.f32 %v2686_v4, %v1013_v5 }
  0xf0   : > { %v2284_v7 = vpop.f32.mrf.mxu0  ;;  %v2710_v24 = vpop.f32.mrf.mxu1 }
  0xf1   : > { %v1025_v9 = vadd.f32 %v2284_v7, %v2686_v4 }
  0xf2   : > { %v1016_v10 = vpop.f32.mrf.mxu0  ;;  %v2712_v25 = vpop.f32.mrf.mxu1 }
  0xf3   : > { %v2691_v11 = vpack.c.bf16 %v1025_v9, %v1022_v6  ;;  %v1017_v12 = vadd.f32 %v2686_v4, %v1016_v10 }
  0xf4   : > { %v2287_v13 = vpop.f32.mrf.mxu0  ;;  %v2714_v26 = vpop.f32.mrf.mxu1 }
  0xf5   : > { %v2694_v14 = vpack.c.bf16 %v1017_v12, %v1014_v8  ;;  %v1038_v16 = vadd.f32 %v2287_v13, %v2686_v4 }
  0xf6   : > { %v2696_v15 = vpop.f32.mrf.mxu0  ;;  %v2716_v27 = vpop.f32.mrf.mxu1 }
  0xf8   : > { %v2288_v17 = vpop.f32.mrf.mxu0  ;;  %v2718_v28 = vpop.f32.mrf.mxu1 }
  0xf9   : > { %v1041_v18 = vadd.f32 %v2288_v17, %v2686_v4 }
  0xfa   : > { %v2720_v29 = vpop.f32.mrf.mxu1  ;;  %v2738_v38 = vpop.f32.mrf.mxu0 }
  0xfb   : > { %v2700_v19 = vpack.c.bf16 %v1041_v18, %v1038_v16 }
  0xfc   : > { %v2722_v30 = vpop.f32.mrf.mxu1  ;;  %v2291_v39 = vpop.f32.mrf.mxu0 }
  0xfe   : > { %v2724_v31 = vpop.f32.mrf.mxu1  ;;  %v1045_v40 = vpop.f32.mrf.mxu0 }
 0x100   : > { %v2292_v41 = vpop.f32.mrf.mxu0 }
 0x102   : > { %v1048_v42 = vpop.f32.mrf.mxu0 }
 0x104   : > { %v2295_v43 = vpop.f32.mrf.mxu0 }
 0x105   : > { %v1070_v61 = vadd.f32 %v2295_v43, %v2686_v4 }
 0x106   : > { %v1061_v45 = vpop.f32.mrf.mxu0 }
 0x107   : > { %v1062_v7 = vadd.f32 %v2686_v4, %v1061_v45 }
 0x108   : > { %v2296_v46 = vpop.f32.mrf.mxu0 }
 0x109   : > { %v1073_v62 = vadd.f32 %v2296_v46, %v2686_v4  ;;  %v1054_v46 = vadd.f32 %v2291_v39, %v2686_v4  ;;  %v1049_v39 = vadd.f32 %v2686_v4, %v1048_v42  ;;  %v1030_v42 = vadd.f32 %v2686_v4, %v2696_v15 }
 0x10a   : > { %v1064_v47 = vpop.f32.mrf.mxu0 }
 0x10b   : > { %v2748_v8 = vpack.c.bf16 %v1073_v62, %v1070_v61  ;;  %v1065_v9 = vadd.f32 %v2686_v4, %v1064_v47  ;;  %v1057_v47 = vadd.f32 %v2292_v41, %v2686_v4 }
 0x10c   : > { %v2299_v48 = vpop.f32.mrf.mxu0 }
 0x10e   : > { %v1077_v49 = vpop.f32.mrf.mxu0 }
 0x110   : > { %v2300_v50 = vpop.f32.mrf.mxu0 }
 0x111   : > { %v1089_v62 = vadd.f32 %v2300_v50, %v2686_v4 }
 0x112   : > { %v1080_v51 = vpop.f32.mrf.mxu0 }
 0x114   : > { %v2303_v52 = vpop.f32.mrf.mxu0 }
 0x116   : > { %v1093_v53 = vpop.f32.mrf.mxu0 }
 0x117   : > { %v1094_v41 = vadd.f32 %v2686_v4, %v1093_v53  ;;  %v1033_v53 = vadd.f32 %v2686_v4, %v2738_v38 }
 0x118   : > { %v2304_v54 = vpop.f32.mrf.mxu0 }
 0x119   : > { %v2804_v50 = vpack.c.bf16 %v1033_v53, %v1030_v42 }
 0x11a   : > { %v1096_v55 = vpop.f32.mrf.mxu0 }
 0x11c   : > { %v2307_v56 = vpop.f32.mrf.mxu0 }
 0x11d   : > { %v1118_v10 = vadd.f32 %v2307_v56, %v2686_v4  ;;  %v1102_v56 = vadd.f32 %v2303_v52, %v2686_v4  ;;  %v1097_v52 = vadd.f32 %v2686_v4, %v1096_v55  ;;  %v1078_v55 = vadd.f32 %v2686_v4, %v1077_v49 }
 0x11e   : > { %v1109_v57 = vpop.f32.mrf.mxu0 }
 0x120   : > { %v2308_v58 = vpop.f32.mrf.mxu0 }
 0x121   : > { %v1121_v12 = vadd.f32 %v2308_v58, %v2686_v4  ;;  %v1105_v58 = vadd.f32 %v2304_v54, %v2686_v4 }
 0x122   : > { %v1112_v59 = vpop.f32.mrf.mxu0 }
 0x123   : > { %v2762_v43 = vpack.c.bf16 %v1121_v12, %v1118_v10  ;;  %v2782_v61 = vpack.c.bf16 %v1105_v58, %v1102_v56 }
 0x124   : > { %v2311_v60 = vpop.f32.mrf.mxu0 }
 0x125   : > { %v1134_v3 = vadd.f32 %v2311_v60, %v2686_v4 }
 0x126   : > { %v1125_v63 = vpop.f32.mrf.mxu0 }
 0x127   : > { %v1126_v13 = vadd.f32 %v2686_v4, %v1125_v63  ;;  %v2791_v63 = vpack.c.bf16 %v1097_v52, %v1094_v41 }
 0x128   : > { %v2312_v5 = vpop.f32.mrf.mxu0 }
 0x129   : > { %v1137_v6 = vadd.f32 %v2312_v5, %v2686_v4 }
 0x12a   : > { %v1128_v17 = vpop.f32.mrf.mxu0 }
 0x12b   : > { %v2754_v16 = vpack.c.bf16 %v1137_v6, %v1134_v3  ;;  %v1129_v18 = vadd.f32 %v2686_v4, %v1128_v17 }
 0x12d   : > { %2168 = vmatprep.subr.bf16.mxu1 %v2754_v16  ;;  %v2765_v45 = vpack.c.bf16 %v1129_v18, %v1126_v13 }
 0x12e   : > { %2169 = vmatpush3.bf16.msra.mxu1 %v2748_v8 }
 0x12f   : > { %2170 = vmatprep.subr.bf16.mxu1 %v2765_v45 }
 0x1af   : > { %v2726_v32 = vpop.f32.mrf.mxu1 }
 0x1b1   : > { %v2728_v33 = vpop.f32.mrf.mxu1 }
 0x1b2   : > { %v1221_v34 = vmax.f32 %v2726_v32, %v2728_v33 }
 0x1b3   : > { %v2732_v35 = vpop.f32.mrf.mxu1 }
 0x1b4   : > { %1222 = vmax.xlane.f32.xlu1 %v1221_v34  ;;  %v2758_v34 = vpack.c.bf16 %v1065_v9, %v1062_v7 }
 0x1b5   : > { %v2734_v36 = vpop.f32.mrf.mxu1 }
 0x1b6   : > { %v1224_v37 = vmax.f32 %v2732_v35, %v2734_v36  ;;  %2171 = vmatpush3.bf16.msra.mxu1 %v2758_v34 }
 0x1b7   : > { %2172 = vmatprep.subr.bf16.mxu1 %v2762_v43 }
 0x1b8   : > { %1225 = vmax.xlane.f32.xlu1 %v1224_v37  ;;  %v1110_v37 = vadd.f32 %v2686_v4, %v1109_v57  ;;  %v1046_v57 = vadd.f32 %v2686_v4, %v1045_v40  ;;  %v1086_v40 = vadd.f32 %v2299_v48, %v2686_v4  ;;  %v1081_v48 = vadd.f32 %v2686_v4, %v1080_v51 }
 0x1ba   : > { %v2786_v54 = vpack.c.bf16 %v1049_v39, %v1046_v57  ;;  %v2800_v3 = vpack.c.bf16 %v1089_v62, %v1086_v40  ;;  %v2807_v5 = vpack.c.bf16 %v1081_v48, %v1078_v55 }
 0x1c9   : > { %639 = vperm.xlu1 %2343, %v621_v44   ;;  %v1113_v44 = vadd.f32 %v2686_v4, %v1112_v59  ;;  %v2777_v59 = vpack.c.bf16 %v1057_v47, %v1054_v46  ;;  %v625_v46 = vld [vmem:[%s3115_s8 + $0x30] sm:$0xff]  ;;  %v626_v47 = vld [vmem:[%s3115_s8 + $0x38] sm:$0xff] }
 0x1cb   : > { %v2773_v60 = vpack.c.bf16 %v1113_v44, %v1110_v37  ;;  %2173 = vmatpush3.bf16.msra.mxu1 %v2777_v59  ;;  %v624_v37 = vld [vmem:[%s3115_s8 + $0x28] sm:$0xff]  ;;  %v623_v44 = vld [vmem:[%s3115_s8 + $0x20] sm:$0xff] }
 0x1cd   : > { %2174 = vmatprep.subr.bf16.mxu1 %v2773_v60 }
 0x1cf   : > { %2175 = vmatpush3.bf16.msra.mxu1 %v2786_v54 }
 0x1d0   : > { %2176 = vmatprep.subr.bf16.mxu1 %v2782_v61 }
 0x1d3   : > { %2177 = vmatpush3.bf16.msra.mxu1 %v2700_v19 }
 0x1d4   : > { %2178 = vmatprep.subr.bf16.mxu1 %v2791_v63 }
 0x1d7   : > { %2179 = vmatpush3.bf16.msra.mxu1 %v2804_v50 }
 0x1d8   : > { %2180 = vmatprep.subr.bf16.mxu1 %v2800_v3 }
 0x1db   : > { %2181 = vmatpush3.bf16.msra.mxu1 %v2691_v11 }
 0x1dc   : > { %2182 = vmatprep.subr.bf16.mxu1 %v2807_v5 }
 0x1df   : > { %2183 = vmatpush3.bf16.msra.mxu1 %v2694_v14 }
 0x23d   : > { %v1223_v15 = vpop.xlane.xlu1 %1222 }
 0x23e   : > { %v1227_v38 = vsub.f32 %v2726_v32, %v1223_v15  ;;  %v1228_v4 = vsub.f32 %v2728_v33, %v1223_v15 }
 0x240   : > { %v1231_v49 = vmul.f32 1.442695, %v1227_v38  ;;  %v1233_v51 = vmul.f32 1.442695, %v1228_v4 }
 0x241   : > { %v1226_v6 = vpop.xlane.xlu1 %1225 }
 0x242   : > { %2403 = vpow2.f32 %v1231_v49  ;;  %v1229_v7 = vsub.f32 %v2732_v35, %v1226_v6  ;;  %v1230_v9 = vsub.f32 %v2734_v36, %v1226_v6  ;;  %v622_v36 = vld [vmem:[%s3115_s8 + $0x18] sm:$0xff] }
 0x243   : > { %2405 = vpow2.f32 %v1233_v51 }
 0x244   : > { %v1235_v10 = vmul.f32 1.442695, %v1229_v7  ;;  %v1237_v12 = vmul.f32 1.442695, %v1230_v9 }
 0x246   : > { %2407 = vpow2.f32 %v1235_v10 }
 0x247   : > { %2409 = vpow2.f32 %v1237_v12 }
 0x24f   : > { %v2817_v13 = vpop.eup %2403 }
 0x250   : > { %v2819_v17 = vpop.eup %2405 }
 0x251   : > { %v1239_v32 = vadd.f32 %v2819_v17, %v2817_v13 }
 0x253   : > { %v2823_v33 = vpop.eup %2407  ;;  %1240 = vadd.xlane.f32.xlu0 %v1239_v32 }
 0x254   : > { %v2825_v18 = vpop.eup %2409 }
 0x255   : > { %v1242_v35 = vadd.f32 %v2825_v18, %v2823_v33 }
 0x257   : > { %1243 = vadd.xlane.f32.xlu1 %v1242_v35 }
 0x268   : > { %644 = vperm.xlu1 %2343, %v622_v36  }
 0x269   : > { %654 = vperm.xlu0 %2342, %v624_v37  }
 0x26c   : > { %1295 = vrot.lane.b32.xlu1 %v2679_v1, %s2468_s21 }
 0x26d   : > { %1421 = vrot.lane.b32.xlu0 %v2754_v16, %s2468_s21 }
 0x270   : > { %649 = vperm.xlu1 %2343, %v623_v44  }
 0x271   : > { %1419 = vrot.lane.b32.xlu0 %v2765_v45, %s2468_s21 }
 0x274   : > { %659 = vperm.xlu1 %2343, %v625_v46  }
 0x275   : > { %1401 = vrot.lane.b32.xlu0 %v2777_v59, %s2468_s21 }
 0x278   : > { %664 = vperm.xlu1 %2343, %v626_v47  }
 0x279   : > { %1399 = vrot.lane.b32.xlu0 %v2786_v54, %s2468_s21 }
 0x27c   : > { %1480 = vrot.lane.b32.xlu1 %v2679_v1, %s2469_s30 }
 0x27d   : > { %1397 = vrot.lane.b32.xlu0 %v2700_v19, %s2468_s21 }
 0x280   : > { %1649 = vrot.lane.b32.xlu1 %v2679_v1, %s2470_s14  ;;  %v640_v1 = vpop.permute.xlu1 %639 }
 0x281   : > { %1395 = vrot.lane.b32.xlu0 %v2804_v50, %s2468_s21  ;;  %v784_v42 = vadd.f32 %v2702_v20, %v640_v1 }
 0x284   : > { %1405 = vrot.lane.b32.xlu1 %v2748_v8, %s2468_s21 }
 0x285   : > { %1393 = vrot.lane.b32.xlu0 %v2691_v11, %s2468_s21 }
 0x288   : > { %1403 = vrot.lane.b32.xlu1 %v2758_v34, %s2468_s21 }
 0x289   : > { %1391 = vrot.lane.b32.xlu0 %v2694_v14, %s2468_s21 }
 0x28c   : > { %1417 = vrot.lane.b32.xlu1 %v2762_v43, %s2468_s21 }
 0x28d   : > { %1574 = vrot.lane.b32.xlu0 %v2748_v8, %s2469_s30 }
 0x290   : > { %1415 = vrot.lane.b32.xlu1 %v2773_v60, %s2468_s21 }
 0x291   : > { %1743 = vrot.lane.b32.xlu0 %v2748_v8, %s2470_s14 }
 0x294   : > { %1413 = vrot.lane.b32.xlu1 %v2782_v61, %s2468_s21 }
 0x295   : > { %1572 = vrot.lane.b32.xlu0 %v2758_v34, %s2469_s30 }
 0x298   : > { %1411 = vrot.lane.b32.xlu1 %v2791_v63, %s2468_s21 }
 0x299   : > { %1741 = vrot.lane.b32.xlu0 %v2758_v34, %s2470_s14 }
 0x29c   : > { %1409 = vrot.lane.b32.xlu1 %v2800_v3, %s2468_s21 }
 0x29d   : > { %1570 = vrot.lane.b32.xlu0 %v2777_v59, %s2469_s30 }
 0x2a0   : > { %1407 = vrot.lane.b32.xlu1 %v2807_v5, %s2468_s21  ;;  %s2471_s21 = smov 16  }
 0x2a1   : > { %1739 = vrot.lane.b32.xlu0 %v2777_v59, %s2470_s14 }
 0x2a4   : > { %1590 = vrot.lane.b32.xlu1 %v2754_v16, %s2469_s30 }
 0x2a5   : > { %1568 = vrot.lane.b32.xlu0 %v2786_v54, %s2469_s30 }
 0x2a8   : > { %1759 = vrot.lane.b32.xlu1 %v2754_v16, %s2470_s14 }
 0x2a9   : > { %1737 = vrot.lane.b32.xlu0 %v2786_v54, %s2470_s14 }
 0x2ac   : > { %1588 = vrot.lane.b32.xlu1 %v2765_v45, %s2469_s30 }
 0x2ad   : > { %1566 = vrot.lane.b32.xlu0 %v2700_v19, %s2469_s30 }
 0x2b0   : > { %1757 = vrot.lane.b32.xlu1 %v2765_v45, %s2470_s14 }
 0x2b1   : > { %1735 = vrot.lane.b32.xlu0 %v2700_v19, %s2470_s14 }
 0x2b4   : > { %1586 = vrot.lane.b32.xlu1 %v2762_v43, %s2469_s30 }
 0x2b5   : > { %1564 = vrot.lane.b32.xlu0 %v2804_v50, %s2469_s30 }
 0x2b8   : > { %1755 = vrot.lane.b32.xlu1 %v2762_v43, %s2470_s14  ;;  %v786_v43 = vadd.f32 %v2704_v21, %v640_v1 }
 0x2b9   : > { %1733 = vrot.lane.b32.xlu0 %v2804_v50, %s2470_s14 }
 0x2bc   : > { %1584 = vrot.lane.b32.xlu1 %v2773_v60, %s2469_s30 }
 0x2c0   : > { %1753 = vrot.lane.b32.xlu1 %v2773_v60, %s2470_s14 }
 0x2c4   : > { %1582 = vrot.lane.b32.xlu1 %v2782_v61, %s2469_s30 }
 0x2c8   : > { %1751 = vrot.lane.b32.xlu1 %v2782_v61, %s2470_s14 }
 0x2cc   : > { %1580 = vrot.lane.b32.xlu1 %v2791_v63, %s2469_s30 }
 0x2d0   : > { %1749 = vrot.lane.b32.xlu1 %v2791_v63, %s2470_s14 }
 0x2d4   : > { %1578 = vrot.lane.b32.xlu1 %v2800_v3, %s2469_s30 }
 0x2dc   : > { %v1241_v19 = vpop.xlane.xlu0 %1240 }
 0x2dd   : > { %2411 = vrcp.f32 %v1241_v19 }
 0x2e0   : > { %v1244_v8 = vpop.xlane.xlu1 %1243 }
 0x2e1   : > { %2413 = vrcp.f32 %v1244_v8 }
 0x2e4   : > { %v655_v16 = vpop.permute.xlu0 %654  ;;  %v645_v34 = vpop.permute.xlu1 %644 }
 0x2e5   : > { %v790_v45 = vadd.f32 %v2708_v23, %v645_v34  ;;  %v788_v61 = vadd.f32 %v2706_v22, %v645_v34  ;;  %v800_v48 = vadd.f32 %v2716_v27, %v655_v16  ;;  %v798_v51 = vadd.f32 %v2714_v26, %v655_v16 }
 0x2e7   : > { %v1153_v56 = vpack.c.bf16 %v790_v45, %v786_v43  ;;  %v1152_v50 = vpack.c.bf16 %v788_v61, %v784_v42 }
 0x2e8   : > { %v1296_v58 = vpop.permute.xlu1 %1295  ;;  %v1422_v60 = vpop.permute.xlu0 %1421 }
 0x2e9   : > { %1314 = vmatprep.subr.bf16.mxu1 %v1153_v56  ;;  %2190 = vmatprep.subr.bf16.mxu0 %v1422_v60 }
 0x2ea   : > { %v2412_v57 = vpop.eup %2411 }
 0x2eb   : > { %v1248_v52 = vmul.f32 %v2412_v57, %v2819_v17  ;;  %v1247_v40 = vmul.f32 %v2412_v57, %v2817_v13 }
 0x2ec   : > { %v650_v59 = vpop.permute.xlu1 %649  ;;  %v1420_v39 = vpop.permute.xlu0 %1419 }
 0x2ed   : > { %v796_v23 = vadd.f32 %v2712_v25, %v650_v59  ;;  %v794_v25 = vadd.f32 %v2710_v24, %v650_v59 }
 0x2ee   : > { %v2414_v41 = vpop.eup %2413 }
 0x2ef   : > { %v1250_v54 = vmul.f32 %v2414_v41, %v2825_v18  ;;  %v1249_v21 = vmul.f32 %v2414_v41, %v2823_v33  ;;  %v1155_v22 = vpack.c.bf16 %v800_v48, %v796_v23  ;;  %v1154_v6 = vpack.c.bf16 %v798_v51, %v794_v25 }
 0x2f0   : > { %v660_v62 = vpop.permute.xlu1 %659  ;;  %v1402_v63 = vpop.permute.xlu0 %1401 }
 0x2f1   : > { %v1252_v53 = vpack.c.bf16 %v1250_v54, %v1248_v52  ;;  %v1251_v55 = vpack.c.bf16 %v1249_v21, %v1247_v40  ;;  %v806_v27 = vadd.f32 %v2720_v29, %v660_v62  ;;  %v804_v13 = vadd.f32 %v2718_v28, %v660_v62 }
 0x2f3   : > { %1285 = vmatprep.mubr.bf16.mxu1 %v1252_v53 }
 0x2f4   : > { %v665_v15 = vpop.permute.xlu1 %664  ;;  %v1400_v38 = vpop.permute.xlu0 %1399  ;;  %1286 = vmatmul.mubr.bf16.vlgmr.msra.gmra.mxu1 %v1251_v55 }
 0x2f5   : > { %1315 = vmatpush1.bf16.msra.mxu1 %v1152_v50  ;;  %1332 = vmatprep.mubr.bf16.mxu1 %v2466_v2  ;;  %v810_v4 = vadd.f32 %v2724_v31, %v665_v15  ;;  %v808_v24 = vadd.f32 %v2722_v30, %v665_v15 }
 0x2f6   : > { %1499 = vmatprep.subr.bf16.mxu1 %v1155_v22 }
 0x2f7   : > { %v1157_v7 = vpack.c.bf16 %v810_v4, %v806_v27  ;;  %v1156_v26 = vpack.c.bf16 %v808_v24, %v804_v13 }
 0x2f8   : > { %v1481_v49 = vpop.permute.xlu1 %1480  ;;  %v1398_v20 = vpop.permute.xlu0 %1397 }
 0x2fc   : > { %v1650_v9 = vpop.permute.xlu1 %1649  ;;  %v1396_v10 = vpop.permute.xlu0 %1395  ;;  %2126 = vmatmul.mubr.msk.bf16.vlgmr.msra.gmra.mxu1 %vm1174_vm2, %v1296_v58 }
 0x2fd   : > { %1500 = vmatpush1.bf16.msra.mxu1 %v1154_v6  ;;  %1517 = vmatprep.mubr.bf16.mxu1 %v2466_v2 }
 0x2fe   : > { %1668 = vmatprep.subr.bf16.mxu1 %v1157_v7 }
 0x300   : > { %v1406_v12 = vpop.permute.xlu1 %1405  ;;  %v1394_v31 = vpop.permute.xlu0 %1393 }
 0x301   : > { %2191 = vmatpush3.bf16.msra.mxu0 %v1406_v12 }
 0x302   : > { %2192 = vmatprep.subr.bf16.mxu0 %v1420_v39 }
 0x304   : > { %v1404_v29 = vpop.permute.xlu1 %1403  ;;  %2127 = vmatmul.mubr.msk.bf16.vlgmr.msra.gmra.mxu1 %vm1174_vm2, %v1481_v49  ;;  %v1392_v17 = vpop.permute.xlu0 %1391 }
 0x305   : > { %1669 = vmatpush1.bf16.msra.mxu1 %v1156_v26  ;;  %1686 = vmatprep.mubr.bf16.mxu1 %v2466_v2 }
 0x306   : > { %2193 = vmatpush3.bf16.msra.mxu0 %v1404_v29 }
 0x308   : > { %v1418_v32 = vpop.permute.xlu1 %1417  ;;  %v2953_v33 = vpop.permute.xlu0 %1574 }
 0x309   : > { %2194 = vmatprep.subr.bf16.mxu0 %v1418_v32 }
 0x30a   : > { %2195 = vmatpush3.bf16.msra.mxu0 %v1402_v63 }
 0x30c   : > { %v1416_v30 = vpop.permute.xlu1 %1415  ;;  %2128 = vmatmul.mubr.msk.bf16.vlgmr.msra.gmra.mxu1 %vm1174_vm2, %v1650_v9  ;;  %v1744_v18 = vpop.permute.xlu0 %1743 }
 0x30d   : > { %2196 = vmatprep.subr.bf16.mxu0 %v1416_v30 }
 0x30e   : > { %2197 = vmatpush3.bf16.msra.mxu0 %v1400_v38 }
 0x310   : > { %v1414_v28 = vpop.permute.xlu1 %1413  ;;  %v2956_v36 = vpop.permute.xlu0 %1572 }
 0x311   : > { %2198 = vmatprep.subr.bf16.mxu0 %v1414_v28 }
 0x312   : > { %2199 = vmatpush3.bf16.msra.mxu0 %v1398_v20 }
 0x314   : > { %v1412_v35 = vpop.permute.xlu1 %1411  ;;  %v1742_v44 = vpop.permute.xlu0 %1741 }
 0x315   : > { %2200 = vmatprep.subr.bf16.mxu0 %v1412_v35 }
 0x316   : > { %2201 = vmatpush3.bf16.msra.mxu0 %v1396_v10 }
 0x318   : > { %v1410_v2 = vpop.permute.xlu1 %1409  ;;  %v2958_v47 = vpop.permute.xlu0 %1570 }
 0x319   : > { %2202 = vmatprep.subr.bf16.mxu0 %v1410_v2 }
 0x31a   : > { %2203 = vmatpush3.bf16.msra.mxu0 %v1394_v31 }
 0x31c   : > { %v1408_v37 = vpop.permute.xlu1 %1407  ;;  %v1740_v8 = vpop.permute.xlu0 %1739 }
 0x31d   : > { %2204 = vmatprep.subr.bf16.mxu0 %v1408_v37 }
 0x31e   : > { %2205 = vmatpush3.bf16.msra.mxu0 %v1392_v17 }
 0x320   : > { %v1591_v46 = vpop.permute.xlu1 %1590  ;;  %v2962_v34 = vpop.permute.xlu0 %1568 }
 0x321   : > { %2212 = vmatprep.subr.bf16.mxu0 %v1591_v46 }
 0x324   : > { %v1760_v1 = vpop.permute.xlu1 %1759  ;;  %v1738_v56 = vpop.permute.xlu0 %1737 }
 0x325   : > { %2234 = vmatprep.subr.bf16.mxu1 %v1760_v1 }
 0x326   : > { %2235 = vmatpush3.bf16.msra.mxu1 %v1744_v18 }
 0x328   : > { %v2960_v19 = vpop.permute.xlu1 %1588  ;;  %v2968_v60 = vpop.permute.xlu0 %1566 }
 0x32c   : > { %v1758_v16 = vpop.permute.xlu1 %1757  ;;  %v1736_v39 = vpop.permute.xlu0 %1735 }
 0x32d   : > { %2236 = vmatprep.subr.bf16.mxu1 %v1758_v16 }
 0x32e   : > { %2237 = vmatpush3.bf16.msra.mxu1 %v1742_v44 }
 0x330   : > { %v2964_v43 = vpop.permute.xlu1 %1586  ;;  %v2972_v61 = vpop.permute.xlu0 %1564 }
 0x334   : > { %v1756_v45 = vpop.permute.xlu1 %1755  ;;  %v1734_v40 = vpop.permute.xlu0 %1733 }
 0x335   : > { %2238 = vmatprep.subr.bf16.mxu1 %v1756_v45 }
 0x336   : > { %2239 = vmatpush3.bf16.msra.mxu1 %v1740_v8 }
 0x338   : > { %v2966_v58 = vpop.permute.xlu1 %1584 }
 0x33c   : > { %v1754_v57 = vpop.permute.xlu1 %1753 }
 0x33d   : > { %2240 = vmatprep.subr.bf16.mxu1 %v1754_v57 }
 0x33e   : > { %2241 = vmatpush3.bf16.msra.mxu1 %v1738_v56 }
 0x340   : > { %v2970_v59 = vpop.permute.xlu1 %1582 }
 0x344   : > { %v1752_v41 = vpop.permute.xlu1 %1751 }
 0x345   : > { %2242 = vmatprep.subr.bf16.mxu1 %v1752_v41 }
 0x346   : > { %2243 = vmatpush3.bf16.msra.mxu1 %v1736_v39 }
 0x348   : > { %v2974_v52 = vpop.permute.xlu1 %1580 }
 0x34c   : > { %v1750_v54 = vpop.permute.xlu1 %1749 }
 0x34d   : > { %2244 = vmatprep.subr.bf16.mxu1 %v1750_v54 }
 0x34e   : > { %2245 = vmatpush3.bf16.msra.mxu1 %v1734_v40 }
 0x350   : > { %v2998_v31 = vpop.permute.xlu1 %1578 }
 0x3b4   : > { %v2184_v21 = vpop.f32.mrf.mxu1 }
 0x3b6   : > { %v2185_v23 = vpop.f32.mrf.mxu1 }
 0x3b7   : > { %v2976_v62 = vadd.f32 %v2185_v23, %v2184_v21 }
 0x3b8   : > { %v2187_v63 = vpop.f32.mrf.mxu1 }
 0x3ba   : > { %v2188_v42 = vpop.f32.mrf.mxu1 }
 0x3bb   : > { %v2978_v53 = vadd.f32 %v2188_v42, %v2187_v63 }
 0x3bc   : > { %v1334_v55 = vpop.f32.mrf.mxu1 }
 0x3be   : > { %v1336_v48 = vpop.f32.mrf.mxu1 }
 0x3bf   : > { %v1343_v50 = vmax.f32 %v1334_v55, %v1336_v48 }
 0x3c0   : > { %v1338_v22 = vpop.f32.mrf.mxu1 }
 0x3c1   : > { %1344 = vmax.xlane.f32.xlu1 %v1343_v50 }
 0x3c2   : > { %v1340_v15 = vpop.f32.mrf.mxu1 }
 0x3c3   : > { %v1346_v38 = vmax.f32 %v1338_v22, %v1340_v15 }
 0x3c4   : > { %v2980_v25 = vpop.f32.mrf.mxu1 }
 0x3c5   : > { %1347 = vmax.xlane.f32.xlu0 %v1346_v38 }
 0x3c6   : > { %v2982_v4 = vpop.f32.mrf.mxu1 }
 0x3c7   : > { %v1528_v24 = vmax.f32 %v2980_v25, %v2982_v4 }
 0x3c8   : > { %v1523_v49 = vpop.f32.mrf.mxu1 }
 0x3ca   : > { %v1525_v20 = vpop.f32.mrf.mxu1 }
 0x3cb   : > { %v1531_v51 = vmax.f32 %v1523_v49, %v1525_v20 }
 0x3cc   : > { %v2984_v27 = vpop.f32.mrf.mxu1 }
 0x3cd   : > { %1532 = vmax.xlane.f32.xlu1 %v1531_v51 }
 0x3ce   : > { %v2986_v6 = vpop.f32.mrf.mxu1 }
 0x3cf   : > { %v1697_v12 = vmax.f32 %v2984_v27, %v2986_v6 }
 0x3d0   : > { %v1692_v7 = vpop.f32.mrf.mxu1 }
 0x3d2   : > { %v1694_v9 = vpop.f32.mrf.mxu1 }
 0x3d3   : > { %v1700_v10 = vmax.f32 %v1692_v7, %v1694_v9 }
 0x3d5   : > { %1701 = vmax.xlane.f32.xlu1 %v1700_v10 }
 0x3db   : > { %1562 = vrot.lane.b32.xlu0 %v2691_v11, %s2469_s30 }
 0x3e6   : > { %1747 = vrot.lane.b32.xlu1 %v2800_v3, %s2470_s14 }
 0x3fa   : > { %1529 = vmax.xlane.f32.xlu0 %v1528_v24 }
 0x3fe   : > { %1698 = vmax.xlane.f32.xlu0 %v1697_v12 }
 0x414   : > { %1731 = vrot.lane.b32.xlu0 %v2691_v11, %s2470_s14 }
 0x44a   : > { %v1345_v13 = vpop.xlane.xlu1 %1344 }
 0x44b   : > { %v1349_v26 = vsub.f32 %v1334_v55, %v1345_v13  ;;  %v1350_v29 = vsub.f32 %v1336_v48, %v1345_v13 }
 0x44d   : > { %v1353_v17 = vmul.f32 1.442695, %v1349_v26  ;;  %v1355_v32 = vmul.f32 1.442695, %v1350_v29 }
 0x44e   : > { %v1348_v30 = vpop.xlane.xlu0 %1347 }
 0x44f   : > { %2415 = vpow2.f32 %v1353_v17  ;;  %v1351_v3 = vsub.f32 %v1338_v22, %v1348_v30  ;;  %v1352_v28 = vsub.f32 %v1340_v15, %v1348_v30 }
 0x450   : > { %2417 = vpow2.f32 %v1355_v32 }
 0x451   : > { %v1357_v18 = vmul.f32 1.442695, %v1351_v3  ;;  %v1359_v35 = vmul.f32 1.442695, %v1352_v28 }
 0x452   : > { %v3013_v54 = vpop.permute.xlu0 %1562 }
 0x453   : > { %2419 = vpow2.f32 %v1357_v18 }
 0x454   : > { %2421 = vpow2.f32 %v1359_v35 }
 0x456   : > { %v1533_v2 = vpop.xlane.xlu1 %1532 }
 0x457   : > { %v1536_v56 = vsub.f32 %v1523_v49, %v1533_v2  ;;  %v1537_v57 = vsub.f32 %v1525_v20, %v1533_v2 }
 0x459   : > { %v1542_v39 = vmul.f32 1.442695, %v1536_v56  ;;  %v1544_v40 = vmul.f32 1.442695, %v1537_v57 }
 0x45b   : > { %2423 = vpow2.f32 %v1542_v39 }
 0x45c   : > { %v3000_v37 = vpop.eup %2415  ;;  %2425 = vpow2.f32 %v1544_v40 }
 0x45d   : > { %v3002_v11 = vpop.eup %2417 }
 0x45e   : > { %v1702_v44 = vpop.xlane.xlu1 %1701  ;;  %v1361_v46 = vadd.f32 %v3002_v11, %v3000_v37 }
 0x45f   : > { %v1705_v41 = vsub.f32 %v1692_v7, %v1702_v44  ;;  %v1706_v21 = vsub.f32 %v1694_v9, %v1702_v44 }
 0x460   : > { %v3006_v1 = vpop.eup %2419  ;;  %1362 = vadd.xlane.f32.xlu1 %v1361_v46 }
 0x461   : > { %v2422_v8 = vpop.eup %2421  ;;  %v1711_v23 = vmul.f32 1.442695, %v1705_v41  ;;  %v1713_v63 = vmul.f32 1.442695, %v1706_v21  ;;  %v2399_v21 = vld [vmem:[%s3113_s6 + $0x18] sm:$0xff]  }
 0x462   : > { %v1748_v16 = vpop.permute.xlu1 %1747  ;;  %v1364_v45 = vadd.f32 %v2422_v8, %v3006_v1 }
 0x463   : > { %2246 = vmatprep.subr.bf16.mxu1 %v1748_v16  ;;  %2427 = vpow2.f32 %v1711_v23 }
 0x464   : > { %1365 = vadd.xlane.f32.xlu0 %v1364_v45  ;;  %2429 = vpow2.f32 %v1713_v63  ;;  %v2400_v63 = vld [vmem:[%s3113_s6 + $0x10] sm:$0xff]  }
 0x471   : > { %1576 = vrot.lane.b32.xlu1 %v2807_v5, %s2469_s30 }
 0x47a   : > { %1560 = vrot.lane.b32.xlu0 %v2694_v14, %s2469_s30 }
 0x483   : > { %v1530_v42 = vpop.xlane.xlu0 %1529 }
 0x484   : > { %v1534_v55 = vsub.f32 %v2980_v25, %v1530_v42  ;;  %v1535_v48 = vsub.f32 %v2982_v4, %v1530_v42  ;;  %v3019_v25 = vpop.eup %2423 }
 0x485   : > { %v3021_v4 = vpop.eup %2425 }
 0x486   : > { %v1538_v50 = vmul.f32 1.442695, %v1534_v55  ;;  %v1540_v22 = vmul.f32 1.442695, %v1535_v48  ;;  %v3023_v9 = vpop.eup %2427  ;;  %v1549_v10 = vadd.f32 %v3021_v4, %v3019_v25 }
 0x487   : > { %v1699_v15 = vpop.xlane.xlu0 %1698  ;;  %v3027_v24 = vpop.eup %2429 }
 0x488   : > { %2431 = vpow2.f32 %v1538_v50  ;;  %v1703_v38 = vsub.f32 %v2984_v27, %v1699_v15  ;;  %v1704_v49 = vsub.f32 %v2986_v6, %v1699_v15  ;;  %v1718_v12 = vadd.f32 %v3027_v24, %v3023_v9  ;;  %v2401_v15 = vld [vmem:[%s3113_s6 + $0x8] sm:$0xff]  }
 0x489   : > { %2433 = vpow2.f32 %v1540_v22 }
 0x48a   : > { %v1707_v20 = vmul.f32 1.442695, %v1703_v38  ;;  %v1709_v51 = vmul.f32 1.442695, %v1704_v49 }
 0x48b   : > { %v1732_v7 = vpop.permute.xlu0 %1731 }
 0x48c   : > { %2435 = vpow2.f32 %v1707_v20  ;;  %2247 = vmatpush3.bf16.msra.mxu1 %v1732_v7  ;;  %v2402_v20 = vld [vmem:[%s3113_s6] sm:$0xff]  }
 0x48d   : > { %2437 = vpow2.f32 %v1709_v51 }
 0x495   : > { %v2432_v27 = vpop.eup %2431  ;;  %1550 = vadd.xlane.f32.xlu1 %v1549_v10 }
 0x496   : > { %v2434_v6 = vpop.eup %2433 }
 0x497   : > { %v1546_v13 = vadd.f32 %v2434_v6, %v2432_v27 }
 0x499   : > { %v3031_v26 = vpop.eup %2435  ;;  %1719 = vadd.xlane.f32.xlu1 %v1718_v12  ;;  %1547 = vadd.xlane.f32.xlu0 %v1546_v13 }
 0x49a   : > { %v2438_v29 = vpop.eup %2437 }
 0x49b   : > { %v1715_v17 = vadd.f32 %v2438_v29, %v3031_v26 }
 0x49d   : > { %1716 = vadd.xlane.f32.xlu0 %v1715_v17 }
 0x4aa   : > { %1745 = vrot.lane.b32.xlu1 %v2807_v5, %s2470_s14 }
 0x4b3   : > { %1729 = vrot.lane.b32.xlu0 %v2694_v14, %s2470_s14 }
 0x4e9   : > { %v1363_v32 = vpop.xlane.xlu1 %1362 }
 0x4ea   : > { %2439 = vrcp.f32 %v1363_v32 }
 0x4ed   : > { %v1366_v30 = vpop.xlane.xlu0 %1365  ;;  %v1577_v14 = vpop.permute.xlu1 %1576 }
 0x4ee   : > { %2441 = vrcp.f32 %v1366_v30 }
 0x4f1   : > { %v1561_v5 = vpop.permute.xlu0 %1560 }
 0x4f7   : > { %v2440_v3 = vpop.eup %2439 }
 0x4f8   : > { %v1370_v18 = vmul.f32 %v2440_v3, %v3002_v11  ;;  %v1369_v2 = vmul.f32 %v2440_v3, %v3000_v37 }
 0x4fb   : > { %v2442_v28 = vpop.eup %2441 }
 0x4fc   : > { %v1372_v35 = vmul.f32 %v2442_v28, %v2422_v8  ;;  %v1371_v44 = vmul.f32 %v2442_v28, %v3006_v1 }
 0x4fe   : > { %v1374_v46 = vpack.c.bf16 %v1372_v35, %v1370_v18  ;;  %v1373_v16 = vpack.c.bf16 %v1371_v44, %v1369_v2 }
 0x500   : > { %1471 = vmatprep.mubr.bf16.mxu0 %v1374_v46 }
 0x501   : > { %1472 = vmatmul.mubr.bf16.vlgmr.msra.gmra.mxu0 %v1373_v16 }
 0x502   : > { %2213 = vmatpush3.bf16.msra.mxu0 %v2953_v33 }
 0x503   : > { %2214 = vmatprep.subr.bf16.mxu0 %v2960_v19 }
 0x506   : > { %2215 = vmatpush3.bf16.msra.mxu0 %v2956_v36 }
 0x507   : > { %2216 = vmatprep.subr.bf16.mxu0 %v2964_v43 }
 0x50a   : > { %2217 = vmatpush3.bf16.msra.mxu0 %v2958_v47 }
 0x50b   : > { %2218 = vmatprep.subr.bf16.mxu0 %v2966_v58 }
 0x50e   : > { %2219 = vmatpush3.bf16.msra.mxu0 %v2962_v34 }
 0x50f   : > { %2220 = vmatprep.subr.bf16.mxu0 %v2970_v59 }
 0x512   : > { %2221 = vmatpush3.bf16.msra.mxu0 %v2968_v60 }
 0x513   : > { %2222 = vmatprep.subr.bf16.mxu0 %v2974_v52 }
 0x516   : > { %2223 = vmatpush3.bf16.msra.mxu0 %v2972_v61 }
 0x517   : > { %2224 = vmatprep.subr.bf16.mxu0 %v2998_v31 }
 0x51a   : > { %2225 = vmatpush3.bf16.msra.mxu0 %v3013_v54 }
 0x51b   : > { %2226 = vmatprep.subr.bf16.mxu0 %v1577_v14 }
 0x51e   : > { %2227 = vmatpush3.bf16.msra.mxu0 %v1561_v5  ;;  %v1551_v33 = vpop.xlane.xlu1 %1550 }
 0x51f   : > { %2313 = vmatprep.subr.bf16.mxu0 %v2465_v0  ;;  %2443 = vrcp.f32 %v1551_v33 }
 0x522   : > { %v1720_v36 = vpop.xlane.xlu1 %1719  ;;  %v1548_v47 = vpop.xlane.xlu0 %1547 }
 0x523   : > { %2445 = vrcp.f32 %v1548_v47 }
 0x524   : > { %2447 = vrcp.f32 %v1720_v36  ;;  %v2129_v36 = vld [vmem:[%s3117_s10] ss:$0 sm:$0xff] }
 0x526   : > { %v1746_v19 = vpop.permute.xlu1 %1745  ;;  %v1717_v34 = vpop.xlane.xlu0 %1716 }
 0x527   : > { %2449 = vrcp.f32 %v1717_v34  ;;  %2248 = vmatprep.subr.bf16.mxu1 %v1746_v19  ;;  %v2455_v34 = vld [vmem:[%s2592_s29] sm:$0xff] }
 0x52a   : > { %v1730_v43 = vpop.permute.xlu0 %1729 }
 0x52b   : > { %2249 = vmatpush3.bf16.msra.mxu1 %v1730_v43 }
 0x52c   : > { %v2444_v58 = vpop.eup %2443 }
 0x52d   : > { %v1557_v52 = vmul.f32 %v2444_v58, %v3021_v4  ;;  %v1556_v37 = vmul.f32 %v2444_v58, %v3019_v25 }
 0x530   : > { %v2446_v60 = vpop.eup %2445 }
 0x531   : > { %v2448_v59 = vpop.eup %2447  ;;  %v1555_v61 = vmul.f32 %v2446_v60, %v2434_v6  ;;  %v1554_v31 = vmul.f32 %v2446_v60, %v2432_v27 }
 0x532   : > { %v1726_v56 = vmul.f32 %v2448_v59, %v3027_v24  ;;  %v1725_v39 = vmul.f32 %v2448_v59, %v3023_v9 }
 0x533   : > { %v1559_v1 = vpack.c.bf16 %v1557_v52, %v1555_v61  ;;  %v1558_v8 = vpack.c.bf16 %v1556_v37, %v1554_v31  ;;  %v2456_v61 = vld [vmem:[%s2592_s29 + $0x8] sm:$0xff] }
 0x534   : > { %v2450_v11 = vpop.eup %2449 }
 0x535   : > { %v1724_v45 = vmul.f32 %v2450_v11, %v2438_v29  ;;  %v1723_v57 = vmul.f32 %v2450_v11, %v3031_v26  ;;  %1640 = vmatprep.mubr.bf16.mxu0 %v1559_v1 }
 0x536   : > { %1641 = vmatmul.mubr.bf16.vlgmr.msra.gmra.mxu0 %v1558_v8 }
 0x537   : > { %v1728_v41 = vpack.c.bf16 %v1726_v56, %v1724_v45  ;;  %v1727_v54 = vpack.c.bf16 %v1725_v39, %v1723_v57  ;;  %2321 = vmatprep.mubr.msk.bf16.mxu0 %vm2467_vm0, %v2465_v0  ;;  %2314 = vmatpush3.bf16.msra.mxu0 %v2399_v21 }
 0x538   : > { %2315 = vmatprep.subr.bf16.mxu0 %v2465_v0 }
 0x539   : > { %1809 = vmatprep.mubr.bf16.mxu1 %v1728_v41 }
 0x53a   : > { %1810 = vmatmul.mubr.bf16.vlgmr.msra.gmra.mxu1 %v1727_v54 }
 0x53b   : > { %2316 = vmatpush3.bf16.msra.mxu0 %v2400_v63 }
 0x53c   : > { %2317 = vmatprep.subr.bf16.mxu0 %v2465_v0 }
 0x53f   : > { %2318 = vmatpush3.bf16.msra.mxu0 %v2401_v15  ;;  %v2136_v15 = vld [vmem:[%s3119_s12] ss:$0 sm:$0xff] }
 0x540   : > { %2319 = vmatprep.subr.bf16.mxu0 %v2465_v0 }
 0x543   : > { %2320 = vmatpush3.bf16.msra.mxu0 %v2402_v20 }
 0x5c1   : > { %v2206_v40 = vpop.f32.mrf.mxu0 }
 0x5c3   : > { %v2207_v23 = vpop.f32.mrf.mxu0 }
 0x5c4   : > { %v2208_v48 = vadd.f32 %v2207_v23, %v2206_v40 }
 0x5c5   : > { %v2209_v42 = vpop.f32.mrf.mxu0 }
 0x5c7   : > { %v2210_v55 = vpop.f32.mrf.mxu0 }
 0x5c8   : > { %v2211_v50 = vadd.f32 %v2210_v55, %v2209_v42 }
 0x5ca   : > { %v2344_v22 = vpack.i.bf16 %v2211_v50, %v2208_v48  ;;  %v2135_v50 = vld [vmem:[%s3118_s11] ss:$0 sm:$0xff] }
 0x5cc   : > { %2345 = vrot.lane.b32.xlu1 %v2344_v22, %s2471_s21 }
 0x5f6   : > { %v2228_v38 = vpop.f32.mrf.mxu0 }
 0x5f8   : > { %v2229_v49 = vpop.f32.mrf.mxu0 }
 0x5f9   : > { %v2230_v9 = vadd.f32 %v2229_v49, %v2228_v38 }
 0x5fa   : > { %v2250_v51 = vpop.f32.mrf.mxu1  ;;  %v2231_v7 = vpop.f32.mrf.mxu0 }
 0x5fc   : > { %v2251_v25 = vpop.f32.mrf.mxu1  ;;  %v2232_v4 = vpop.f32.mrf.mxu0 }
 0x5fd   : > { %v2233_v10 = vadd.f32 %v2232_v4, %v2231_v7  ;;  %v2252_v12 = vadd.f32 %v2251_v25, %v2250_v51 }
 0x5fe   : > { %v2253_v24 = vpop.f32.mrf.mxu1 }
 0x5ff   : > { %v2349_v27 = vpack.i.bf16 %v2233_v10, %v2230_v9 }
 0x600   : > { %v2254_v6 = vpop.f32.mrf.mxu1 }
 0x601   : > { %v2255_v13 = vadd.f32 %v2254_v6, %v2253_v24  ;;  %2350 = vrot.lane.b32.xlu0 %v2349_v27, %s2472_s19 }
 0x603   : > { %v2354_v0 = vpack.i.bf16 %v2255_v13, %v2252_v12 }
 0x605   : > { %2355 = vrot.lane.b32.xlu1 %v2354_v0, %s2473_s28 }
 0x63e   : > { %v2346_v26 = vpop.permute.xlu1 %2345 }
 0x63f   : > { %v2348_v29 = vunpack.i.h.bf16 %v2346_v26  ;;  %v2347_v17 = vunpack.i.l.bf16 %v2346_v26 }
 0x641   : > { %v1842_v18 = vsel %vm1174_vm2, %v2976_v62, %v2347_v17  ;;  %v1843_v35 = vsel %vm1174_vm2, %v2978_v53, %v2348_v29 }
 0x673   : > { %v2351_v32 = vpop.permute.xlu0 %2350 }
 0x674   : > { %v2353_v30 = vunpack.i.h.bf16 %v2351_v32  ;;  %v2352_v3 = vunpack.i.l.bf16 %v2351_v32 }
 0x676   : > { %v1845_v46 = vsel %vm1844_vm3, %v1842_v18, %v2352_v3  ;;  %v1846_v16 = vsel %vm1844_vm3, %v1843_v35, %v2353_v30 }
 0x677   : > { %v2356_v28 = vpop.permute.xlu1 %2355 }
 0x678   : > { %v2358_v2 = vunpack.i.h.bf16 %v2356_v28  ;;  %v2357_v44 = vunpack.i.l.bf16 %v2356_v28 }
 0x67a   : > { %v1848_v14 = vsel %vm1847_vm4, %v1845_v46, %v2357_v44  ;;  %v1849_v5 = vsel %vm1847_vm4, %v1846_v16, %v2358_v2 }
 0x67b   : > { %v1850_v33 = vpack.c.bf16 %v1849_v5, %v1848_v14 }
 0x67d   : > { %2322 = vmatmul.mubr.msk.bf16.vlgmr.msra.gmra.mxu0 %vm564_vm1, %v1850_v33 }
 0x73d   : > { %v1918_v47 = vpop.f32.mrf.mxu0 }
 0x73e   : > { %v1919_v19 = vadd.f32 %v2129_v36, %v1918_v47 }
 0x73f   : > { %v2323_v62 = vpop.f32.mrf.mxu0 }
 0x740   : > { %v1925_v43 = vadd.f32 %v2455_v34, %v1919_v19 }
 0x741   : > { %v1921_v53 = vpop.f32.mrf.mxu0 }
 0x742   : > { %v1922_v58 = vadd.f32 %v2129_v36, %v1921_v53  ;;  %v1929_v60 = vsel %vm564_vm1, %v1925_v43, 0.0 }
 0x743   : > { %1930 = vadd.xlane.f32.xlu0 %v1929_v60  ;;  %v2324_v59 = vpop.f32.mrf.mxu0 }
 0x744   : > { %v1926_v52 = vadd.f32 %v2456_v61, %v1922_v58 }
 0x746   : > { %v1932_v31 = vsel %vm564_vm1, %v1926_v52, 0.0 }
 0x747   : > { %1933 = vadd.xlane.f32.xlu1 %v1932_v31 }
 0x7cc   : > { %v1931_v37 = vpop.xlane.xlu0 %1930 }
 0x7cd   : > { %v1936_v11 = vmul.f32 0.015625, %v1931_v37 }
 0x7cf   : > { %v1938_v1 = vsub.f32 %v1925_v43, %v1936_v11 }
 0x7d0   : > { %v1934_v8 = vpop.xlane.xlu1 %1933 }
 0x7d1   : > { %v1937_v45 = vmul.f32 0.015625, %v1934_v8  ;;  %v1940_v56 = vmul.f32 %v1938_v1, %v1938_v1 }
 0x7d3   : > { %v1939_v57 = vsub.f32 %v1926_v52, %v1937_v45  ;;  %v1942_v39 = vsel %vm564_vm1, %v1940_v56, 0.0 }
 0x7d4   : > { %1943 = vadd.xlane.f32.xlu0 %v1942_v39 }
 0x7d5   : > { %v1941_v41 = vmul.f32 %v1939_v57, %v1939_v57 }
 0x7d7   : > { %v1945_v54 = vsel %vm564_vm1, %v1941_v41, 0.0 }
 0x7d8   : > { %1946 = vadd.xlane.f32.xlu0 %v1945_v54 }
 0x85d   : > { %v1944_v40 = vpop.xlane.xlu0 %1943 }
 0x85e   : > { %v1948_v21 = vmul.f32 0.015625, %v1944_v40 }
 0x860   : > { %v1950_v23 = vadd.f32 1e-05, %v1948_v21 }
 0x861   : > { %v1947_v63 = vpop.xlane.xlu0 %1946 }
 0x862   : > { %2451 = vrsqrt.f32 %v1950_v23  ;;  %v1949_v42 = vmul.f32 0.015625, %v1947_v63 }
 0x864   : > { %v1951_v55 = vadd.f32 1e-05, %v1949_v42 }
 0x866   : > { %2453 = vrsqrt.f32 %v1951_v55 }
 0x86f   : > { %v2452_v48 = vpop.eup %2451 }
 0x870   : > { %v1954_v22 = vmul.f32 %v2452_v48, %v1938_v1 }
 0x872   : > { %v1962_v38 = vmul.f32 %v2135_v50, %v1954_v22 }
 0x873   : > { %v2454_v49 = vpop.eup %2453 }
 0x874   : > { %v1970_v20 = vadd.f32 %v2136_v15, %v1962_v38  ;;  %v1955_v51 = vmul.f32 %v2454_v49, %v1939_v57 }
 0x876   : > { %1972 = vst.msk [vmem:[%s480_s17] sm:$0xff] %vm564_vm1, %v1970_v20  ;;  %v1963_v7 = vmul.f32 %v2135_v50, %v1955_v51 }
 0x878   : > { %v1971_v25 = vadd.f32 %v2136_v15, %v1963_v7 }
 0x87a   : > { %1973 = vst.msk [vmem:[%s480_s17 + $0x8] sm:$0xff] %vm564_vm1, %v1971_v25 }
 0x87b PF: > { %s23_s25 = sadd.s32 1, %s2463_s25  }
 0x87c   : > { %p20_p4 = scmp.ge.s32.totalorder %s23_s25, 4  }
 0x87e   :  { %22 = sbr.rel (!%p20_p4) target bundleno = 1 (0x1), region = 108 }

</bundles_post_ra>
